<compile_context>
chip_gen: v7x
topology: tpu7x:2x2x1
jax: 0.10.0
libtpu: 0.0.40
codegen_flags: <defaults>
</compile_context>

<pallas_src>
import functools

import jax
import jax.numpy as jnp
from jax.experimental import pallas as pl
from jax.experimental.pallas import tpu as pltpu


# ---------------------------------------------------------------------------
# Fused kernel: whole AuxiliaryHeadCIFAR2 forward for a batch tile of B images.
# Every operand / intermediate is lane-dense; all heavy work is MXU GEMMs with
# M = B; all intermediates stay in vregs/VMEM.
# ---------------------------------------------------------------------------
def aux_head_kernel(x_ref, m1_ref, b1_ref, w2_ref, b2_ref, wc_ref, bc_ref, o_ref):
    # Leading ReLU (commutes with the wrapper-side bf16 cast).
    x = jnp.maximum(x_ref[...], 0)                                   # (B, HW*Cin) bf16

    # AvgPool2d(7, s=3) + Conv2d(Cin->128, 1x1) + BN scale, folded into one
    # (HW*Cin, 16*128) matrix: a single lane-dense GEMM with M = B.
    h1 = jnp.dot(x, m1_ref[...], preferred_element_type=jnp.float32)
    h1 = jnp.maximum(h1 + b1_ref[...], 0.0)                          # (B, 16*128) f32

    # AvgPool2d(4): mean over the 16 pooled positions.  Positions live in
    # 128-lane groups -> 15 whole-vreg adds on the VPU, no relayout, no MXU.
    p2 = h1[:, 0:128]
    for o in range(1, 16):
        p2 = p2 + h1[:, o * 128:(o + 1) * 128]
    p2 = p2 * (1.0 / 16.0)                                           # (B, 128)

    # Conv2d(128->768, 1x1) with folded BN, then ReLU.
    h2 = jnp.dot(p2.astype(jnp.bfloat16), w2_ref[...],
                 preferred_element_type=jnp.float32) + b2_ref[...]
    h2 = jnp.maximum(h2, 0.0)                                        # (B, 768)

    # Classifier: Dropout(0) == identity; Linear(768 -> num_classes) with the
    # class axis zero-padded to 128 so the store is a full unmasked lane tile.
    o_ref[...] = (jnp.dot(h2.astype(jnp.bfloat16), wc_ref[...],
                          preferred_element_type=jnp.float32) + bc_ref[...])


# ---------------------------------------------------------------------------
# Host-side helpers (run once under jit; become constants / tiny XLA ops)
# ---------------------------------------------------------------------------
def _avgpool_matrix(H, W, K, stride):
    """(OH*OW, H*W) matrix implementing AvgPool2d(K, stride), no padding."""
    OH = (H - K) // stride + 1
    OW = (W - K) // stride + 1
    rows = []
    for oh in range(OH):
        for ow in range(OW):
            row = [0.0] * (H * W)
            for kr in range(K):
                for kc in range(K):
                    row[(oh * stride + kr) * W + (ow * stride + kc)] = 1.0 / (K * K)
            rows.append(row)
    return jnp.asarray(rows, dtype=jnp.float32)


def _fold_bn(w, bn, eps=1e-5):
    """Fold inference-mode BatchNorm into the preceding (bias-free) 1x1 conv."""
    gamma, beta, mean, var = bn
    scale = gamma / jnp.sqrt(var + eps)
    return w * scale[None, :], (beta - mean * scale).reshape(1, -1)


def _round_up(x, m):
    return (x + m - 1) // m * m


def _pick_batch_tile(N):
    # >= 256 rows feeds the 256-wide MXU (v6e/v7x) and amortizes per-step cost;
    # for small N just round up to a sublane multiple and run one grid step.
    if N >= 256:
        return 256
    return max(8, _round_up(N, 8))


def auxiliary_head_forward(x_nchw, params, *, num_classes):
    N, Cin, H, W = x_nchw.shape
    assert (H, W) == (16, 16), "AuxiliaryHeadCIFAR2 assumes 16x16 inputs"
    HW = H * W
    KIN = HW * Cin                      # lane-dense input width (multiple of 128)
    NPOOL, C1, C2 = 16, 128, 768
    NC_pad = _round_up(max(num_classes, 1), 128)

    B = _pick_batch_tile(N)
    N_pad = _round_up(N, B)

    # Input repack: NCHW -> (N, H*W*Cin) (channels-last per pixel), bf16,
    # batch zero-padded to a multiple of the batch tile.
    x = jnp.transpose(x_nchw, (0, 2, 3, 1)).reshape(N, KIN).astype(jnp.bfloat16)
    if N_pad != N:
        x = jnp.pad(x, ((0, N_pad - N), (0, 0)))

    # Fold BN scale/bias into the 1x1 convs; fold pool-1 (linear map) into
    # conv1 so the whole first half is one (HW*Cin, 16*128) bf16 matrix.
    pool1 = _avgpool_matrix(H, W, K=7, stride=3)                      # (16, 256)
    w1, b1 = _fold_bn(params["conv1_w"], params["bn1"])               # (Cin,128),(1,128)
    m1 = jnp.einsum("os,ck->scok", pool1, w1).reshape(KIN, NPOOL * C1)
    m1 = m1.astype(jnp.bfloat16)
    b1_t = jnp.tile(b1, (1, NPOOL))                                   # (1, 16*128) f32

    w2, b2 = _fold_bn(params["conv2_w"], params["bn2"])               # (128,768),(1,768)
    w2 = w2.astype(jnp.bfloat16)

    wc = jnp.zeros((C2, NC_pad), jnp.float32).at[:, :num_classes].set(params["fc_w"])
    wc = wc.astype(jnp.bfloat16)                                      # (768, NC_pad)
    bc = jnp.zeros((1, NC_pad), jnp.float32).at[0, :num_classes].set(params["fc_b"])

    flops = 2 * N_pad * (KIN * NPOOL * C1 + C1 * C2 + C2 * NC_pad)
    bytes_accessed = (N_pad * KIN * 2                    # x (bf16)
                      + KIN * NPOOL * C1 * 2             # m1
                      + C1 * C2 * 2 + C2 * NC_pad * 2    # w2, wc
                      + (NPOOL * C1 + C2 + NC_pad) * 4   # biases
                      + N_pad * NC_pad * 4)              # output

    out = pl.pallas_call(
        aux_head_kernel,
        out_shape=jax.ShapeDtypeStruct((N_pad, NC_pad), jnp.float32),
        grid=(N_pad // B,),
        in_specs=[
            pl.BlockSpec((B, KIN), lambda n: (n, 0)),              # image batch tile
            pl.BlockSpec((KIN, NPOOL * C1), lambda n: (0, 0)),     # pool1 (x) conv1+BN
            pl.BlockSpec((1, NPOOL * C1), lambda n: (0, 0)),       # bn1 bias (tiled)
            pl.BlockSpec((C1, C2), lambda n: (0, 0)),              # conv2 (+BN scale)
            pl.BlockSpec((1, C2), lambda n: (0, 0)),               # bn2 bias
            pl.BlockSpec((C2, NC_pad), lambda n: (0, 0)),          # fc weight (padded)
            pl.BlockSpec((1, NC_pad), lambda n: (0, 0)),           # fc bias  (padded)
        ],
        out_specs=pl.BlockSpec((B, NC_pad), lambda n: (n, 0)),
        compiler_params=pltpu.CompilerParams(
            dimension_semantics=("parallel",)),
        cost_estimate=pl.CostEstimate(flops=flops, transcendentals=0,
                                      bytes_accessed=bytes_accessed),
    )(x, m1, b1_t, w2, b2, wc, bc)

    return out[:N, :num_classes]


# ---------------------------------------------------------------------------
# Deterministic parameter init + pure-JAX reference for a sanity check
# ---------------------------------------------------------------------------
def init_params(key, C, num_classes):
    ks = jax.random.split(key, 8)

    def bn(c, kg, kb):
        gamma = 1.0 + 0.1 * jax.random.normal(kg, (c,), jnp.float32)
        beta = 0.1 * jax.random.normal(kb, (c,), jnp.float32)
        running_mean = jnp.zeros((c,), jnp.float32)
        running_var = jnp.ones((c,), jnp.float32)
        return (gamma, beta, running_mean, running_var)

    return dict(
        conv1_w=0.1 * jax.random.normal(ks[0], (C, 128), jnp.float32),
        bn1=bn(128, ks[1], ks[2]),
        conv2_w=0.1 * jax.random.normal(ks[3], (128, 768), jnp.float32),
        bn2=bn(768, ks[4], ks[5]),
        fc_w=0.1 * jax.random.normal(ks[6], (768, num_classes), jnp.float32),
        fc_b=0.1 * jax.random.normal(ks[7], (num_classes,), jnp.float32),
    )


def reference_forward(x_nchw, params, *, num_classes):
    """Pure-JAX f32 reference of AuxiliaryHeadCIFAR2.forward (inference-mode BN)."""
    x = jnp.maximum(x_nchw, 0.0)                                         # ReLU
    # AvgPool2d(7, stride=3, padding=0): 16x16 -> 4x4 (explicit windows)
    wins = [x[:, :, oh * 3:oh * 3 + 7, ow * 3:ow * 3 + 7].mean(axis=(2, 3))
            for oh in range(4) for ow in range(4)]                       # 16 x (N, C)
    p1 = jnp.stack(wins, axis=1)                                         # (N, 16, C)
    w1, b1 = _fold_bn(params["conv1_w"], params["bn1"])
    h1 = jnp.maximum(jnp.einsum("noc,ck->nok", p1, w1) + b1, 0.0)        # (N, 16, 128)
    p2 = h1.mean(axis=1)                                                 # AvgPool2d(4)
    w2, b2 = _fold_bn(params["conv2_w"], params["bn2"])
    h2 = jnp.maximum(p2 @ w2 + b2, 0.0)                                  # (N, 768)
    return h2 @ params["fc_w"] + params["fc_b"][None, :]                 # (N, nc)


# ---------------------------------------------------------------------------
if __name__ == "__main__":
    N, Cin, H, W = 2, 4, 16, 16
    num_classes = 10

    key = jax.random.PRNGKey(0)
    kx, kp = jax.random.split(key)
    x = jax.random.normal(kx, (N, Cin, H, W), jnp.float32)   # NCHW, like PyTorch
    params = init_params(kp, Cin, num_classes)

    fwd = jax.jit(functools.partial(auxiliary_head_forward, num_classes=num_classes))
    out = jax.block_until_ready(fwd(x, params))

    assert out.shape == (N, num_classes), out.shape
    assert bool(jnp.all(jnp.isfinite(out)))

    ref = reference_forward(x, params, num_classes=num_classes)
    max_diff = float(jnp.max(jnp.abs(out - ref)))
    assert bool(jnp.allclose(out, ref, rtol=2e-2, atol=2e-2)), (
        "max |diff| = %g" % max_diff)

    print("KERNEL_OK")
</pallas_src>

<mosaic_0001>
module attributes {stable_mosaic.version = 11 : i64} {
  func.func @aux_head_kernel(%arg0: i32, %arg1: memref<8x1024xbf16, #tpu.memory_space<vmem>>, %arg2: memref<1024x2048xbf16, #tpu.memory_space<vmem>>, %arg3: memref<1x2048xf32, #tpu.memory_space<vmem>>, %arg4: memref<128x768xbf16, #tpu.memory_space<vmem>>, %arg5: memref<1x768xf32, #tpu.memory_space<vmem>>, %arg6: memref<768x128xbf16, #tpu.memory_space<vmem>>, %arg7: memref<1x128xf32, #tpu.memory_space<vmem>>, %arg8: memref<8x128xf32, #tpu.memory_space<vmem>>) attributes {dimension_semantics = [#tpu.dimension_semantics<parallel>], iteration_bounds = array<i64: 1>, scalar_prefetch = 0 : i64, scratch_operands = 0 : i64, tpu.core_type = #tpu.core_type<tc>, window_params = [{transform_indices = @transform_0, window_bounds = array<i64: 8, 1024>}, {pipeline_mode = #tpu.pipeline_mode<synchronous>, transform_indices = @transform_1, window_bounds = array<i64: 1024, 2048>}, {pipeline_mode = #tpu.pipeline_mode<synchronous>, transform_indices = @transform_2, window_bounds = array<i64: 1, 2048>}, {pipeline_mode = #tpu.pipeline_mode<synchronous>, transform_indices = @transform_3, window_bounds = array<i64: 128, 768>}, {pipeline_mode = #tpu.pipeline_mode<synchronous>, transform_indices = @transform_4, window_bounds = array<i64: 1, 768>}, {pipeline_mode = #tpu.pipeline_mode<synchronous>, transform_indices = @transform_5, window_bounds = array<i64: 768, 128>}, {pipeline_mode = #tpu.pipeline_mode<synchronous>, transform_indices = @transform_6, window_bounds = array<i64: 1, 128>}, {transform_indices = @transform_7, window_bounds = array<i64: 8, 128>}]} {
    %c0 = arith.constant 0 : index
    %c0_0 = arith.constant 0 : index
    %0 = vector.load %arg1[%c0, %c0_0] : memref<8x1024xbf16, #tpu.memory_space<vmem>>, vector<8x1024xbf16>
    %cst = arith.constant 0.000000e+00 : bf16
    %1 = vector.broadcast %cst : bf16 to vector<8x1024xbf16>
    %2 = arith.maximumf %0, %1 : vector<8x1024xbf16>
    %c0_1 = arith.constant 0 : index
    %c0_2 = arith.constant 0 : index
    %3 = vector.load %arg2[%c0_1, %c0_2] : memref<1024x2048xbf16, #tpu.memory_space<vmem>>, vector<1024x2048xbf16>
    %cst_3 = arith.constant dense<0.000000e+00> : vector<8x2048xf32>
    %4 = tpu.matmul %2, %3, %cst_3 {dimension_numbers = #tpu.dot_dimension_numbers<[1], [0], [0], [1], [0, 0, 1, 1], [], []>} : vector<8x1024xbf16>, vector<1024x2048xbf16>, vector<8x2048xf32> -> vector<8x2048xf32>
    %c0_4 = arith.constant 0 : index
    %c0_5 = arith.constant 0 : index
    %5 = vector.load %arg3[%c0_4, %c0_5] : memref<1x2048xf32, #tpu.memory_space<vmem>>, vector<1x2048xf32>
    %6 = vector.broadcast %5 : vector<1x2048xf32> to vector<8x2048xf32>
    %7 = arith.addf %4, %6 : vector<8x2048xf32>
    %cst_6 = arith.constant 0.000000e+00 : f32
    %8 = vector.broadcast %cst_6 : f32 to vector<8x2048xf32>
    %9 = arith.maximumf %7, %8 : vector<8x2048xf32>
    %10 = vector.extract_strided_slice %9 {offsets = [0, 0], sizes = [8, 128], strides = [1, 1]} : vector<8x2048xf32> to vector<8x128xf32>
    %11 = vector.extract_strided_slice %9 {offsets = [0, 128], sizes = [8, 128], strides = [1, 1]} : vector<8x2048xf32> to vector<8x128xf32>
    %12 = arith.addf %10, %11 : vector<8x128xf32>
    %13 = vector.extract_strided_slice %9 {offsets = [0, 256], sizes = [8, 128], strides = [1, 1]} : vector<8x2048xf32> to vector<8x128xf32>
    %14 = arith.addf %12, %13 : vector<8x128xf32>
    %15 = vector.extract_strided_slice %9 {offsets = [0, 384], sizes = [8, 128], strides = [1, 1]} : vector<8x2048xf32> to vector<8x128xf32>
    %16 = arith.addf %14, %15 : vector<8x128xf32>
    %17 = vector.extract_strided_slice %9 {offsets = [0, 512], sizes = [8, 128], strides = [1, 1]} : vector<8x2048xf32> to vector<8x128xf32>
    %18 = arith.addf %16, %17 : vector<8x128xf32>
    %19 = vector.extract_strided_slice %9 {offsets = [0, 640], sizes = [8, 128], strides = [1, 1]} : vector<8x2048xf32> to vector<8x128xf32>
    %20 = arith.addf %18, %19 : vector<8x128xf32>
    %21 = vector.extract_strided_slice %9 {offsets = [0, 768], sizes = [8, 128], strides = [1, 1]} : vector<8x2048xf32> to vector<8x128xf32>
    %22 = arith.addf %20, %21 : vector<8x128xf32>
    %23 = vector.extract_strided_slice %9 {offsets = [0, 896], sizes = [8, 128], strides = [1, 1]} : vector<8x2048xf32> to vector<8x128xf32>
    %24 = arith.addf %22, %23 : vector<8x128xf32>
    %25 = vector.extract_strided_slice %9 {offsets = [0, 1024], sizes = [8, 128], strides = [1, 1]} : vector<8x2048xf32> to vector<8x128xf32>
    %26 = arith.addf %24, %25 : vector<8x128xf32>
    %27 = vector.extract_strided_slice %9 {offsets = [0, 1152], sizes = [8, 128], strides = [1, 1]} : vector<8x2048xf32> to vector<8x128xf32>
    %28 = arith.addf %26, %27 : vector<8x128xf32>
    %29 = vector.extract_strided_slice %9 {offsets = [0, 1280], sizes = [8, 128], strides = [1, 1]} : vector<8x2048xf32> to vector<8x128xf32>
    %30 = arith.addf %28, %29 : vector<8x128xf32>
    %31 = vector.extract_strided_slice %9 {offsets = [0, 1408], sizes = [8, 128], strides = [1, 1]} : vector<8x2048xf32> to vector<8x128xf32>
    %32 = arith.addf %30, %31 : vector<8x128xf32>
    %33 = vector.extract_strided_slice %9 {offsets = [0, 1536], sizes = [8, 128], strides = [1, 1]} : vector<8x2048xf32> to vector<8x128xf32>
    %34 = arith.addf %32, %33 : vector<8x128xf32>
    %35 = vector.extract_strided_slice %9 {offsets = [0, 1664], sizes = [8, 128], strides = [1, 1]} : vector<8x2048xf32> to vector<8x128xf32>
    %36 = arith.addf %34, %35 : vector<8x128xf32>
    %37 = vector.extract_strided_slice %9 {offsets = [0, 1792], sizes = [8, 128], strides = [1, 1]} : vector<8x2048xf32> to vector<8x128xf32>
    %38 = arith.addf %36, %37 : vector<8x128xf32>
    %39 = vector.extract_strided_slice %9 {offsets = [0, 1920], sizes = [8, 128], strides = [1, 1]} : vector<8x2048xf32> to vector<8x128xf32>
    %40 = arith.addf %38, %39 : vector<8x128xf32>
    %cst_7 = arith.constant 6.250000e-02 : f32
    %41 = vector.broadcast %cst_7 : f32 to vector<8x128xf32>
    %42 = arith.mulf %40, %41 : vector<8x128xf32>
    %43 = arith.truncf %42 : vector<8x128xf32> to vector<8x128xbf16>
    %c0_8 = arith.constant 0 : index
    %c0_9 = arith.constant 0 : index
    %44 = vector.load %arg4[%c0_8, %c0_9] : memref<128x768xbf16, #tpu.memory_space<vmem>>, vector<128x768xbf16>
    %cst_10 = arith.constant dense<0.000000e+00> : vector<8x768xf32>
    %45 = tpu.matmul %43, %44, %cst_10 {dimension_numbers = #tpu.dot_dimension_numbers<[1], [0], [0], [1], [0, 0, 1, 1], [], []>} : vector<8x128xbf16>, vector<128x768xbf16>, vector<8x768xf32> -> vector<8x768xf32>
    %c0_11 = arith.constant 0 : index
    %c0_12 = arith.constant 0 : index
    %46 = vector.load %arg5[%c0_11, %c0_12] : memref<1x768xf32, #tpu.memory_space<vmem>>, vector<1x768xf32>
    %47 = vector.broadcast %46 : vector<1x768xf32> to vector<8x768xf32>
    %48 = arith.addf %45, %47 : vector<8x768xf32>
    %cst_13 = arith.constant 0.000000e+00 : f32
    %49 = vector.broadcast %cst_13 : f32 to vector<8x768xf32>
    %50 = arith.maximumf %48, %49 : vector<8x768xf32>
    %51 = arith.truncf %50 : vector<8x768xf32> to vector<8x768xbf16>
    %c0_14 = arith.constant 0 : index
    %c0_15 = arith.constant 0 : index
    %52 = vector.load %arg6[%c0_14, %c0_15] : memref<768x128xbf16, #tpu.memory_space<vmem>>, vector<768x128xbf16>
    %cst_16 = arith.constant dense<0.000000e+00> : vector<8x128xf32>
    %53 = tpu.matmul %51, %52, %cst_16 {dimension_numbers = #tpu.dot_dimension_numbers<[1], [0], [0], [1], [0, 0, 1, 1], [], []>} : vector<8x768xbf16>, vector<768x128xbf16>, vector<8x128xf32> -> vector<8x128xf32>
    %c0_17 = arith.constant 0 : index
    %c0_18 = arith.constant 0 : index
    %54 = vector.load %arg7[%c0_17, %c0_18] : memref<1x128xf32, #tpu.memory_space<vmem>>, vector<1x128xf32>
    %55 = vector.broadcast %54 : vector<1x128xf32> to vector<8x128xf32>
    %56 = arith.addf %53, %55 : vector<8x128xf32>
    %c0_19 = arith.constant 0 : index
    %c0_20 = arith.constant 0 : index
    %57 = vector.load %arg8[%c0_19, %c0_20] : memref<8x128xf32, #tpu.memory_space<vmem>>, vector<8x128xf32>
    tpu.vector_store %arg8[%c0_19, %c0_20], %56 {strides = array<i32>} : memref<8x128xf32, #tpu.memory_space<vmem>>, vector<8x128xf32>,
    return
  }
  func.func @transform_0(%arg0: i32) -> (i32, i32) {
    %c0_i32 = arith.constant 0 : i32
    %c0_i32_0 = arith.constant 0 : i32
    return %arg0, %c0_i32 : i32, i32
  }
  func.func @transform_1(%arg0: i32) -> (i32, i32) {
    %c0_i32 = arith.constant 0 : i32
    %c0_i32_0 = arith.constant 0 : i32
    %c0_i32_1 = arith.constant 0 : i32
    return %c0_i32, %c0_i32_0 : i32, i32
  }
  func.func @transform_2(%arg0: i32) -> (i32, i32) {
    %c0_i32 = arith.constant 0 : i32
    %c0_i32_0 = arith.constant 0 : i32
    %c0_i32_1 = arith.constant 0 : i32
    return %c0_i32, %c0_i32_0 : i32, i32
  }
  func.func @transform_3(%arg0: i32) -> (i32, i32) {
    %c0_i32 = arith.constant 0 : i32
    %c0_i32_0 = arith.constant 0 : i32
    %c0_i32_1 = arith.constant 0 : i32
    return %c0_i32, %c0_i32_0 : i32, i32
  }
  func.func @transform_4(%arg0: i32) -> (i32, i32) {
    %c0_i32 = arith.constant 0 : i32
    %c0_i32_0 = arith.constant 0 : i32
    %c0_i32_1 = arith.constant 0 : i32
    return %c0_i32, %c0_i32_0 : i32, i32
  }
  func.func @transform_5(%arg0: i32) -> (i32, i32) {
    %c0_i32 = arith.constant 0 : i32
    %c0_i32_0 = arith.constant 0 : i32
    %c0_i32_1 = arith.constant 0 : i32
    return %c0_i32, %c0_i32_0 : i32, i32
  }
  func.func @transform_6(%arg0: i32) -> (i32, i32) {
    %c0_i32 = arith.constant 0 : i32
    %c0_i32_0 = arith.constant 0 : i32
    %c0_i32_1 = arith.constant 0 : i32
    return %c0_i32, %c0_i32_0 : i32, i32
  }
  func.func @transform_7(%arg0: i32) -> (i32, i32) {
    %c0_i32 = arith.constant 0 : i32
    %c0_i32_0 = arith.constant 0 : i32
    return %arg0, %c0_i32 : i32, i32
  }
}

</mosaic_0001>

<bundles_post_ra>
// kernel: auxiliary_head_forward.1
= control target key start
LH: loop header
LB: loop body
LE: loop exit
PB: predicated region body
PF: predicated region fallthrough
CT: control target
= control target key end

     0   :  { %v10036_v57 = vmov 0   ;;  %s13645_s1 = inlined_call_operand.vmem [shape: bf16[1024,2048], index: 1, kind: input, shape index: {}]   ;;  %s13646_s0 = inlined_call_operand.vmem [shape: bf16[8,1024], index: 0, kind: input, shape index: {}]   ;;  %s13647_s2 = inlined_call_operand.vmem [shape: f32[1,2048], index: 2, kind: input, shape index: {}]   ;;  %s13648_s3 = inlined_call_operand.vmem [shape: bf16[128,768], index: 3, kind: input, shape index: {}]   ;;  %s13649_s5 = inlined_call_operand.vmem [shape: bf16[768,128], index: 5, kind: input, shape index: {}]   ;;  %s13650_s4 = inlined_call_operand.vmem [shape: f32[1,768], index: 4, kind: input, shape index: {}]   ;;  %s13651_s6 = inlined_call_operand.vmem [shape: f32[1,128], index: 6, kind: input, shape index: {}]   ;;  %s13652_s7 = inlined_call_operand.vmem [shape: f32[8,128], index: 7, kind: output, shape index: {}]  }
   0x1   :  { %v35_v0 = vld [vmem:[%s13645_s1] sm:$0xff]  ;;  %v36_v2 = vld [vmem:[%s13645_s1 + $0x8] sm:$0xff] }
   0x2   :  { %v43_v1 = vld [vmem:[%s13645_s1 + $0x40] sm:$0xff]  ;;  %v44_v4 = vld [vmem:[%s13645_s1 + $0x48] sm:$0xff] }
   0x3   :  { %v8616_v3 = vcombine.high %v35_v0, %v43_v1  ;;  %v8615_v5 = vcombine.low %v35_v0, %v43_v1  ;;  %v51_v6 = vld [vmem:[%s13645_s1 + $0x80] sm:$0xff]  ;;  %v8618_v8 = vcombine.high %v36_v2, %v44_v4  ;;  %v8617_v9 = vcombine.low %v36_v2, %v44_v4  ;;  %v52_v11 = vld [vmem:[%s13645_s1 + $0x88] sm:$0xff] }
   0x4   :  { %v59_v7 = vld [vmem:[%s13645_s1 + $0xc0] sm:$0xff]  ;;  %v60_v12 = vld [vmem:[%s13645_s1 + $0xc8] sm:$0xff] }
   0x5   :  { %v8632_v10 = vcombine.high %v51_v6, %v59_v7  ;;  %v67_v13 = vld [vmem:[%s13645_s1 + $0x100] sm:$0xff]  ;;  %6291 = vmatprep.subr.bf16.mxu0 %v8616_v3  ;;  %v8634_v14 = vcombine.high %v52_v11, %v60_v12  ;;  %v68_v16 = vld [vmem:[%s13645_s1 + $0x108] sm:$0xff]  ;;  %6455 = vmatprep.subr.bf16.mxu1 %v8618_v8  ;;  %v8631_v18 = vcombine.low %v51_v6, %v59_v7 }
   0x6   :  { %v75_v15 = vld [vmem:[%s13645_s1 + $0x140] sm:$0xff]  ;;  %v76_v17 = vld [vmem:[%s13645_s1 + $0x148] sm:$0xff]  ;;  %6292 = vmatpush1.bf16.msra.mxu0 %v8615_v5  ;;  %6456 = vmatpush1.bf16.msra.mxu1 %v8617_v9  ;;  %v8633_v19 = vcombine.low %v52_v11, %v60_v12 }
   0x7   :  { %6293 = vmatprep.subr.bf16.mxu0 %v8632_v10  ;;  %v8648_v20 = vcombine.high %v67_v13, %v75_v15  ;;  %6457 = vmatprep.subr.bf16.mxu1 %v8634_v14  ;;  %v8650_v21 = vcombine.high %v68_v16, %v76_v17  ;;  %v83_v22 = vld [vmem:[%s13645_s1 + $0x180] sm:$0xff]  ;;  %v84_v24 = vld [vmem:[%s13645_s1 + $0x188] sm:$0xff]  ;;  %v8647_v26 = vcombine.low %v67_v13, %v75_v15 }
   0x8   :  { %v91_v23 = vld [vmem:[%s13645_s1 + $0x1c0] sm:$0xff]  ;;  %v92_v25 = vld [vmem:[%s13645_s1 + $0x1c8] sm:$0xff]  ;;  %v8649_v27 = vcombine.low %v68_v16, %v76_v17 }
   0x9   :  { %v8664_v28 = vcombine.high %v83_v22, %v91_v23  ;;  %v8666_v29 = vcombine.high %v84_v24, %v92_v25  ;;  %v99_v30 = vld [vmem:[%s13645_s1 + $0x200] sm:$0xff]  ;;  %v100_v32 = vld [vmem:[%s13645_s1 + $0x208] sm:$0xff]  ;;  %v8663_v34 = vcombine.low %v83_v22, %v91_v23  ;;  %v8665_v35 = vcombine.low %v84_v24, %v92_v25 }
   0xa   :  { %6294 = vmatpush1.bf16.msra.mxu0 %v8631_v18  ;;  %6458 = vmatpush1.bf16.msra.mxu1 %v8633_v19  ;;  %v107_v31 = vld [vmem:[%s13645_s1 + $0x240] sm:$0xff]  ;;  %v108_v33 = vld [vmem:[%s13645_s1 + $0x248] sm:$0xff] }
   0xb   :  { %6295 = vmatprep.subr.bf16.mxu0 %v8648_v20  ;;  %6459 = vmatprep.subr.bf16.mxu1 %v8650_v21  ;;  %v8680_v36 = vcombine.high %v99_v30, %v107_v31  ;;  %v8682_v37 = vcombine.high %v100_v32, %v108_v33  ;;  %v115_v38 = vld [vmem:[%s13645_s1 + $0x280] sm:$0xff]  ;;  %v116_v40 = vld [vmem:[%s13645_s1 + $0x288] sm:$0xff]  ;;  %v8679_v42 = vcombine.low %v99_v30, %v107_v31 }
   0xc   :  { %v123_v39 = vld [vmem:[%s13645_s1 + $0x2c0] sm:$0xff]  ;;  %v124_v41 = vld [vmem:[%s13645_s1 + $0x2c8] sm:$0xff]  ;;  %v8681_v43 = vcombine.low %v100_v32, %v108_v33 }
   0xd   :  { %v8696_v44 = vcombine.high %v115_v38, %v123_v39  ;;  %v8698_v45 = vcombine.high %v116_v40, %v124_v41  ;;  %v131_v46 = vld [vmem:[%s13645_s1 + $0x300] sm:$0xff]  ;;  %v132_v48 = vld [vmem:[%s13645_s1 + $0x308] sm:$0xff]  ;;  %v8695_v50 = vcombine.low %v115_v38, %v123_v39  ;;  %v8697_v51 = vcombine.low %v116_v40, %v124_v41 }
   0xe   :  { %6296 = vmatpush1.bf16.msra.mxu0 %v8647_v26  ;;  %6460 = vmatpush1.bf16.msra.mxu1 %v8649_v27  ;;  %v139_v47 = vld [vmem:[%s13645_s1 + $0x340] sm:$0xff]  ;;  %v140_v49 = vld [vmem:[%s13645_s1 + $0x348] sm:$0xff] }
   0xf   :  { %6297 = vmatprep.subr.bf16.mxu0 %v8664_v28  ;;  %6461 = vmatprep.subr.bf16.mxu1 %v8666_v29  ;;  %v8712_v52 = vcombine.high %v131_v46, %v139_v47  ;;  %v27_v53 = vld [vmem:[%s13646_s0] sm:$0xff]  ;;  %v8714_v54 = vcombine.high %v132_v48, %v140_v49  ;;  %v148_v59 = vld [vmem:[%s13645_s1 + $0x388] sm:$0xff]  ;;  %v8711_v61 = vcombine.low %v131_v46, %v139_v47 }
  0x10   :  { %v147_v55 = vld [vmem:[%s13645_s1 + $0x380] sm:$0xff]  ;;  %v10171_v58 = vmax.bf16 %v10036_v57, %v27_v53  ;;  %v156_v60 = vld [vmem:[%s13645_s1 + $0x3c8] sm:$0xff]  ;;  %v8713_v63 = vcombine.low %v132_v48, %v140_v49 }
  0x11   :  { %v155_v56 = vld [vmem:[%s13645_s1 + $0x3c0] sm:$0xff]  ;;  %v8730_v1 = vcombine.high %v148_v59, %v156_v60  ;;  %v164_v4 = vld [vmem:[%s13645_s1 + $0x408] sm:$0xff]  ;;  %v8729_v7 = vcombine.low %v148_v59, %v156_v60 }
  0x12   :  { %6298 = vmatpush1.bf16.msra.mxu0 %v8663_v34  ;;  %6462 = vmatpush1.bf16.msra.mxu1 %v8665_v35  ;;  %v10181_v62 = vcombine.high %v10171_v58, %v10171_v58  ;;  %v8728_v0 = vcombine.high %v147_v55, %v155_v56  ;;  %v163_v2 = vld [vmem:[%s13645_s1 + $0x400] sm:$0xff]  ;;  %v172_v5 = vld [vmem:[%s13645_s1 + $0x448] sm:$0xff]  ;;  %v8727_v6 = vcombine.low %v147_v55, %v155_v56 }
  0x13   :  { %6299 = vmatprep.subr.bf16.mxu0 %v8680_v36  ;;  %6463 = vmatprep.subr.bf16.mxu1 %v8682_v37  ;;  %v171_v3 = vld [vmem:[%s13645_s1 + $0x440] sm:$0xff]  ;;  %v8746_v9 = vcombine.high %v164_v4, %v172_v5  ;;  %v180_v12 = vld [vmem:[%s13645_s1 + $0x488] sm:$0xff]  ;;  %v8745_v15 = vcombine.low %v164_v4, %v172_v5 }
  0x14   :  { %6323 = vmatprep.mubr.bf16.mxu0 %v10181_v62  ;;  %6487 = vmatprep.mubr.bf16.mxu1 %v10181_v62  ;;  %v8744_v8 = vcombine.high %v163_v2, %v171_v3  ;;  %v179_v10 = vld [vmem:[%s13645_s1 + $0x480] sm:$0xff]  ;;  %v188_v13 = vld [vmem:[%s13645_s1 + $0x4c8] sm:$0xff]  ;;  %v8743_v14 = vcombine.low %v163_v2, %v171_v3 }
  0x15   :  { %v187_v11 = vld [vmem:[%s13645_s1 + $0x4c0] sm:$0xff]  ;;  %v8762_v17 = vcombine.high %v180_v12, %v188_v13  ;;  %v196_v20 = vld [vmem:[%s13645_s1 + $0x508] sm:$0xff]  ;;  %v8761_v23 = vcombine.low %v180_v12, %v188_v13 }
  0x16   :  { %6300 = vmatpush1.bf16.msra.mxu0 %v8679_v42  ;;  %6464 = vmatpush1.bf16.msra.mxu1 %v8681_v43  ;;  %v8760_v16 = vcombine.high %v179_v10, %v187_v11  ;;  %v195_v18 = vld [vmem:[%s13645_s1 + $0x500] sm:$0xff]  ;;  %v204_v21 = vld [vmem:[%s13645_s1 + $0x548] sm:$0xff]  ;;  %v8759_v22 = vcombine.low %v179_v10, %v187_v11 }
  0x17   :  { %6301 = vmatprep.subr.bf16.mxu0 %v8696_v44  ;;  %6465 = vmatprep.subr.bf16.mxu1 %v8698_v45  ;;  %v203_v19 = vld [vmem:[%s13645_s1 + $0x540] sm:$0xff]  ;;  %v8778_v25 = vcombine.high %v196_v20, %v204_v21  ;;  %v212_v28 = vld [vmem:[%s13645_s1 + $0x588] sm:$0xff]  ;;  %v8777_v31 = vcombine.low %v196_v20, %v204_v21 }
  0x18   :  { %v8776_v24 = vcombine.high %v195_v18, %v203_v19  ;;  %v211_v26 = vld [vmem:[%s13645_s1 + $0x580] sm:$0xff]  ;;  %v220_v29 = vld [vmem:[%s13645_s1 + $0x5c8] sm:$0xff]  ;;  %v8775_v30 = vcombine.low %v195_v18, %v203_v19 }
  0x19   :  { %v219_v27 = vld [vmem:[%s13645_s1 + $0x5c0] sm:$0xff]  ;;  %v8794_v33 = vcombine.high %v212_v28, %v220_v29  ;;  %v228_v36 = vld [vmem:[%s13645_s1 + $0x608] sm:$0xff]  ;;  %v8793_v39 = vcombine.low %v212_v28, %v220_v29 }
  0x1a   :  { %6302 = vmatpush1.bf16.msra.mxu0 %v8695_v50  ;;  %6466 = vmatpush1.bf16.msra.mxu1 %v8697_v51  ;;  %v8792_v32 = vcombine.high %v211_v26, %v219_v27  ;;  %v227_v34 = vld [vmem:[%s13645_s1 + $0x600] sm:$0xff]  ;;  %v236_v37 = vld [vmem:[%s13645_s1 + $0x648] sm:$0xff]  ;;  %v8791_v38 = vcombine.low %v211_v26, %v219_v27 }
  0x1b   :  { %6303 = vmatprep.subr.bf16.mxu0 %v8712_v52  ;;  %6467 = vmatprep.subr.bf16.mxu1 %v8714_v54  ;;  %v235_v35 = vld [vmem:[%s13645_s1 + $0x640] sm:$0xff]  ;;  %v8810_v41 = vcombine.high %v228_v36, %v236_v37  ;;  %v244_v44 = vld [vmem:[%s13645_s1 + $0x688] sm:$0xff]  ;;  %v8809_v47 = vcombine.low %v228_v36, %v236_v37 }
  0x1c   :  { %v8808_v40 = vcombine.high %v227_v34, %v235_v35  ;;  %v243_v42 = vld [vmem:[%s13645_s1 + $0x680] sm:$0xff]  ;;  %v252_v45 = vld [vmem:[%s13645_s1 + $0x6c8] sm:$0xff]  ;;  %v8807_v46 = vcombine.low %v227_v34, %v235_v35 }
  0x1d   :  { %v251_v43 = vld [vmem:[%s13645_s1 + $0x6c0] sm:$0xff]  ;;  %v8826_v49 = vcombine.high %v244_v44, %v252_v45  ;;  %v260_v52 = vld [vmem:[%s13645_s1 + $0x708] sm:$0xff]  ;;  %v8825_v55 = vcombine.low %v244_v44, %v252_v45 }
  0x1e   :  { %6304 = vmatpush1.bf16.msra.mxu0 %v8711_v61  ;;  %6468 = vmatpush1.bf16.msra.mxu1 %v8713_v63  ;;  %v8824_v48 = vcombine.high %v243_v42, %v251_v43  ;;  %v259_v50 = vld [vmem:[%s13645_s1 + $0x700] sm:$0xff]  ;;  %v268_v53 = vld [vmem:[%s13645_s1 + $0x748] sm:$0xff]  ;;  %v8823_v54 = vcombine.low %v243_v42, %v251_v43 }
  0x1f   :  { %6305 = vmatprep.subr.bf16.mxu0 %v8728_v0  ;;  %6469 = vmatprep.subr.bf16.mxu1 %v8730_v1  ;;  %v267_v51 = vld [vmem:[%s13645_s1 + $0x740] sm:$0xff]  ;;  %v8842_v59 = vcombine.high %v260_v52, %v268_v53  ;;  %v276_v63 = vld [vmem:[%s13645_s1 + $0x788] sm:$0xff]  ;;  %v8841_v2 = vcombine.low %v260_v52, %v268_v53 }
  0x20   :  { %v8840_v56 = vcombine.high %v259_v50, %v267_v51  ;;  %v275_v60 = vld [vmem:[%s13645_s1 + $0x780] sm:$0xff]  ;;  %v284_v0 = vld [vmem:[%s13645_s1 + $0x7c8] sm:$0xff]  ;;  %v8839_v1 = vcombine.low %v259_v50, %v267_v51 }
  0x21   :  { %v283_v61 = vld [vmem:[%s13645_s1 + $0x7c0] sm:$0xff]  ;;  %v8858_v4 = vcombine.high %v276_v63, %v284_v0  ;;  %v8857_v11 = vcombine.low %v276_v63, %v284_v0  ;;  %v308_v18 = vld [vmem:[%s13645_s1 + $0x888] sm:$0xff] }
  0x22   :  { %6306 = vmatpush1.bf16.msra.mxu0 %v8727_v6  ;;  %6470 = vmatpush1.bf16.msra.mxu1 %v8729_v7  ;;  %v8856_v3 = vcombine.high %v275_v60, %v283_v61  ;;  %v291_v5 = vld [vmem:[%s13645_s1 + $0x800] sm:$0xff]  ;;  %v292_v7 = vld [vmem:[%s13645_s1 + $0x808] sm:$0xff]  ;;  %v8855_v10 = vcombine.low %v275_v60, %v283_v61 }
  0x23   :  { %6307 = vmatprep.subr.bf16.mxu0 %v8744_v8  ;;  %6471 = vmatprep.subr.bf16.mxu1 %v8746_v9  ;;  %v299_v6 = vld [vmem:[%s13645_s1 + $0x840] sm:$0xff]  ;;  %v300_v8 = vld [vmem:[%s13645_s1 + $0x848] sm:$0xff] }
  0x24   :  { %v28_v9 = vld [vmem:[%s13646_s0 + $0x8] sm:$0xff]  ;;  %v8872_v12 = vcombine.high %v291_v5, %v299_v6  ;;  %v8874_v13 = vcombine.high %v292_v7, %v300_v8  ;;  %v8871_v20 = vcombine.low %v291_v5, %v299_v6  ;;  %v8873_v21 = vcombine.low %v292_v7, %v300_v8 }
  0x25   :  { %v316_v19 = vld [vmem:[%s13645_s1 + $0x8c8] sm:$0xff] }
  0x26   :  { %6308 = vmatpush1.bf16.msra.mxu0 %v8743_v14  ;;  %6472 = vmatpush1.bf16.msra.mxu1 %v8745_v15  ;;  %v307_v14 = vld [vmem:[%s13645_s1 + $0x880] sm:$0xff]  ;;  %v324_v26 = vld [vmem:[%s13645_s1 + $0x908] sm:$0xff]  ;;  %v8889_v29 = vcombine.low %v308_v18, %v316_v19 }
  0x27   :  { %6309 = vmatprep.subr.bf16.mxu0 %v8760_v16  ;;  %6473 = vmatprep.subr.bf16.mxu1 %v8762_v17  ;;  %v315_v15 = vld [vmem:[%s13645_s1 + $0x8c0] sm:$0xff]  ;;  %v10303_v16 = vmax.bf16 %v10036_v57, %v28_v9  ;;  %v10307_v17 = vcombine.low %v10171_v58, %v10171_v58  ;;  %v332_v27 = vld [vmem:[%s13645_s1 + $0x948] sm:$0xff] }
  0x28   :  { %v323_v58 = vld [vmem:[%s13645_s1 + $0x900] sm:$0xff]  ;;  %v8887_v28 = vcombine.low %v307_v14, %v315_v15  ;;  %v340_v34 = vld [vmem:[%s13645_s1 + $0x988] sm:$0xff]  ;;  %v8905_v37 = vcombine.low %v324_v26, %v332_v27 }
  0x29   :  { %v348_v35 = vld [vmem:[%s13645_s1 + $0x9c8] sm:$0xff] }
  0x2a   :  { %6310 = vmatpush1.bf16.msra.mxu0 %v8759_v22  ;;  %6474 = vmatpush1.bf16.msra.mxu1 %v8761_v23  ;;  %v8888_v22 = vcombine.high %v307_v14, %v315_v15  ;;  %v8890_v23 = vcombine.high %v308_v18, %v316_v19  ;;  %v356_v42 = vld [vmem:[%s13645_s1 + $0xa08] sm:$0xff]  ;;  %v8921_v45 = vcombine.low %v340_v34, %v348_v35 }
  0x2b   :  { %6311 = vmatprep.subr.bf16.mxu0 %v8776_v24  ;;  %6475 = vmatprep.subr.bf16.mxu1 %v8778_v25  ;;  %v331_v24 = vld [vmem:[%s13645_s1 + $0x940] sm:$0xff]  ;;  %v10323_v25 = vcombine.high %v10303_v16, %v10303_v16  ;;  %v364_v43 = vld [vmem:[%s13645_s1 + $0xa48] sm:$0xff] }
  0x2c   :  { %v8903_v36 = vcombine.low %v323_v58, %v331_v24  ;;  %v372_v50 = vld [vmem:[%s13645_s1 + $0xa88] sm:$0xff]  ;;  %v8937_v53 = vcombine.low %v356_v42, %v364_v43 }
  0x2d   :  { %v380_v51 = vld [vmem:[%s13645_s1 + $0xac8] sm:$0xff] }
  0x2e   :  { %6312 = vmatpush1.bf16.msra.mxu0 %v8775_v30  ;;  %6476 = vmatpush1.bf16.msra.mxu1 %v8777_v31  ;;  %v8904_v30 = vcombine.high %v323_v58, %v331_v24  ;;  %v8906_v31 = vcombine.high %v324_v26, %v332_v27  ;;  %v388_v60 = vld [vmem:[%s13645_s1 + $0xb08] sm:$0xff]  ;;  %v8953_v0 = vcombine.low %v372_v50, %v380_v51 }
  0x2f   :  { %6313 = vmatprep.subr.bf16.mxu0 %v8792_v32  ;;  %6477 = vmatprep.subr.bf16.mxu1 %v8794_v33  ;;  %v339_v32 = vld [vmem:[%s13645_s1 + $0x980] sm:$0xff]  ;;  %v396_v61 = vld [vmem:[%s13645_s1 + $0xb48] sm:$0xff] }
  0x30   :  { %v347_v33 = vld [vmem:[%s13645_s1 + $0x9c0] sm:$0xff]  ;;  %v404_v5 = vld [vmem:[%s13645_s1 + $0xb88] sm:$0xff]  ;;  %v8969_v8 = vcombine.low %v388_v60, %v396_v61 }
  0x31   :  { %v8919_v44 = vcombine.low %v339_v32, %v347_v33  ;;  %v412_v6 = vld [vmem:[%s13645_s1 + $0xbc8] sm:$0xff] }
  0x32   :  { %6314 = vmatpush1.bf16.msra.mxu0 %v8791_v38  ;;  %6478 = vmatpush1.bf16.msra.mxu1 %v8793_v39  ;;  %v8920_v38 = vcombine.high %v339_v32, %v347_v33  ;;  %v8922_v39 = vcombine.high %v340_v34, %v348_v35  ;;  %v428_v14 = vld [vmem:[%s13645_s1 + $0xc48] sm:$0xff]  ;;  %v8985_v18 = vcombine.low %v404_v5, %v412_v6 }
  0x33   :  { %6315 = vmatprep.subr.bf16.mxu0 %v8808_v40  ;;  %6479 = vmatprep.subr.bf16.mxu1 %v8810_v41  ;;  %v355_v40 = vld [vmem:[%s13645_s1 + $0xa00] sm:$0xff]  ;;  %v444_v58 = vld [vmem:[%s13645_s1 + $0xcc8] sm:$0xff] }
  0x34   :  { %v363_v41 = vld [vmem:[%s13645_s1 + $0xa40] sm:$0xff]  ;;  %v460_v32 = vld [vmem:[%s13645_s1 + $0xd48] sm:$0xff] }
  0x35   :  { %v8935_v52 = vcombine.low %v355_v40, %v363_v41 }
  0x36   :  { %6316 = vmatpush1.bf16.msra.mxu0 %v8807_v46  ;;  %6480 = vmatpush1.bf16.msra.mxu1 %v8809_v47  ;;  %v8936_v46 = vcombine.high %v355_v40, %v363_v41  ;;  %v8938_v47 = vcombine.high %v356_v42, %v364_v43  ;;  %v476_v40 = vld [vmem:[%s13645_s1 + $0xdc8] sm:$0xff] }
  0x37   :  { %6317 = vmatprep.subr.bf16.mxu0 %v8824_v48  ;;  %6481 = vmatprep.subr.bf16.mxu1 %v8826_v49  ;;  %v371_v48 = vld [vmem:[%s13645_s1 + $0xa80] sm:$0xff] }
  0x38   :  { %v379_v49 = vld [vmem:[%s13645_s1 + $0xac0] sm:$0xff] }
  0x39   :  { %v8951_v63 = vcombine.low %v371_v48, %v379_v49 }
  0x3a   :  { %6318 = vmatpush1.bf16.msra.mxu0 %v8823_v54  ;;  %6482 = vmatpush1.bf16.msra.mxu1 %v8825_v55  ;;  %v8952_v54 = vcombine.high %v371_v48, %v379_v49  ;;  %v8954_v55 = vcombine.high %v372_v50, %v380_v51  ;;  %v492_v48 = vld [vmem:[%s13645_s1 + $0xe48] sm:$0xff] }
  0x3b   :  { %6319 = vmatprep.subr.bf16.mxu0 %v8840_v56  ;;  %6483 = vmatprep.subr.bf16.mxu1 %v8842_v59  ;;  %v387_v56 = vld [vmem:[%s13645_s1 + $0xb00] sm:$0xff] }
  0x3c   :  { %v395_v59 = vld [vmem:[%s13645_s1 + $0xb40] sm:$0xff] }
  0x3d   :  { %v8967_v7 = vcombine.low %v387_v56, %v395_v59 }
  0x3e   :  { %6320 = vmatpush1.bf16.msra.mxu0 %v8839_v1  ;;  %6484 = vmatpush1.bf16.msra.mxu1 %v8841_v2  ;;  %v8968_v1 = vcombine.high %v387_v56, %v395_v59  ;;  %v8970_v2 = vcombine.high %v388_v60, %v396_v61  ;;  %v508_v56 = vld [vmem:[%s13645_s1 + $0xec8] sm:$0xff] }
  0x3f   :  { %6321 = vmatprep.subr.bf16.mxu0 %v8856_v3  ;;  %6485 = vmatprep.subr.bf16.mxu1 %v8858_v4  ;;  %v403_v3 = vld [vmem:[%s13645_s1 + $0xb80] sm:$0xff] }
  0x40   :  { %v411_v4 = vld [vmem:[%s13645_s1 + $0xbc0] sm:$0xff] }
  0x41   :  { %v8984_v9 = vcombine.high %v403_v3, %v411_v4  ;;  %v8983_v15 = vcombine.low %v403_v3, %v411_v4  ;;  %v524_v3 = vld [vmem:[%s13645_s1 + $0xf48] sm:$0xff] }
  0x42   :  { %6322 = vmatpush1.bf16.msra.mxu0 %v8855_v10  ;;  %6486 = vmatpush1.bf16.msra.mxu1 %v8857_v11  ;;  %v8986_v10 = vcombine.high %v404_v5, %v412_v6  ;;  %v419_v11 = vld [vmem:[%s13645_s1 + $0xc00] sm:$0xff] }
  0x43   :  { %6332 = vmatprep.subr.bf16.mxu0 %v8872_v12  ;;  %6496 = vmatprep.subr.bf16.mxu1 %v8874_v13  ;;  %v427_v12 = vld [vmem:[%s13645_s1 + $0xc40] sm:$0xff]  ;;  %v420_v13 = vld [vmem:[%s13645_s1 + $0xc08] sm:$0xff] }
  0x44   :  { %v9000_v19 = vcombine.high %v419_v11, %v427_v12  ;;  %v8999_v24 = vcombine.low %v419_v11, %v427_v12  ;;  %v9001_v26 = vcombine.low %v420_v13, %v428_v14  ;;  %v540_v11 = vld [vmem:[%s13645_s1 + $0xfc8] sm:$0xff] }
  0x45   :  { %6324 = vmatmul.mubr.bf16.vlgmr.msra.gmra.mrb[0].mxu0 %v10307_v17  ;;  %6488 = vmatmul.mubr.bf16.vlgmr.msra.gmra.mrb[0].mxu1 %v10307_v17 }
  0x46   :  { %6333 = vmatpush1.bf16.msra.mxu0 %v8871_v20  ;;  %6497 = vmatpush1.bf16.msra.mxu1 %v8873_v21  ;;  %v9002_v20 = vcombine.high %v420_v13, %v428_v14  ;;  %v435_v21 = vld [vmem:[%s13645_s1 + $0xc80] sm:$0xff] }
  0x47   :  { %6334 = vmatprep.subr.bf16.mxu0 %v8888_v22  ;;  %6498 = vmatprep.subr.bf16.mxu1 %v8890_v23  ;;  %v443_v22 = vld [vmem:[%s13645_s1 + $0xcc0] sm:$0xff]  ;;  %v436_v23 = vld [vmem:[%s13645_s1 + $0xc88] sm:$0xff] }
  0x48   :  { %6364 = vmatprep.mubr.bf16.mxu0 %v10323_v25  ;;  %6528 = vmatprep.mubr.bf16.mxu1 %v10323_v25  ;;  %v9016_v27 = vcombine.high %v435_v21, %v443_v22  ;;  %v9015_v33 = vcombine.low %v435_v21, %v443_v22  ;;  %v9017_v34 = vcombine.low %v436_v23, %v444_v58  ;;  %v556_v21 = vld [vmem:[%s13645_s1 + $0x1048] sm:$0xff]  ;;  %v29_v22 = vld [vmem:[%s13646_s0 + $0x10] sm:$0xff] }
  0x4a   :  { %6335 = vmatpush1.bf16.msra.mxu0 %v8887_v28  ;;  %6499 = vmatpush1.bf16.msra.mxu1 %v8889_v29  ;;  %v9018_v28 = vcombine.high %v436_v23, %v444_v58  ;;  %v451_v29 = vld [vmem:[%s13645_s1 + $0xd00] sm:$0xff] }
  0x4b   :  { %6336 = vmatprep.subr.bf16.mxu0 %v8904_v30  ;;  %6500 = vmatprep.subr.bf16.mxu1 %v8906_v31  ;;  %v459_v30 = vld [vmem:[%s13645_s1 + $0xd40] sm:$0xff]  ;;  %v452_v31 = vld [vmem:[%s13645_s1 + $0xd08] sm:$0xff] }
  0x4c   :  { %v9032_v35 = vcombine.high %v451_v29, %v459_v30  ;;  %v9031_v41 = vcombine.low %v451_v29, %v459_v30  ;;  %v9033_v42 = vcombine.low %v452_v31, %v460_v32  ;;  %v10513_v29 = vmax.bf16 %v10036_v57, %v29_v22 }
  0x4d   :  { %v10517_v30 = vcombine.low %v10303_v16, %v10303_v16  ;;  %v579_v16 = vld [vmem:[%s13645_s1 + $0x1100] sm:$0xff] }
  0x4e   :  { %6337 = vmatpush1.bf16.msra.mxu0 %v8903_v36  ;;  %6501 = vmatpush1.bf16.msra.mxu1 %v8905_v37  ;;  %v9034_v36 = vcombine.high %v452_v31, %v460_v32  ;;  %v467_v37 = vld [vmem:[%s13645_s1 + $0xd80] sm:$0xff]  ;;  %v564_v31 = vld [vmem:[%s13645_s1 + $0x1088] sm:$0xff] }
  0x4f   :  { %6338 = vmatprep.subr.bf16.mxu0 %v8920_v38  ;;  %6502 = vmatprep.subr.bf16.mxu1 %v8922_v39  ;;  %v475_v38 = vld [vmem:[%s13645_s1 + $0xdc0] sm:$0xff]  ;;  %v468_v39 = vld [vmem:[%s13645_s1 + $0xd88] sm:$0xff] }
  0x50   :  { %v9048_v43 = vcombine.high %v467_v37, %v475_v38  ;;  %v9047_v49 = vcombine.low %v467_v37, %v475_v38  ;;  %v9049_v50 = vcombine.low %v468_v39, %v476_v40  ;;  %v572_v32 = vld [vmem:[%s13645_s1 + $0x10c8] sm:$0xff]  ;;  %v587_v37 = vld [vmem:[%s13645_s1 + $0x1140] sm:$0xff]  ;;  %v10533_v38 = vcombine.high %v10513_v29, %v10513_v29 }
  0x52   :  { %6339 = vmatpush1.bf16.msra.mxu0 %v8919_v44  ;;  %6503 = vmatpush1.bf16.msra.mxu1 %v8921_v45  ;;  %v9050_v44 = vcombine.high %v468_v39, %v476_v40  ;;  %v483_v45 = vld [vmem:[%s13645_s1 + $0xe00] sm:$0xff]  ;;  %v580_v39 = vld [vmem:[%s13645_s1 + $0x1108] sm:$0xff] }
  0x53   :  { %6340 = vmatprep.subr.bf16.mxu0 %v8936_v46  ;;  %6504 = vmatprep.subr.bf16.mxu1 %v8938_v47  ;;  %v491_v46 = vld [vmem:[%s13645_s1 + $0xe40] sm:$0xff]  ;;  %v484_v47 = vld [vmem:[%s13645_s1 + $0xe08] sm:$0xff] }
  0x54   :  { %v9064_v51 = vcombine.high %v483_v45, %v491_v46  ;;  %v9063_v59 = vcombine.low %v483_v45, %v491_v46  ;;  %v9065_v60 = vcombine.low %v484_v47, %v492_v48  ;;  %v588_v40 = vld [vmem:[%s13645_s1 + $0x1148] sm:$0xff]  ;;  %v595_v45 = vld [vmem:[%s13645_s1 + $0x1180] sm:$0xff] }
  0x55   :  { %v603_v46 = vld [vmem:[%s13645_s1 + $0x11c0] sm:$0xff] }
  0x56   :  { %6341 = vmatpush1.bf16.msra.mxu0 %v8935_v52  ;;  %6505 = vmatpush1.bf16.msra.mxu1 %v8937_v53  ;;  %v9066_v52 = vcombine.high %v484_v47, %v492_v48  ;;  %v499_v53 = vld [vmem:[%s13645_s1 + $0xe80] sm:$0xff]  ;;  %v596_v47 = vld [vmem:[%s13645_s1 + $0x1188] sm:$0xff] }
  0x57   :  { %6342 = vmatprep.subr.bf16.mxu0 %v8952_v54  ;;  %6506 = vmatprep.subr.bf16.mxu1 %v8954_v55  ;;  %v507_v54 = vld [vmem:[%s13645_s1 + $0xec0] sm:$0xff]  ;;  %v500_v55 = vld [vmem:[%s13645_s1 + $0xe88] sm:$0xff] }
  0x58   :  { %v9080_v61 = vcombine.high %v499_v53, %v507_v54  ;;  %v9079_v4 = vcombine.low %v499_v53, %v507_v54  ;;  %v9081_v5 = vcombine.low %v500_v55, %v508_v56  ;;  %v604_v48 = vld [vmem:[%s13645_s1 + $0x11c8] sm:$0xff]  ;;  %v611_v53 = vld [vmem:[%s13645_s1 + $0x1200] sm:$0xff] }
  0x59   :  { %v619_v54 = vld [vmem:[%s13645_s1 + $0x1240] sm:$0xff] }
  0x5a   :  { %6343 = vmatpush1.bf16.msra.mxu0 %v8951_v63  ;;  %6507 = vmatpush1.bf16.msra.mxu1 %v8953_v0  ;;  %v9082_v63 = vcombine.high %v500_v55, %v508_v56  ;;  %v515_v0 = vld [vmem:[%s13645_s1 + $0xf00] sm:$0xff]  ;;  %v612_v55 = vld [vmem:[%s13645_s1 + $0x1208] sm:$0xff] }
  0x5b   :  { %6344 = vmatprep.subr.bf16.mxu0 %v8968_v1  ;;  %6508 = vmatprep.subr.bf16.mxu1 %v8970_v2  ;;  %v523_v1 = vld [vmem:[%s13645_s1 + $0xf40] sm:$0xff]  ;;  %v516_v2 = vld [vmem:[%s13645_s1 + $0xf08] sm:$0xff] }
  0x5c   :  { %v9096_v6 = vcombine.high %v515_v0, %v523_v1  ;;  %v9095_v12 = vcombine.low %v515_v0, %v523_v1  ;;  %v9097_v13 = vcombine.low %v516_v2, %v524_v3  ;;  %v620_v56 = vld [vmem:[%s13645_s1 + $0x1248] sm:$0xff]  ;;  %v627_v0 = vld [vmem:[%s13645_s1 + $0x1280] sm:$0xff] }
  0x5d   :  { %v635_v1 = vld [vmem:[%s13645_s1 + $0x12c0] sm:$0xff] }
  0x5e   :  { %6345 = vmatpush1.bf16.msra.mxu0 %v8967_v7  ;;  %6509 = vmatpush1.bf16.msra.mxu1 %v8969_v8  ;;  %v9098_v7 = vcombine.high %v516_v2, %v524_v3  ;;  %v531_v8 = vld [vmem:[%s13645_s1 + $0xf80] sm:$0xff]  ;;  %v628_v2 = vld [vmem:[%s13645_s1 + $0x1288] sm:$0xff] }
  0x5f   :  { %6346 = vmatprep.subr.bf16.mxu0 %v8984_v9  ;;  %6510 = vmatprep.subr.bf16.mxu1 %v8986_v10  ;;  %v539_v9 = vld [vmem:[%s13645_s1 + $0xfc0] sm:$0xff]  ;;  %v532_v10 = vld [vmem:[%s13645_s1 + $0xf88] sm:$0xff] }
  0x60   :  { %v9112_v14 = vcombine.high %v531_v8, %v539_v9  ;;  %v9111_v23 = vcombine.low %v531_v8, %v539_v9  ;;  %v9113_v58 = vcombine.low %v532_v10, %v540_v11  ;;  %v636_v3 = vld [vmem:[%s13645_s1 + $0x12c8] sm:$0xff]  ;;  %v643_v8 = vld [vmem:[%s13645_s1 + $0x1300] sm:$0xff] }
  0x61   :  { %v651_v9 = vld [vmem:[%s13645_s1 + $0x1340] sm:$0xff] }
  0x62   :  { %6347 = vmatpush1.bf16.msra.mxu0 %v8983_v15  ;;  %6511 = vmatpush1.bf16.msra.mxu1 %v8985_v18  ;;  %v9114_v15 = vcombine.high %v532_v10, %v540_v11  ;;  %v547_v18 = vld [vmem:[%s13645_s1 + $0x1000] sm:$0xff]  ;;  %v644_v10 = vld [vmem:[%s13645_s1 + $0x1308] sm:$0xff]  ;;  %v9223_v22 = vcombine.low %v643_v8, %v651_v9 }
  0x63   :  { %6348 = vmatprep.subr.bf16.mxu0 %v9000_v19  ;;  %6512 = vmatprep.subr.bf16.mxu1 %v9002_v20  ;;  %v555_v19 = vld [vmem:[%s13645_s1 + $0x1040] sm:$0xff]  ;;  %v548_v20 = vld [vmem:[%s13645_s1 + $0x1008] sm:$0xff] }
  0x64   :  { %v652_v11 = vld [vmem:[%s13645_s1 + $0x1348] sm:$0xff] }
  0x66   :  { %6349 = vmatpush1.bf16.msra.mxu0 %v8999_v24  ;;  %6513 = vmatpush1.bf16.msra.mxu1 %v9001_v26  ;;  %v9128_v24 = vcombine.high %v547_v18, %v555_v19  ;;  %v9130_v26 = vcombine.high %v548_v20, %v556_v21 }
  0x67   :  { %6350 = vmatprep.subr.bf16.mxu0 %v9016_v27  ;;  %6514 = vmatprep.subr.bf16.mxu1 %v9018_v28  ;;  %v563_v27 = vld [vmem:[%s13645_s1 + $0x1080] sm:$0xff] }
  0x68   :  { %v571_v28 = vld [vmem:[%s13645_s1 + $0x10c0] sm:$0xff] }
  0x6a   :  { %6351 = vmatpush1.bf16.msra.mxu0 %v9015_v33  ;;  %6515 = vmatpush1.bf16.msra.mxu1 %v9017_v34  ;;  %v9127_v33 = vcombine.low %v547_v18, %v555_v19  ;;  %v9129_v34 = vcombine.low %v548_v20, %v556_v21  ;;  %v659_v18 = vld [vmem:[%s13645_s1 + $0x1380] sm:$0xff]  ;;  %v660_v20 = vld [vmem:[%s13645_s1 + $0x1388] sm:$0xff] }
  0x6b   :  { %6352 = vmatprep.subr.bf16.mxu0 %v9032_v35  ;;  %6516 = vmatprep.subr.bf16.mxu1 %v9034_v36  ;;  %v9144_v35 = vcombine.high %v563_v27, %v571_v28  ;;  %v9146_v36 = vcombine.high %v564_v31, %v572_v32  ;;  %v667_v19 = vld [vmem:[%s13645_s1 + $0x13c0] sm:$0xff]  ;;  %v668_v21 = vld [vmem:[%s13645_s1 + $0x13c8] sm:$0xff] }
  0x6e   :  { %6353 = vmatpush1.bf16.msra.mxu0 %v9031_v41  ;;  %6517 = vmatpush1.bf16.msra.mxu1 %v9033_v42  ;;  %v9143_v41 = vcombine.low %v563_v27, %v571_v28  ;;  %v9145_v42 = vcombine.low %v564_v31, %v572_v32  ;;  %v683_v27 = vld [vmem:[%s13645_s1 + $0x1440] sm:$0xff]  ;;  %v676_v28 = vld [vmem:[%s13645_s1 + $0x1408] sm:$0xff]  ;;  %v9239_v32 = vcombine.low %v659_v18, %v667_v19 }
  0x6f   :  { %6354 = vmatprep.subr.bf16.mxu0 %v9048_v43  ;;  %6518 = vmatprep.subr.bf16.mxu1 %v9050_v44  ;;  %v9160_v43 = vcombine.high %v579_v16, %v587_v37  ;;  %v9162_v44 = vcombine.high %v580_v39, %v588_v40  ;;  %v684_v31 = vld [vmem:[%s13645_s1 + $0x1448] sm:$0xff] }
  0x72   :  { %6355 = vmatpush1.bf16.msra.mxu0 %v9047_v49  ;;  %6519 = vmatpush1.bf16.msra.mxu1 %v9049_v50  ;;  %v9159_v49 = vcombine.low %v579_v16, %v587_v37  ;;  %v9161_v50 = vcombine.low %v580_v39, %v588_v40  ;;  %v699_v16 = vld [vmem:[%s13645_s1 + $0x14c0] sm:$0xff]  ;;  %v692_v37 = vld [vmem:[%s13645_s1 + $0x1488] sm:$0xff] }
  0x73   :  { %6356 = vmatprep.subr.bf16.mxu0 %v9064_v51  ;;  %6520 = vmatprep.subr.bf16.mxu1 %v9066_v52  ;;  %v9176_v51 = vcombine.high %v595_v45, %v603_v46  ;;  %v9178_v52 = vcombine.high %v596_v47, %v604_v48  ;;  %v700_v39 = vld [vmem:[%s13645_s1 + $0x14c8] sm:$0xff] }
  0x76   :  { %6357 = vmatpush1.bf16.msra.mxu0 %v9063_v59  ;;  %6521 = vmatpush1.bf16.msra.mxu1 %v9065_v60  ;;  %v9175_v59 = vcombine.low %v595_v45, %v603_v46  ;;  %v9177_v60 = vcombine.low %v596_v47, %v604_v48  ;;  %v715_v45 = vld [vmem:[%s13645_s1 + $0x1540] sm:$0xff]  ;;  %v708_v46 = vld [vmem:[%s13645_s1 + $0x1508] sm:$0xff] }
  0x77   :  { %6358 = vmatprep.subr.bf16.mxu0 %v9080_v61  ;;  %6522 = vmatprep.subr.bf16.mxu1 %v9082_v63  ;;  %v9192_v61 = vcombine.high %v611_v53, %v619_v54  ;;  %v9194_v63 = vcombine.high %v612_v55, %v620_v56  ;;  %v716_v47 = vld [vmem:[%s13645_s1 + $0x1548] sm:$0xff] }
  0x7a   :  { %6359 = vmatpush1.bf16.msra.mxu0 %v9079_v4  ;;  %6523 = vmatpush1.bf16.msra.mxu1 %v9081_v5  ;;  %v9191_v4 = vcombine.low %v611_v53, %v619_v54  ;;  %v9193_v5 = vcombine.low %v612_v55, %v620_v56  ;;  %v731_v53 = vld [vmem:[%s13645_s1 + $0x15c0] sm:$0xff]  ;;  %v724_v54 = vld [vmem:[%s13645_s1 + $0x1588] sm:$0xff] }
  0x7b   :  { %6360 = vmatprep.subr.bf16.mxu0 %v9096_v6  ;;  %6524 = vmatprep.subr.bf16.mxu1 %v9098_v7  ;;  %v9208_v6 = vcombine.high %v627_v0, %v635_v1  ;;  %v9210_v7 = vcombine.high %v628_v2, %v636_v3  ;;  %v732_v55 = vld [vmem:[%s13645_s1 + $0x15c8] sm:$0xff] }
  0x7e   :  { %6361 = vmatpush1.bf16.msra.mxu0 %v9095_v12  ;;  %6525 = vmatpush1.bf16.msra.mxu1 %v9097_v13  ;;  %v9207_v12 = vcombine.low %v627_v0, %v635_v1  ;;  %v9209_v13 = vcombine.low %v628_v2, %v636_v3  ;;  %v747_v0 = vld [vmem:[%s13645_s1 + $0x1640] sm:$0xff]  ;;  %v740_v1 = vld [vmem:[%s13645_s1 + $0x1608] sm:$0xff] }
  0x7f   :  { %6362 = vmatprep.subr.bf16.mxu0 %v9112_v14  ;;  %6526 = vmatprep.subr.bf16.mxu1 %v9114_v15  ;;  %v9224_v14 = vcombine.high %v643_v8, %v651_v9  ;;  %v9226_v15 = vcombine.high %v644_v10, %v652_v11  ;;  %v748_v2 = vld [vmem:[%s13645_s1 + $0x1648] sm:$0xff]  ;;  %v763_v8 = vld [vmem:[%s13645_s1 + $0x16c0] sm:$0xff] }
  0x80   :  { %v756_v9 = vld [vmem:[%s13645_s1 + $0x1688] sm:$0xff] }
  0x82   :  { %6363 = vmatpush1.bf16.msra.mxu0 %v9111_v23  ;;  %6527 = vmatpush1.bf16.msra.mxu1 %v9113_v58  ;;  %v9225_v23 = vcombine.low %v644_v10, %v652_v11  ;;  %v9240_v58 = vcombine.high %v659_v18, %v667_v19  ;;  %v764_v10 = vld [vmem:[%s13645_s1 + $0x16c8] sm:$0xff]  ;;  %v779_v18 = vld [vmem:[%s13645_s1 + $0x1740] sm:$0xff] }
  0x83   :  { %6373 = vmatprep.subr.bf16.mxu0 %v9128_v24  ;;  %6537 = vmatprep.subr.bf16.mxu1 %v9130_v26  ;;  %v9242_v24 = vcombine.high %v660_v20, %v668_v21  ;;  %v675_v26 = vld [vmem:[%s13645_s1 + $0x1400] sm:$0xff]  ;;  %v772_v19 = vld [vmem:[%s13645_s1 + $0x1708] sm:$0xff] }
  0x84   :  { %v9255_v40 = vcombine.low %v675_v26, %v683_v27 }
  0x85   :  { %6365 = vmatmul.mubr.bf16.vlgmr.msra.gmra.mrb[0].mxu0 %v10517_v30  ;;  %6529 = vmatmul.mubr.bf16.vlgmr.msra.gmra.mrb[0].mxu1 %v10517_v30 }
  0x86   :  { %6374 = vmatpush1.bf16.msra.mxu0 %v9127_v33  ;;  %6538 = vmatpush1.bf16.msra.mxu1 %v9129_v34  ;;  %v9241_v33 = vcombine.low %v660_v20, %v668_v21  ;;  %v9256_v34 = vcombine.high %v675_v26, %v683_v27  ;;  %v780_v20 = vld [vmem:[%s13645_s1 + $0x1748] sm:$0xff]  ;;  %v795_v26 = vld [vmem:[%s13645_s1 + $0x17c0] sm:$0xff] }
  0x87   :  { %6375 = vmatprep.subr.bf16.mxu0 %v9144_v35  ;;  %6539 = vmatprep.subr.bf16.mxu1 %v9146_v36  ;;  %v9258_v35 = vcombine.high %v676_v28, %v684_v31  ;;  %v691_v36 = vld [vmem:[%s13645_s1 + $0x1480] sm:$0xff]  ;;  %v788_v27 = vld [vmem:[%s13645_s1 + $0x1788] sm:$0xff] }
  0x88   :  { %6405 = vmatprep.mubr.bf16.mxu0 %v10533_v38  ;;  %6569 = vmatprep.mubr.bf16.mxu1 %v10533_v38  ;;  %v9271_v48 = vcombine.low %v691_v36, %v699_v16 }
  0x8a   :  { %6376 = vmatpush1.bf16.msra.mxu0 %v9143_v41  ;;  %6540 = vmatpush1.bf16.msra.mxu1 %v9145_v42  ;;  %v9257_v41 = vcombine.low %v676_v28, %v684_v31  ;;  %v9272_v42 = vcombine.high %v691_v36, %v699_v16  ;;  %v796_v28 = vld [vmem:[%s13645_s1 + $0x17c8] sm:$0xff]  ;;  %v811_v36 = vld [vmem:[%s13645_s1 + $0x1840] sm:$0xff] }
  0x8b   :  { %6377 = vmatprep.subr.bf16.mxu0 %v9160_v43  ;;  %6541 = vmatprep.subr.bf16.mxu1 %v9162_v44  ;;  %v9274_v43 = vcombine.high %v692_v37, %v700_v39  ;;  %v707_v44 = vld [vmem:[%s13645_s1 + $0x1500] sm:$0xff]  ;;  %v804_v16 = vld [vmem:[%s13645_s1 + $0x1808] sm:$0xff] }
  0x8c   :  { %v9287_v56 = vcombine.low %v707_v44, %v715_v45 }
  0x8e   :  { %6378 = vmatpush1.bf16.msra.mxu0 %v9159_v49  ;;  %6542 = vmatpush1.bf16.msra.mxu1 %v9161_v50  ;;  %v9273_v49 = vcombine.low %v692_v37, %v700_v39  ;;  %v9288_v50 = vcombine.high %v707_v44, %v715_v45  ;;  %v812_v37 = vld [vmem:[%s13645_s1 + $0x1848] sm:$0xff]  ;;  %v30_v39 = vld [vmem:[%s13646_s0 + $0x18] sm:$0xff]  ;;  %v819_v44 = vld [vmem:[%s13645_s1 + $0x1880] sm:$0xff] }
  0x8f   :  { %6379 = vmatprep.subr.bf16.mxu0 %v9176_v51  ;;  %6543 = vmatprep.subr.bf16.mxu1 %v9178_v52  ;;  %v9290_v51 = vcombine.high %v708_v46, %v716_v47  ;;  %v723_v52 = vld [vmem:[%s13645_s1 + $0x1580] sm:$0xff] }
  0x90   :  { %v9303_v3 = vcombine.low %v723_v52, %v731_v53  ;;  %v827_v45 = vld [vmem:[%s13645_s1 + $0x18c0] sm:$0xff] }
  0x92   :  { %6380 = vmatpush1.bf16.msra.mxu0 %v9175_v59  ;;  %6544 = vmatpush1.bf16.msra.mxu1 %v9177_v60  ;;  %v9289_v59 = vcombine.low %v708_v46, %v716_v47  ;;  %v9304_v60 = vcombine.high %v723_v52, %v731_v53  ;;  %v10723_v46 = vmax.bf16 %v10036_v57, %v30_v39  ;;  %v916_v39 = vld [vmem:[%s13645_s1 + $0x1b88] sm:$0xff] }
  0x93   :  { %6381 = vmatprep.subr.bf16.mxu0 %v9192_v61  ;;  %6545 = vmatprep.subr.bf16.mxu1 %v9194_v63  ;;  %v9306_v61 = vcombine.high %v724_v54, %v732_v55  ;;  %v739_v63 = vld [vmem:[%s13645_s1 + $0x1600] sm:$0xff]  ;;  %v10727_v47 = vcombine.low %v10513_v29, %v10513_v29  ;;  %v9400_v52 = vcombine.high %v819_v44, %v827_v45 }
  0x94   :  { %v9319_v11 = vcombine.low %v739_v63, %v747_v0  ;;  %v835_v29 = vld [vmem:[%s13645_s1 + $0x1900] sm:$0xff] }
  0x96   :  { %6382 = vmatpush1.bf16.msra.mxu0 %v9191_v4  ;;  %6546 = vmatpush1.bf16.msra.mxu1 %v9193_v5  ;;  %v9305_v4 = vcombine.low %v724_v54, %v732_v55  ;;  %v9320_v5 = vcombine.high %v739_v63, %v747_v0  ;;  %v843_v54 = vld [vmem:[%s13645_s1 + $0x1940] sm:$0xff]  ;;  %v10743_v55 = vcombine.high %v10723_v46, %v10723_v46 }
  0x97   :  { %6383 = vmatprep.subr.bf16.mxu0 %v9208_v6  ;;  %6547 = vmatprep.subr.bf16.mxu1 %v9210_v7  ;;  %v9322_v6 = vcombine.high %v740_v1, %v748_v2  ;;  %v755_v7 = vld [vmem:[%s13645_s1 + $0x1680] sm:$0xff]  ;;  %v9416_v63 = vcombine.high %v835_v29, %v843_v54 }
  0x98   :  { %v9335_v21 = vcombine.low %v755_v7, %v763_v8 }
  0x9a   :  { %6384 = vmatpush1.bf16.msra.mxu0 %v9207_v12  ;;  %6548 = vmatpush1.bf16.msra.mxu1 %v9209_v13  ;;  %v9321_v12 = vcombine.low %v740_v1, %v748_v2  ;;  %v9336_v13 = vcombine.high %v755_v7, %v763_v8  ;;  %v851_v1 = vld [vmem:[%s13645_s1 + $0x1980] sm:$0xff] }
  0x9b   :  { %6385 = vmatprep.subr.bf16.mxu0 %v9224_v14  ;;  %6549 = vmatprep.subr.bf16.mxu1 %v9226_v15  ;;  %v9338_v14 = vcombine.high %v756_v9, %v764_v10  ;;  %v771_v15 = vld [vmem:[%s13645_s1 + $0x1700] sm:$0xff] }
  0x9c   :  { %v9351_v31 = vcombine.low %v771_v15, %v779_v18  ;;  %v859_v2 = vld [vmem:[%s13645_s1 + $0x19c0] sm:$0xff] }
  0x9d   :  { %v9432_v7 = vcombine.high %v851_v1, %v859_v2 }
  0x9e   :  { %6386 = vmatpush1.bf16.msra.mxu0 %v9223_v22  ;;  %6550 = vmatpush1.bf16.msra.mxu1 %v9225_v23  ;;  %v9337_v22 = vcombine.low %v756_v9, %v764_v10  ;;  %v9352_v23 = vcombine.high %v771_v15, %v779_v18  ;;  %v867_v9 = vld [vmem:[%s13645_s1 + $0x1a00] sm:$0xff] }
  0x9f   :  { %6387 = vmatprep.subr.bf16.mxu0 %v9240_v58  ;;  %6551 = vmatprep.subr.bf16.mxu1 %v9242_v24  ;;  %v9354_v58 = vcombine.high %v772_v19, %v780_v20  ;;  %v787_v24 = vld [vmem:[%s13645_s1 + $0x1780] sm:$0xff] }
  0xa0   :  { %v875_v10 = vld [vmem:[%s13645_s1 + $0x1a40] sm:$0xff] }
  0xa1   :  { %v9448_v15 = vcombine.high %v867_v9, %v875_v10 }
  0xa2   :  { %6388 = vmatpush1.bf16.msra.mxu0 %v9239_v32  ;;  %6552 = vmatpush1.bf16.msra.mxu1 %v9241_v33  ;;  %v9353_v32 = vcombine.low %v772_v19, %v780_v20  ;;  %v9368_v33 = vcombine.high %v787_v24, %v795_v26  ;;  %v883_v19 = vld [vmem:[%s13645_s1 + $0x1a80] sm:$0xff] }
  0xa3   :  { %6389 = vmatprep.subr.bf16.mxu0 %v9256_v34  ;;  %6553 = vmatprep.subr.bf16.mxu1 %v9258_v35  ;;  %v9370_v34 = vcombine.high %v788_v27, %v796_v28  ;;  %v803_v35 = vld [vmem:[%s13645_s1 + $0x1800] sm:$0xff] }
  0xa4   :  { %v891_v20 = vld [vmem:[%s13645_s1 + $0x1ac0] sm:$0xff] }
  0xa6   :  { %6390 = vmatpush1.bf16.msra.mxu0 %v9255_v40  ;;  %6554 = vmatpush1.bf16.msra.mxu1 %v9257_v41  ;;  %v9367_v40 = vcombine.low %v787_v24, %v795_v26  ;;  %v9369_v41 = vcombine.low %v788_v27, %v796_v28  ;;  %v9464_v24 = vcombine.high %v883_v19, %v891_v20  ;;  %v899_v27 = vld [vmem:[%s13645_s1 + $0x1b00] sm:$0xff] }
  0xa7   :  { %6391 = vmatprep.subr.bf16.mxu0 %v9272_v42  ;;  %6555 = vmatprep.subr.bf16.mxu1 %v9274_v43  ;;  %v9384_v42 = vcombine.high %v803_v35, %v811_v36  ;;  %v9386_v43 = vcombine.high %v804_v16, %v812_v37  ;;  %v907_v28 = vld [vmem:[%s13645_s1 + $0x1b40] sm:$0xff] }
  0xaa   :  { %6392 = vmatpush1.bf16.msra.mxu0 %v9271_v48  ;;  %6556 = vmatpush1.bf16.msra.mxu1 %v9273_v49  ;;  %v820_v48 = vld [vmem:[%s13645_s1 + $0x1888] sm:$0xff] }
  0xab   :  { %6393 = vmatprep.subr.bf16.mxu0 %v9288_v50  ;;  %6557 = vmatprep.subr.bf16.mxu1 %v9290_v51  ;;  %v828_v49 = vld [vmem:[%s13645_s1 + $0x18c8] sm:$0xff]  ;;  %v9383_v50 = vcombine.low %v803_v35, %v811_v36  ;;  %v9385_v51 = vcombine.low %v804_v16, %v812_v37  ;;  %v9480_v35 = vcombine.high %v899_v27, %v907_v28  ;;  %v915_v16 = vld [vmem:[%s13645_s1 + $0x1b80] sm:$0xff] }
  0xac   :  { %v9402_v53 = vcombine.high %v820_v48, %v828_v49  ;;  %v923_v37 = vld [vmem:[%s13645_s1 + $0x1bc0] sm:$0xff] }
  0xae   :  { %6394 = vmatpush1.bf16.msra.mxu0 %v9287_v56  ;;  %6558 = vmatpush1.bf16.msra.mxu1 %v9289_v59  ;;  %v836_v56 = vld [vmem:[%s13645_s1 + $0x1908] sm:$0xff] }
  0xaf   :  { %6395 = vmatprep.subr.bf16.mxu0 %v9304_v60  ;;  %6559 = vmatprep.subr.bf16.mxu1 %v9306_v61  ;;  %v844_v59 = vld [vmem:[%s13645_s1 + $0x1948] sm:$0xff]  ;;  %v9399_v60 = vcombine.low %v819_v44, %v827_v45  ;;  %v9401_v61 = vcombine.low %v820_v48, %v828_v49  ;;  %v931_v45 = vld [vmem:[%s13645_s1 + $0x1c00] sm:$0xff] }
  0xb0   :  { %v9418_v0 = vcombine.high %v836_v56, %v844_v59  ;;  %v939_v48 = vld [vmem:[%s13645_s1 + $0x1c40] sm:$0xff]  ;;  %v932_v49 = vld [vmem:[%s13645_s1 + $0x1c08] sm:$0xff] }
  0xb2   :  { %6396 = vmatpush1.bf16.msra.mxu0 %v9303_v3  ;;  %6560 = vmatpush1.bf16.msra.mxu1 %v9305_v4  ;;  %v852_v3 = vld [vmem:[%s13645_s1 + $0x1988] sm:$0xff] }
  0xb3   :  { %6397 = vmatprep.subr.bf16.mxu0 %v9320_v5  ;;  %6561 = vmatprep.subr.bf16.mxu1 %v9322_v6  ;;  %v860_v4 = vld [vmem:[%s13645_s1 + $0x19c8] sm:$0xff]  ;;  %v9415_v5 = vcombine.low %v835_v29, %v843_v54  ;;  %v9417_v6 = vcombine.low %v836_v56, %v844_v59  ;;  %v947_v54 = vld [vmem:[%s13645_s1 + $0x1c80] sm:$0xff] }
  0xb4   :  { %v9434_v8 = vcombine.high %v852_v3, %v860_v4  ;;  %v955_v56 = vld [vmem:[%s13645_s1 + $0x1cc0] sm:$0xff]  ;;  %v948_v59 = vld [vmem:[%s13645_s1 + $0x1c88] sm:$0xff] }
  0xb6   :  { %6398 = vmatpush1.bf16.msra.mxu0 %v9319_v11  ;;  %6562 = vmatpush1.bf16.msra.mxu1 %v9321_v12  ;;  %v868_v11 = vld [vmem:[%s13645_s1 + $0x1a08] sm:$0xff] }
  0xb7   :  { %6399 = vmatprep.subr.bf16.mxu0 %v9336_v13  ;;  %6563 = vmatprep.subr.bf16.mxu1 %v9338_v14  ;;  %v876_v12 = vld [vmem:[%s13645_s1 + $0x1a48] sm:$0xff]  ;;  %v9431_v13 = vcombine.low %v851_v1, %v859_v2  ;;  %v9433_v14 = vcombine.low %v852_v3, %v860_v4  ;;  %v963_v2 = vld [vmem:[%s13645_s1 + $0x1d00] sm:$0xff] }
  0xb8   :  { %v9450_v18 = vcombine.high %v868_v11, %v876_v12  ;;  %v971_v3 = vld [vmem:[%s13645_s1 + $0x1d40] sm:$0xff]  ;;  %v964_v4 = vld [vmem:[%s13645_s1 + $0x1d08] sm:$0xff] }
  0xba   :  { %6400 = vmatpush1.bf16.msra.mxu0 %v9335_v21  ;;  %6564 = vmatpush1.bf16.msra.mxu1 %v9337_v22  ;;  %v884_v21 = vld [vmem:[%s13645_s1 + $0x1a88] sm:$0xff] }
  0xbb   :  { %6401 = vmatprep.subr.bf16.mxu0 %v9352_v23  ;;  %6565 = vmatprep.subr.bf16.mxu1 %v9354_v58  ;;  %v892_v22 = vld [vmem:[%s13645_s1 + $0x1ac8] sm:$0xff]  ;;  %v9447_v23 = vcombine.low %v867_v9, %v875_v10  ;;  %v9449_v58 = vcombine.low %v868_v11, %v876_v12  ;;  %v979_v10 = vld [vmem:[%s13645_s1 + $0x1d80] sm:$0xff] }
  0xbc   :  { %v9466_v26 = vcombine.high %v884_v21, %v892_v22  ;;  %v987_v11 = vld [vmem:[%s13645_s1 + $0x1dc0] sm:$0xff]  ;;  %v980_v12 = vld [vmem:[%s13645_s1 + $0x1d88] sm:$0xff] }
  0xbe   :  { %6402 = vmatpush1.bf16.msra.mxu0 %v9351_v31  ;;  %6566 = vmatpush1.bf16.msra.mxu1 %v9353_v32  ;;  %v900_v31 = vld [vmem:[%s13645_s1 + $0x1b08] sm:$0xff] }
  0xbf   :  { %6403 = vmatprep.subr.bf16.mxu0 %v9368_v33  ;;  %6567 = vmatprep.subr.bf16.mxu1 %v9370_v34  ;;  %v908_v32 = vld [vmem:[%s13645_s1 + $0x1b48] sm:$0xff]  ;;  %v9463_v33 = vcombine.low %v883_v19, %v891_v20  ;;  %v9465_v34 = vcombine.low %v884_v21, %v892_v22  ;;  %v995_v20 = vld [vmem:[%s13645_s1 + $0x1e00] sm:$0xff] }
  0xc0   :  { %v9482_v36 = vcombine.high %v900_v31, %v908_v32  ;;  %v1003_v21 = vld [vmem:[%s13645_s1 + $0x1e40] sm:$0xff]  ;;  %v996_v22 = vld [vmem:[%s13645_s1 + $0x1e08] sm:$0xff] }
  0xc2   :  { %6404 = vmatpush1.bf16.msra.mxu0 %v9367_v40  ;;  %6568 = vmatpush1.bf16.msra.mxu1 %v9369_v41  ;;  %v924_v40 = vld [vmem:[%s13645_s1 + $0x1bc8] sm:$0xff]  ;;  %v9479_v41 = vcombine.low %v899_v27, %v907_v28  ;;  %v1011_v28 = vld [vmem:[%s13645_s1 + $0x1e80] sm:$0xff] }
  0xc3   :  { %6414 = vmatprep.subr.bf16.mxu0 %v9384_v42  ;;  %6578 = vmatprep.subr.bf16.mxu1 %v9386_v43  ;;  %v9481_v42 = vcombine.low %v900_v31, %v908_v32  ;;  %v9496_v43 = vcombine.high %v915_v16, %v923_v37  ;;  %v9498_v44 = vcombine.high %v916_v39, %v924_v40  ;;  %v1019_v31 = vld [vmem:[%s13645_s1 + $0x1ec0] sm:$0xff]  ;;  %v1012_v32 = vld [vmem:[%s13645_s1 + $0x1e88] sm:$0xff] }
  0xc5   :  { %6406 = vmatmul.mubr.bf16.vlgmr.msra.gmra.mrb[0].mxu0 %v10727_v47  ;;  %6570 = vmatmul.mubr.bf16.vlgmr.msra.gmra.mrb[0].mxu1 %v10727_v47 }
  0xc6   :  { %6415 = vmatpush1.bf16.msra.mxu0 %v9383_v50  ;;  %6579 = vmatpush1.bf16.msra.mxu1 %v9385_v51  ;;  %v940_v50 = vld [vmem:[%s13645_s1 + $0x1c48] sm:$0xff]  ;;  %v9495_v51 = vcombine.low %v915_v16, %v923_v37  ;;  %v1027_v37 = vld [vmem:[%s13645_s1 + $0x1f00] sm:$0xff] }
  0xc7   :  { %6416 = vmatprep.subr.bf16.mxu0 %v9400_v52  ;;  %6580 = vmatprep.subr.bf16.mxu1 %v9402_v53  ;;  %v9497_v52 = vcombine.low %v916_v39, %v924_v40  ;;  %v9512_v53 = vcombine.high %v931_v45, %v939_v48  ;;  %v9514_v29 = vcombine.high %v932_v49, %v940_v50  ;;  %v1035_v39 = vld [vmem:[%s13645_s1 + $0x1f40] sm:$0xff]  ;;  %v1028_v40 = vld [vmem:[%s13645_s1 + $0x1f08] sm:$0xff] }
  0xc8   :  { %6446 = vmatprep.mubr.bf16.mxu0 %v10743_v55  ;;  %6610 = vmatprep.mubr.bf16.mxu1 %v10743_v55 }
  0xca   :  { %6417 = vmatpush1.bf16.msra.mxu0 %v9399_v60  ;;  %6581 = vmatpush1.bf16.msra.mxu1 %v9401_v61  ;;  %v956_v60 = vld [vmem:[%s13645_s1 + $0x1cc8] sm:$0xff]  ;;  %v9511_v61 = vcombine.low %v931_v45, %v939_v48  ;;  %v1043_v48 = vld [vmem:[%s13645_s1 + $0x1f80] sm:$0xff] }
  0xcb   :  { %6418 = vmatprep.subr.bf16.mxu0 %v9416_v63  ;;  %6582 = vmatprep.subr.bf16.mxu1 %v9418_v0  ;;  %v9513_v63 = vcombine.low %v932_v49, %v940_v50  ;;  %v9528_v0 = vcombine.high %v947_v54, %v955_v56  ;;  %v9530_v1 = vcombine.high %v948_v59, %v956_v60  ;;  %v1051_v49 = vld [vmem:[%s13645_s1 + $0x1fc0] sm:$0xff]  ;;  %v1044_v50 = vld [vmem:[%s13645_s1 + $0x1f88] sm:$0xff] }
  0xce   :  { %6419 = vmatpush1.bf16.msra.mxu0 %v9415_v5  ;;  %6583 = vmatpush1.bf16.msra.mxu1 %v9417_v6  ;;  %v972_v5 = vld [vmem:[%s13645_s1 + $0x1d48] sm:$0xff]  ;;  %v9527_v6 = vcombine.low %v947_v54, %v955_v56  ;;  %v37_v56 = vld [vmem:[%s13645_s1 + $0x10] sm:$0xff] }
  0xcf   :  { %6420 = vmatprep.subr.bf16.mxu0 %v9432_v7  ;;  %6584 = vmatprep.subr.bf16.mxu1 %v9434_v8  ;;  %v9529_v7 = vcombine.low %v948_v59, %v956_v60  ;;  %v9544_v8 = vcombine.high %v963_v2, %v971_v3  ;;  %v9546_v9 = vcombine.high %v964_v4, %v972_v5  ;;  %v45_v59 = vld [vmem:[%s13645_s1 + $0x50] sm:$0xff]  ;;  %v38_v60 = vld [vmem:[%s13645_s1 + $0x18] sm:$0xff] }
  0xd2   :  { %6421 = vmatpush1.bf16.msra.mxu0 %v9431_v13  ;;  %6585 = vmatpush1.bf16.msra.mxu1 %v9433_v14  ;;  %v988_v13 = vld [vmem:[%s13645_s1 + $0x1dc8] sm:$0xff]  ;;  %v9543_v14 = vcombine.low %v963_v2, %v971_v3  ;;  %v53_v3 = vld [vmem:[%s13645_s1 + $0x90] sm:$0xff] }
  0xd3   :  { %6422 = vmatprep.subr.bf16.mxu0 %v9448_v15  ;;  %6586 = vmatprep.subr.bf16.mxu1 %v9450_v18  ;;  %v9545_v15 = vcombine.low %v964_v4, %v972_v5  ;;  %v9560_v18 = vcombine.high %v979_v10, %v987_v11  ;;  %v9562_v19 = vcombine.high %v980_v12, %v988_v13  ;;  %v61_v4 = vld [vmem:[%s13645_s1 + $0xd0] sm:$0xff] }
  0xd4   :  { %v10931_v5 = vcombine.low %v10723_v46, %v10723_v46  ;;  %v69_v46 = vld [vmem:[%s13645_s1 + $0x110] sm:$0xff] }
  0xd6   :  { %6423 = vmatpush1.bf16.msra.mxu0 %v9447_v23  ;;  %6587 = vmatpush1.bf16.msra.mxu1 %v9449_v58  ;;  %v1004_v23 = vld [vmem:[%s13645_s1 + $0x1e48] sm:$0xff]  ;;  %v9559_v58 = vcombine.low %v979_v10, %v987_v11  ;;  %v8636_v10 = vcombine.high %v53_v3, %v61_v4 }
  0xd7   :  { %6424 = vmatprep.subr.bf16.mxu0 %v9464_v24  ;;  %6588 = vmatprep.subr.bf16.mxu1 %v9466_v26  ;;  %v9561_v24 = vcombine.low %v980_v12, %v988_v13  ;;  %v9576_v26 = vcombine.high %v995_v20, %v1003_v21  ;;  %v9578_v27 = vcombine.high %v996_v22, %v1004_v23  ;;  %v77_v12 = vld [vmem:[%s13645_s1 + $0x150] sm:$0xff]  ;;  %v70_v13 = vld [vmem:[%s13645_s1 + $0x118] sm:$0xff] }
  0xda   :  { %6425 = vmatpush1.bf16.msra.mxu0 %v9463_v33  ;;  %6589 = vmatpush1.bf16.msra.mxu1 %v9465_v34  ;;  %v1020_v33 = vld [vmem:[%s13645_s1 + $0x1ec8] sm:$0xff]  ;;  %v9575_v34 = vcombine.low %v995_v20, %v1003_v21  ;;  %v85_v21 = vld [vmem:[%s13645_s1 + $0x190] sm:$0xff] }
  0xdb   :  { %6426 = vmatprep.subr.bf16.mxu0 %v9480_v35  ;;  %6590 = vmatprep.subr.bf16.mxu1 %v9482_v36  ;;  %v9577_v35 = vcombine.low %v996_v22, %v1004_v23  ;;  %v9592_v36 = vcombine.high %v1011_v28, %v1019_v31  ;;  %v9594_v16 = vcombine.high %v1012_v32, %v1020_v33  ;;  %v93_v22 = vld [vmem:[%s13645_s1 + $0x1d0] sm:$0xff]  ;;  %v86_v23 = vld [vmem:[%s13645_s1 + $0x198] sm:$0xff] }
  0xde   :  { %6427 = vmatpush1.bf16.msra.mxu0 %v9479_v41  ;;  %6591 = vmatpush1.bf16.msra.mxu1 %v9481_v42  ;;  %v1036_v41 = vld [vmem:[%s13645_s1 + $0x1f48] sm:$0xff]  ;;  %v9591_v42 = vcombine.low %v1011_v28, %v1019_v31  ;;  %v101_v31 = vld [vmem:[%s13645_s1 + $0x210] sm:$0xff] }
  0xdf   :  { %6428 = vmatprep.subr.bf16.mxu0 %v9496_v43  ;;  %6592 = vmatprep.subr.bf16.mxu1 %v9498_v44  ;;  %v9593_v43 = vcombine.low %v1012_v32, %v1020_v33  ;;  %v9608_v44 = vcombine.high %v1027_v37, %v1035_v39  ;;  %v9610_v45 = vcombine.high %v1028_v40, %v1036_v41  ;;  %v109_v32 = vld [vmem:[%s13645_s1 + $0x250] sm:$0xff]  ;;  %v102_v33 = vld [vmem:[%s13645_s1 + $0x218] sm:$0xff] }
  0xe2   :  { %6429 = vmatpush1.bf16.msra.mxu0 %v9495_v51  ;;  %6593 = vmatpush1.bf16.msra.mxu1 %v9497_v52  ;;  %v1052_v51 = vld [vmem:[%s13645_s1 + $0x1fc8] sm:$0xff]  ;;  %v9607_v52 = vcombine.low %v1027_v37, %v1035_v39  ;;  %v117_v39 = vld [vmem:[%s13645_s1 + $0x290] sm:$0xff] }
  0xe3   :  { %6430 = vmatprep.subr.bf16.mxu0 %v9512_v53  ;;  %6594 = vmatprep.subr.bf16.mxu1 %v9514_v29  ;;  %v9609_v53 = vcombine.low %v1028_v40, %v1036_v41  ;;  %v9624_v29 = vcombine.high %v1043_v48, %v1051_v49  ;;  %v9626_v54 = vcombine.high %v1044_v50, %v1052_v51  ;;  %v125_v40 = vld [vmem:[%s13645_s1 + $0x2d0] sm:$0xff]  ;;  %v118_v41 = vld [vmem:[%s13645_s1 + $0x298] sm:$0xff] }
  0xe6   :  { %6431 = vmatpush1.bf16.msra.mxu0 %v9511_v61  ;;  %6595 = vmatpush1.bf16.msra.mxu1 %v9513_v63  ;;  %v46_v61 = vld [vmem:[%s13645_s1 + $0x58] sm:$0xff]  ;;  %v9623_v63 = vcombine.low %v1043_v48, %v1051_v49  ;;  %v133_v49 = vld [vmem:[%s13645_s1 + $0x310] sm:$0xff] }
  0xe7   :  { %6432 = vmatprep.subr.bf16.mxu0 %v9528_v0  ;;  %6596 = vmatprep.subr.bf16.mxu1 %v9530_v1  ;;  %v9625_v0 = vcombine.low %v1044_v50, %v1052_v51  ;;  %v8620_v1 = vcombine.high %v37_v56, %v45_v59  ;;  %v8622_v2 = vcombine.high %v38_v60, %v46_v61  ;;  %v141_v50 = vld [vmem:[%s13645_s1 + $0x350] sm:$0xff]  ;;  %v134_v51 = vld [vmem:[%s13645_s1 + $0x318] sm:$0xff] }
  0xea   :  { %6433 = vmatpush1.bf16.msra.mxu0 %v9527_v6  ;;  %6597 = vmatpush1.bf16.msra.mxu1 %v9529_v7  ;;  %v54_v6 = vld [vmem:[%s13645_s1 + $0x98] sm:$0xff] }
  0xeb   :  { %6434 = vmatprep.subr.bf16.mxu0 %v9544_v8  ;;  %6598 = vmatprep.subr.bf16.mxu1 %v9546_v9  ;;  %v62_v7 = vld [vmem:[%s13645_s1 + $0xd8] sm:$0xff]  ;;  %v8619_v8 = vcombine.low %v37_v56, %v45_v59  ;;  %v8621_v9 = vcombine.low %v38_v60, %v46_v61  ;;  %v149_v59 = vld [vmem:[%s13645_s1 + $0x390] sm:$0xff] }
  0xec   :  { %v8638_v11 = vcombine.high %v54_v6, %v62_v7  ;;  %v157_v60 = vld [vmem:[%s13645_s1 + $0x3d0] sm:$0xff]  ;;  %v150_v61 = vld [vmem:[%s13645_s1 + $0x398] sm:$0xff] }
  0xee   :  { %6435 = vmatpush1.bf16.msra.mxu0 %v9543_v14  ;;  %6599 = vmatpush1.bf16.msra.mxu1 %v9545_v15  ;;  %v78_v14 = vld [vmem:[%s13645_s1 + $0x158] sm:$0xff]  ;;  %v8635_v15 = vcombine.low %v53_v3, %v61_v4  ;;  %v165_v4 = vld [vmem:[%s13645_s1 + $0x410] sm:$0xff] }
  0xef   :  { %6436 = vmatprep.subr.bf16.mxu0 %v9560_v18  ;;  %6600 = vmatprep.subr.bf16.mxu1 %v9562_v19  ;;  %v8637_v18 = vcombine.low %v54_v6, %v62_v7  ;;  %v8652_v19 = vcombine.high %v69_v46, %v77_v12  ;;  %v8654_v20 = vcombine.high %v70_v13, %v78_v14  ;;  %v173_v6 = vld [vmem:[%s13645_s1 + $0x450] sm:$0xff]  ;;  %v166_v7 = vld [vmem:[%s13645_s1 + $0x418] sm:$0xff] }
  0xf2   :  { %6437 = vmatpush1.bf16.msra.mxu0 %v9559_v58  ;;  %6601 = vmatpush1.bf16.msra.mxu1 %v9561_v24  ;;  %v94_v58 = vld [vmem:[%s13645_s1 + $0x1d8] sm:$0xff]  ;;  %v8651_v24 = vcombine.low %v69_v46, %v77_v12  ;;  %v181_v12 = vld [vmem:[%s13645_s1 + $0x490] sm:$0xff] }
  0xf3   :  { %6438 = vmatprep.subr.bf16.mxu0 %v9576_v26  ;;  %6602 = vmatprep.subr.bf16.mxu1 %v9578_v27  ;;  %v8653_v26 = vcombine.low %v70_v13, %v78_v14  ;;  %v8668_v27 = vcombine.high %v85_v21, %v93_v22  ;;  %v8670_v28 = vcombine.high %v86_v23, %v94_v58  ;;  %v189_v13 = vld [vmem:[%s13645_s1 + $0x4d0] sm:$0xff]  ;;  %v182_v14 = vld [vmem:[%s13645_s1 + $0x498] sm:$0xff] }
  0xf6   :  { %6439 = vmatpush1.bf16.msra.mxu0 %v9575_v34  ;;  %6603 = vmatpush1.bf16.msra.mxu1 %v9577_v35  ;;  %v110_v34 = vld [vmem:[%s13645_s1 + $0x258] sm:$0xff]  ;;  %v8667_v35 = vcombine.low %v85_v21, %v93_v22  ;;  %v197_v22 = vld [vmem:[%s13645_s1 + $0x510] sm:$0xff] }
  0xf7   :  { %6440 = vmatprep.subr.bf16.mxu0 %v9592_v36  ;;  %6604 = vmatprep.subr.bf16.mxu1 %v9594_v16  ;;  %v8669_v36 = vcombine.low %v86_v23, %v94_v58  ;;  %v8684_v16 = vcombine.high %v101_v31, %v109_v32  ;;  %v8686_v37 = vcombine.high %v102_v33, %v110_v34  ;;  %v205_v23 = vld [vmem:[%s13645_s1 + $0x550] sm:$0xff]  ;;  %v198_v58 = vld [vmem:[%s13645_s1 + $0x518] sm:$0xff] }
  0xfa   :  { %6441 = vmatpush1.bf16.msra.mxu0 %v9591_v42  ;;  %6605 = vmatpush1.bf16.msra.mxu1 %v9593_v43  ;;  %v126_v42 = vld [vmem:[%s13645_s1 + $0x2d8] sm:$0xff]  ;;  %v8683_v43 = vcombine.low %v101_v31, %v109_v32  ;;  %v213_v32 = vld [vmem:[%s13645_s1 + $0x590] sm:$0xff] }
  0xfb   :  { %6442 = vmatprep.subr.bf16.mxu0 %v9608_v44  ;;  %6606 = vmatprep.subr.bf16.mxu1 %v9610_v45  ;;  %v8685_v44 = vcombine.low %v102_v33, %v110_v34  ;;  %v8700_v45 = vcombine.high %v117_v39, %v125_v40  ;;  %v8702_v48 = vcombine.high %v118_v41, %v126_v42  ;;  %v221_v33 = vld [vmem:[%s13645_s1 + $0x5d0] sm:$0xff]  ;;  %v214_v34 = vld [vmem:[%s13645_s1 + $0x598] sm:$0xff] }
  0xfe   :  { %6443 = vmatpush1.bf16.msra.mxu0 %v9607_v52  ;;  %6607 = vmatpush1.bf16.msra.mxu1 %v9609_v53  ;;  %v142_v52 = vld [vmem:[%s13645_s1 + $0x358] sm:$0xff]  ;;  %v8699_v53 = vcombine.low %v117_v39, %v125_v40  ;;  %v229_v40 = vld [vmem:[%s13645_s1 + $0x610] sm:$0xff] }
  0xff   :  { %6444 = vmatprep.subr.bf16.mxu0 %v9624_v29  ;;  %6608 = vmatprep.subr.bf16.mxu1 %v9626_v54  ;;  %v8701_v29 = vcombine.low %v118_v41, %v126_v42  ;;  %v8716_v54 = vcombine.high %v133_v49, %v141_v50  ;;  %v8718_v56 = vcombine.high %v134_v51, %v142_v52  ;;  %v237_v41 = vld [vmem:[%s13645_s1 + $0x650] sm:$0xff]  ;;  %v230_v42 = vld [vmem:[%s13645_s1 + $0x618] sm:$0xff] }
 0x102   :  { %6445 = vmatpush1.bf16.msra.mxu0 %v9623_v63  ;;  %6609 = vmatpush1.bf16.msra.mxu1 %v9625_v0  ;;  %v158_v63 = vld [vmem:[%s13645_s1 + $0x3d8] sm:$0xff]  ;;  %v8715_v0 = vcombine.low %v133_v49, %v141_v50  ;;  %v245_v50 = vld [vmem:[%s13645_s1 + $0x690] sm:$0xff] }
 0x103   :  { %6619 = vmatprep.subr.bf16.mxu0 %v8620_v1  ;;  %6783 = vmatprep.subr.bf16.mxu1 %v8622_v2  ;;  %v8717_v1 = vcombine.low %v134_v51, %v142_v52  ;;  %v8732_v2 = vcombine.high %v149_v59, %v157_v60  ;;  %v8734_v3 = vcombine.high %v150_v61, %v158_v63  ;;  %v253_v51 = vld [vmem:[%s13645_s1 + $0x6d0] sm:$0xff]  ;;  %v246_v52 = vld [vmem:[%s13645_s1 + $0x698] sm:$0xff] }
 0x105   :  { %6447 = vmatmul.mubr.bf16.vlgmr.msra.gmra.mrb[0].mxu0 %v10931_v5  ;;  %6611 = vmatmul.mubr.bf16.vlgmr.msra.gmra.mrb[0].mxu1 %v10931_v5 }
 0x106   :  { %6620 = vmatpush1.bf16.msra.mxu0 %v8619_v8  ;;  %6784 = vmatpush1.bf16.msra.mxu1 %v8621_v9  ;;  %v174_v8 = vld [vmem:[%s13645_s1 + $0x458] sm:$0xff]  ;;  %v8731_v9 = vcombine.low %v149_v59, %v157_v60  ;;  %v261_v60 = vld [vmem:[%s13645_s1 + $0x710] sm:$0xff] }
 0x107   :  { %6621 = vmatprep.subr.bf16.mxu0 %v8636_v10  ;;  %6785 = vmatprep.subr.bf16.mxu1 %v8638_v11  ;;  %v8733_v10 = vcombine.low %v150_v61, %v158_v63  ;;  %v8748_v11 = vcombine.high %v165_v4, %v173_v6  ;;  %v8750_v46 = vcombine.high %v166_v7, %v174_v8  ;;  %v269_v61 = vld [vmem:[%s13645_s1 + $0x750] sm:$0xff]  ;;  %v262_v63 = vld [vmem:[%s13645_s1 + $0x718] sm:$0xff] }
 0x108   :  { %6651 = vmatprep.mubr.bf16.mxu0 %v10181_v62  ;;  %6815 = vmatprep.mubr.bf16.mxu1 %v10181_v62 }
 0x10a   :  { %6622 = vmatpush1.bf16.msra.mxu0 %v8635_v15  ;;  %6786 = vmatpush1.bf16.msra.mxu1 %v8637_v18  ;;  %v190_v15 = vld [vmem:[%s13645_s1 + $0x4d8] sm:$0xff]  ;;  %v8747_v18 = vcombine.low %v165_v4, %v173_v6  ;;  %v277_v6 = vld [vmem:[%s13645_s1 + $0x790] sm:$0xff] }
 0x10b   :  { %6623 = vmatprep.subr.bf16.mxu0 %v8652_v19  ;;  %6787 = vmatprep.subr.bf16.mxu1 %v8654_v20  ;;  %v8749_v19 = vcombine.low %v166_v7, %v174_v8  ;;  %v8764_v20 = vcombine.high %v181_v12, %v189_v13  ;;  %v8766_v21 = vcombine.high %v182_v14, %v190_v15  ;;  %v285_v7 = vld [vmem:[%s13645_s1 + $0x7d0] sm:$0xff]  ;;  %v278_v8 = vld [vmem:[%s13645_s1 + $0x798] sm:$0xff] }
 0x10e   :  { %6624 = vmatpush1.bf16.msra.mxu0 %v8651_v24  ;;  %6788 = vmatpush1.bf16.msra.mxu1 %v8653_v26  ;;  %v206_v24 = vld [vmem:[%s13645_s1 + $0x558] sm:$0xff]  ;;  %v8763_v26 = vcombine.low %v181_v12, %v189_v13  ;;  %v293_v13 = vld [vmem:[%s13645_s1 + $0x810] sm:$0xff] }
 0x10f   :  { %6625 = vmatprep.subr.bf16.mxu0 %v8668_v27  ;;  %6789 = vmatprep.subr.bf16.mxu1 %v8670_v28  ;;  %v8765_v27 = vcombine.low %v182_v14, %v190_v15  ;;  %v8780_v28 = vcombine.high %v197_v22, %v205_v23  ;;  %v8782_v31 = vcombine.high %v198_v58, %v206_v24  ;;  %v301_v14 = vld [vmem:[%s13645_s1 + $0x850] sm:$0xff]  ;;  %v294_v15 = vld [vmem:[%s13645_s1 + $0x818] sm:$0xff] }
 0x112   :  { %6626 = vmatpush1.bf16.msra.mxu0 %v8667_v35  ;;  %6790 = vmatpush1.bf16.msra.mxu1 %v8669_v36  ;;  %v222_v35 = vld [vmem:[%s13645_s1 + $0x5d8] sm:$0xff]  ;;  %v8779_v36 = vcombine.low %v197_v22, %v205_v23  ;;  %v309_v23 = vld [vmem:[%s13645_s1 + $0x890] sm:$0xff] }
 0x113   :  { %6627 = vmatprep.subr.bf16.mxu0 %v8684_v16  ;;  %6791 = vmatprep.subr.bf16.mxu1 %v8686_v37  ;;  %v8781_v16 = vcombine.low %v198_v58, %v206_v24  ;;  %v8796_v37 = vcombine.high %v213_v32, %v221_v33  ;;  %v8798_v39 = vcombine.high %v214_v34, %v222_v35  ;;  %v317_v58 = vld [vmem:[%s13645_s1 + $0x8d0] sm:$0xff]  ;;  %v310_v24 = vld [vmem:[%s13645_s1 + $0x898] sm:$0xff] }
 0x116   :  { %6628 = vmatpush1.bf16.msra.mxu0 %v8683_v43  ;;  %6792 = vmatpush1.bf16.msra.mxu1 %v8685_v44  ;;  %v238_v43 = vld [vmem:[%s13645_s1 + $0x658] sm:$0xff]  ;;  %v8795_v44 = vcombine.low %v213_v32, %v221_v33  ;;  %v325_v33 = vld [vmem:[%s13645_s1 + $0x910] sm:$0xff] }
 0x117   :  { %6629 = vmatprep.subr.bf16.mxu0 %v8700_v45  ;;  %6793 = vmatprep.subr.bf16.mxu1 %v8702_v48  ;;  %v8797_v45 = vcombine.low %v214_v34, %v222_v35  ;;  %v8812_v48 = vcombine.high %v229_v40, %v237_v41  ;;  %v8814_v49 = vcombine.high %v230_v42, %v238_v43  ;;  %v333_v34 = vld [vmem:[%s13645_s1 + $0x950] sm:$0xff]  ;;  %v326_v35 = vld [vmem:[%s13645_s1 + $0x918] sm:$0xff] }
 0x11a   :  { %6630 = vmatpush1.bf16.msra.mxu0 %v8699_v53  ;;  %6794 = vmatpush1.bf16.msra.mxu1 %v8701_v29  ;;  %v254_v53 = vld [vmem:[%s13645_s1 + $0x6d8] sm:$0xff]  ;;  %v8811_v29 = vcombine.low %v229_v40, %v237_v41  ;;  %v341_v41 = vld [vmem:[%s13645_s1 + $0x990] sm:$0xff] }
 0x11b   :  { %6631 = vmatprep.subr.bf16.mxu0 %v8716_v54  ;;  %6795 = vmatprep.subr.bf16.mxu1 %v8718_v56  ;;  %v8813_v54 = vcombine.low %v230_v42, %v238_v43  ;;  %v8828_v56 = vcombine.high %v245_v50, %v253_v51  ;;  %v8830_v59 = vcombine.high %v246_v52, %v254_v53  ;;  %v349_v42 = vld [vmem:[%s13645_s1 + $0x9d0] sm:$0xff]  ;;  %v342_v43 = vld [vmem:[%s13645_s1 + $0x998] sm:$0xff] }
 0x11e   :  { %6632 = vmatpush1.bf16.msra.mxu0 %v8715_v0  ;;  %6796 = vmatpush1.bf16.msra.mxu1 %v8717_v1  ;;  %v270_v0 = vld [vmem:[%s13645_s1 + $0x758] sm:$0xff]  ;;  %v8827_v1 = vcombine.low %v245_v50, %v253_v51  ;;  %v357_v51 = vld [vmem:[%s13645_s1 + $0xa10] sm:$0xff] }
 0x11f   :  { %6633 = vmatprep.subr.bf16.mxu0 %v8732_v2  ;;  %6797 = vmatprep.subr.bf16.mxu1 %v8734_v3  ;;  %v8829_v2 = vcombine.low %v246_v52, %v254_v53  ;;  %v8844_v3 = vcombine.high %v261_v60, %v269_v61  ;;  %v8846_v4 = vcombine.high %v262_v63, %v270_v0  ;;  %v365_v52 = vld [vmem:[%s13645_s1 + $0xa50] sm:$0xff]  ;;  %v358_v53 = vld [vmem:[%s13645_s1 + $0xa18] sm:$0xff] }
 0x122   :  { %6634 = vmatpush1.bf16.msra.mxu0 %v8731_v9  ;;  %6798 = vmatpush1.bf16.msra.mxu1 %v8733_v10  ;;  %v286_v9 = vld [vmem:[%s13645_s1 + $0x7d8] sm:$0xff]  ;;  %v8843_v10 = vcombine.low %v261_v60, %v269_v61  ;;  %v373_v61 = vld [vmem:[%s13645_s1 + $0xa90] sm:$0xff] }
 0x123   :  { %6635 = vmatprep.subr.bf16.mxu0 %v8748_v11  ;;  %6799 = vmatprep.subr.bf16.mxu1 %v8750_v46  ;;  %v8845_v11 = vcombine.low %v262_v63, %v270_v0  ;;  %v8860_v46 = vcombine.high %v277_v6, %v285_v7  ;;  %v8862_v12 = vcombine.high %v278_v8, %v286_v9  ;;  %v381_v63 = vld [vmem:[%s13645_s1 + $0xad0] sm:$0xff]  ;;  %v374_v0 = vld [vmem:[%s13645_s1 + $0xa98] sm:$0xff] }
 0x126   :  { %6636 = vmatpush1.bf16.msra.mxu0 %v8747_v18  ;;  %6800 = vmatpush1.bf16.msra.mxu1 %v8749_v19  ;;  %v302_v18 = vld [vmem:[%s13645_s1 + $0x858] sm:$0xff]  ;;  %v8859_v19 = vcombine.low %v277_v6, %v285_v7  ;;  %v389_v7 = vld [vmem:[%s13645_s1 + $0xb10] sm:$0xff] }
 0x127   :  { %6637 = vmatprep.subr.bf16.mxu0 %v8764_v20  ;;  %6801 = vmatprep.subr.bf16.mxu1 %v8766_v21  ;;  %v8861_v20 = vcombine.low %v278_v8, %v286_v9  ;;  %v8876_v21 = vcombine.high %v293_v13, %v301_v14  ;;  %v8878_v22 = vcombine.high %v294_v15, %v302_v18  ;;  %v397_v8 = vld [vmem:[%s13645_s1 + $0xb50] sm:$0xff]  ;;  %v390_v9 = vld [vmem:[%s13645_s1 + $0xb18] sm:$0xff] }
 0x12a   :  { %6638 = vmatpush1.bf16.msra.mxu0 %v8763_v26  ;;  %6802 = vmatpush1.bf16.msra.mxu1 %v8765_v27  ;;  %v318_v26 = vld [vmem:[%s13645_s1 + $0x8d8] sm:$0xff]  ;;  %v8875_v27 = vcombine.low %v293_v13, %v301_v14  ;;  %v405_v14 = vld [vmem:[%s13645_s1 + $0xb90] sm:$0xff] }
 0x12b   :  { %6639 = vmatprep.subr.bf16.mxu0 %v8780_v28  ;;  %6803 = vmatprep.subr.bf16.mxu1 %v8782_v31  ;;  %v8877_v28 = vcombine.low %v294_v15, %v302_v18  ;;  %v8892_v31 = vcombine.high %v309_v23, %v317_v58  ;;  %v8894_v32 = vcombine.high %v310_v24, %v318_v26  ;;  %v413_v15 = vld [vmem:[%s13645_s1 + $0xbd0] sm:$0xff]  ;;  %v406_v18 = vld [vmem:[%s13645_s1 + $0xb98] sm:$0xff] }
 0x12e   :  { %6640 = vmatpush1.bf16.msra.mxu0 %v8779_v36  ;;  %6804 = vmatpush1.bf16.msra.mxu1 %v8781_v16  ;;  %v334_v36 = vld [vmem:[%s13645_s1 + $0x958] sm:$0xff]  ;;  %v8891_v16 = vcombine.low %v309_v23, %v317_v58  ;;  %v421_v58 = vld [vmem:[%s13645_s1 + $0xc10] sm:$0xff] }
 0x12f   :  { %6641 = vmatprep.subr.bf16.mxu0 %v8796_v37  ;;  %6805 = vmatprep.subr.bf16.mxu1 %v8798_v39  ;;  %v8893_v37 = vcombine.low %v310_v24, %v318_v26  ;;  %v8908_v39 = vcombine.high %v325_v33, %v333_v34  ;;  %v8910_v40 = vcombine.high %v326_v35, %v334_v36  ;;  %v429_v24 = vld [vmem:[%s13645_s1 + $0xc50] sm:$0xff]  ;;  %v422_v26 = vld [vmem:[%s13645_s1 + $0xc18] sm:$0xff] }
 0x132   :  { %6642 = vmatpush1.bf16.msra.mxu0 %v8795_v44  ;;  %6806 = vmatpush1.bf16.msra.mxu1 %v8797_v45  ;;  %v350_v44 = vld [vmem:[%s13645_s1 + $0x9d8] sm:$0xff]  ;;  %v8907_v45 = vcombine.low %v325_v33, %v333_v34  ;;  %v437_v34 = vld [vmem:[%s13645_s1 + $0xc90] sm:$0xff] }
 0x133   :  { %6643 = vmatprep.subr.bf16.mxu0 %v8812_v48  ;;  %6807 = vmatprep.subr.bf16.mxu1 %v8814_v49  ;;  %v8909_v48 = vcombine.low %v326_v35, %v334_v36  ;;  %v8924_v49 = vcombine.high %v341_v41, %v349_v42  ;;  %v8926_v50 = vcombine.high %v342_v43, %v350_v44  ;;  %v445_v35 = vld [vmem:[%s13645_s1 + $0xcd0] sm:$0xff]  ;;  %v438_v36 = vld [vmem:[%s13645_s1 + $0xc98] sm:$0xff] }
 0x136   :  { %6644 = vmatpush1.bf16.msra.mxu0 %v8811_v29  ;;  %6808 = vmatpush1.bf16.msra.mxu1 %v8813_v54  ;;  %v366_v29 = vld [vmem:[%s13645_s1 + $0xa58] sm:$0xff]  ;;  %v8923_v54 = vcombine.low %v341_v41, %v349_v42  ;;  %v453_v42 = vld [vmem:[%s13645_s1 + $0xd10] sm:$0xff] }
 0x137   :  { %6645 = vmatprep.subr.bf16.mxu0 %v8828_v56  ;;  %6809 = vmatprep.subr.bf16.mxu1 %v8830_v59  ;;  %v8925_v56 = vcombine.low %v342_v43, %v350_v44  ;;  %v8940_v59 = vcombine.high %v357_v51, %v365_v52  ;;  %v8942_v60 = vcombine.high %v358_v53, %v366_v29  ;;  %v461_v43 = vld [vmem:[%s13645_s1 + $0xd50] sm:$0xff]  ;;  %v454_v44 = vld [vmem:[%s13645_s1 + $0xd18] sm:$0xff] }
 0x13a   :  { %6646 = vmatpush1.bf16.msra.mxu0 %v8827_v1  ;;  %6810 = vmatpush1.bf16.msra.mxu1 %v8829_v2  ;;  %v382_v1 = vld [vmem:[%s13645_s1 + $0xad8] sm:$0xff]  ;;  %v8939_v2 = vcombine.low %v357_v51, %v365_v52  ;;  %v469_v52 = vld [vmem:[%s13645_s1 + $0xd90] sm:$0xff] }
 0x13b   :  { %6647 = vmatprep.subr.bf16.mxu0 %v8844_v3  ;;  %6811 = vmatprep.subr.bf16.mxu1 %v8846_v4  ;;  %v8941_v3 = vcombine.low %v358_v53, %v366_v29  ;;  %v8956_v4 = vcombine.high %v373_v61, %v381_v63  ;;  %v8958_v6 = vcombine.high %v374_v0, %v382_v1  ;;  %v477_v53 = vld [vmem:[%s13645_s1 + $0xdd0] sm:$0xff]  ;;  %v470_v29 = vld [vmem:[%s13645_s1 + $0xd98] sm:$0xff] }
 0x13e   :  { %6648 = vmatpush1.bf16.msra.mxu0 %v8843_v10  ;;  %6812 = vmatpush1.bf16.msra.mxu1 %v8845_v11  ;;  %v398_v10 = vld [vmem:[%s13645_s1 + $0xb58] sm:$0xff]  ;;  %v8955_v11 = vcombine.low %v373_v61, %v381_v63  ;;  %v485_v63 = vld [vmem:[%s13645_s1 + $0xe10] sm:$0xff] }
 0x13f   :  { %6649 = vmatprep.subr.bf16.mxu0 %v8860_v46  ;;  %6813 = vmatprep.subr.bf16.mxu1 %v8862_v12  ;;  %v8957_v46 = vcombine.low %v374_v0, %v382_v1  ;;  %v8972_v12 = vcombine.high %v389_v7, %v397_v8  ;;  %v8974_v13 = vcombine.high %v390_v9, %v398_v10  ;;  %v493_v0 = vld [vmem:[%s13645_s1 + $0xe50] sm:$0xff]  ;;  %v486_v1 = vld [vmem:[%s13645_s1 + $0xe18] sm:$0xff] }
 0x142   :  { %6650 = vmatpush1.bf16.msra.mxu0 %v8859_v19  ;;  %6814 = vmatpush1.bf16.msra.mxu1 %v8861_v20  ;;  %v414_v19 = vld [vmem:[%s13645_s1 + $0xbd8] sm:$0xff]  ;;  %v8971_v20 = vcombine.low %v389_v7, %v397_v8  ;;  %v501_v8 = vld [vmem:[%s13645_s1 + $0xe90] sm:$0xff] }
 0x143   :  { %6660 = vmatprep.subr.bf16.mxu0 %v8876_v21  ;;  %6824 = vmatprep.subr.bf16.mxu1 %v8878_v22  ;;  %v8973_v21 = vcombine.low %v390_v9, %v398_v10  ;;  %v8988_v22 = vcombine.high %v405_v14, %v413_v15  ;;  %v8990_v23 = vcombine.high %v406_v18, %v414_v19  ;;  %v509_v9 = vld [vmem:[%s13645_s1 + $0xed0] sm:$0xff]  ;;  %v502_v10 = vld [vmem:[%s13645_s1 + $0xe98] sm:$0xff] }
 0x145   :  { %6652 = vmatmul.mubr.bf16.vlgmr.msra.gmra.mrb[4].mxu0 %v10307_v17  ;;  %6816 = vmatmul.mubr.bf16.vlgmr.msra.gmra.mrb[4].mxu1 %v10307_v17 }
 0x146   :  { %6661 = vmatpush1.bf16.msra.mxu0 %v8875_v27  ;;  %6825 = vmatpush1.bf16.msra.mxu1 %v8877_v28  ;;  %v430_v27 = vld [vmem:[%s13645_s1 + $0xc58] sm:$0xff]  ;;  %v8987_v28 = vcombine.low %v405_v14, %v413_v15  ;;  %v517_v15 = vld [vmem:[%s13645_s1 + $0xf10] sm:$0xff] }
 0x147   :  { %6662 = vmatprep.subr.bf16.mxu0 %v8892_v31  ;;  %6826 = vmatprep.subr.bf16.mxu1 %v8894_v32  ;;  %v8989_v31 = vcombine.low %v406_v18, %v414_v19  ;;  %v9004_v32 = vcombine.high %v421_v58, %v429_v24  ;;  %v9006_v33 = vcombine.high %v422_v26, %v430_v27  ;;  %v525_v18 = vld [vmem:[%s13645_s1 + $0xf50] sm:$0xff]  ;;  %v518_v19 = vld [vmem:[%s13645_s1 + $0xf18] sm:$0xff] }
 0x148   :  { %6692 = vmatprep.mubr.bf16.mxu0 %v10323_v25  ;;  %6856 = vmatprep.mubr.bf16.mxu1 %v10323_v25 }
 0x14a   :  { %6663 = vmatpush1.bf16.msra.mxu0 %v8891_v16  ;;  %6827 = vmatpush1.bf16.msra.mxu1 %v8893_v37  ;;  %v446_v16 = vld [vmem:[%s13645_s1 + $0xcd8] sm:$0xff]  ;;  %v9003_v37 = vcombine.low %v421_v58, %v429_v24  ;;  %v533_v24 = vld [vmem:[%s13645_s1 + $0xf90] sm:$0xff] }
 0x14b   :  { %6664 = vmatprep.subr.bf16.mxu0 %v8908_v39  ;;  %6828 = vmatprep.subr.bf16.mxu1 %v8910_v40  ;;  %v9005_v39 = vcombine.low %v422_v26, %v430_v27  ;;  %v9020_v40 = vcombine.high %v437_v34, %v445_v35  ;;  %v9022_v41 = vcombine.high %v438_v36, %v446_v16  ;;  %v541_v26 = vld [vmem:[%s13645_s1 + $0xfd0] sm:$0xff]  ;;  %v534_v27 = vld [vmem:[%s13645_s1 + $0xf98] sm:$0xff] }
 0x14e   :  { %6665 = vmatpush1.bf16.msra.mxu0 %v8907_v45  ;;  %6829 = vmatpush1.bf16.msra.mxu1 %v8909_v48  ;;  %v462_v45 = vld [vmem:[%s13645_s1 + $0xd58] sm:$0xff]  ;;  %v9019_v48 = vcombine.low %v437_v34, %v445_v35  ;;  %v549_v35 = vld [vmem:[%s13645_s1 + $0x1010] sm:$0xff] }
 0x14f   :  { %6666 = vmatprep.subr.bf16.mxu0 %v8924_v49  ;;  %6830 = vmatprep.subr.bf16.mxu1 %v8926_v50  ;;  %v9021_v49 = vcombine.low %v438_v36, %v446_v16  ;;  %v9036_v50 = vcombine.high %v453_v42, %v461_v43  ;;  %v9038_v51 = vcombine.high %v454_v44, %v462_v45  ;;  %v557_v36 = vld [vmem:[%s13645_s1 + $0x1050] sm:$0xff]  ;;  %v550_v16 = vld [vmem:[%s13645_s1 + $0x1018] sm:$0xff] }
 0x152   :  { %6667 = vmatpush1.bf16.msra.mxu0 %v8923_v54  ;;  %6831 = vmatpush1.bf16.msra.mxu1 %v8925_v56  ;;  %v478_v54 = vld [vmem:[%s13645_s1 + $0xdd8] sm:$0xff]  ;;  %v9035_v56 = vcombine.low %v453_v42, %v461_v43  ;;  %v565_v43 = vld [vmem:[%s13645_s1 + $0x1090] sm:$0xff] }
 0x153   :  { %6668 = vmatprep.subr.bf16.mxu0 %v8940_v59  ;;  %6832 = vmatprep.subr.bf16.mxu1 %v8942_v60  ;;  %v9037_v59 = vcombine.low %v454_v44, %v462_v45  ;;  %v9052_v60 = vcombine.high %v469_v52, %v477_v53  ;;  %v9054_v61 = vcombine.high %v470_v29, %v478_v54  ;;  %v573_v44 = vld [vmem:[%s13645_s1 + $0x10d0] sm:$0xff]  ;;  %v566_v45 = vld [vmem:[%s13645_s1 + $0x1098] sm:$0xff] }
 0x156   :  { %6669 = vmatpush1.bf16.msra.mxu0 %v8939_v2  ;;  %6833 = vmatpush1.bf16.msra.mxu1 %v8941_v3  ;;  %v494_v2 = vld [vmem:[%s13645_s1 + $0xe58] sm:$0xff]  ;;  %v9051_v3 = vcombine.low %v469_v52, %v477_v53  ;;  %v581_v53 = vld [vmem:[%s13645_s1 + $0x1110] sm:$0xff] }
 0x157   :  { %6670 = vmatprep.subr.bf16.mxu0 %v8956_v4  ;;  %6834 = vmatprep.subr.bf16.mxu1 %v8958_v6  ;;  %v9053_v4 = vcombine.low %v470_v29, %v478_v54  ;;  %v9068_v6 = vcombine.high %v485_v63, %v493_v0  ;;  %v9070_v7 = vcombine.high %v486_v1, %v494_v2  ;;  %v589_v29 = vld [vmem:[%s13645_s1 + $0x1150] sm:$0xff]  ;;  %v582_v54 = vld [vmem:[%s13645_s1 + $0x1118] sm:$0xff] }
 0x15a   :  { %6671 = vmatpush1.bf16.msra.mxu0 %v8955_v11  ;;  %6835 = vmatpush1.bf16.msra.mxu1 %v8957_v46  ;;  %v510_v11 = vld [vmem:[%s13645_s1 + $0xed8] sm:$0xff]  ;;  %v9067_v46 = vcombine.low %v485_v63, %v493_v0  ;;  %v597_v0 = vld [vmem:[%s13645_s1 + $0x1190] sm:$0xff] }
 0x15b   :  { %6672 = vmatprep.subr.bf16.mxu0 %v8972_v12  ;;  %6836 = vmatprep.subr.bf16.mxu1 %v8974_v13  ;;  %v9069_v12 = vcombine.low %v486_v1, %v494_v2  ;;  %v9084_v13 = vcombine.high %v501_v8, %v509_v9  ;;  %v9086_v14 = vcombine.high %v502_v10, %v510_v11  ;;  %v605_v1 = vld [vmem:[%s13645_s1 + $0x11d0] sm:$0xff]  ;;  %v598_v2 = vld [vmem:[%s13645_s1 + $0x1198] sm:$0xff] }
 0x15e   :  { %6673 = vmatpush1.bf16.msra.mxu0 %v8971_v20  ;;  %6837 = vmatpush1.bf16.msra.mxu1 %v8973_v21  ;;  %v526_v20 = vld [vmem:[%s13645_s1 + $0xf58] sm:$0xff]  ;;  %v9083_v21 = vcombine.low %v501_v8, %v509_v9  ;;  %v613_v9 = vld [vmem:[%s13645_s1 + $0x1210] sm:$0xff] }
 0x15f   :  { %6674 = vmatprep.subr.bf16.mxu0 %v8988_v22  ;;  %6838 = vmatprep.subr.bf16.mxu1 %v8990_v23  ;;  %v9085_v22 = vcombine.low %v502_v10, %v510_v11  ;;  %v9100_v23 = vcombine.high %v517_v15, %v525_v18  ;;  %v9102_v58 = vcombine.high %v518_v19, %v526_v20  ;;  %v621_v10 = vld [vmem:[%s13645_s1 + $0x1250] sm:$0xff]  ;;  %v614_v11 = vld [vmem:[%s13645_s1 + $0x1218] sm:$0xff] }
 0x162   :  { %6675 = vmatpush1.bf16.msra.mxu0 %v8987_v28  ;;  %6839 = vmatpush1.bf16.msra.mxu1 %v8989_v31  ;;  %v542_v28 = vld [vmem:[%s13645_s1 + $0xfd8] sm:$0xff]  ;;  %v9099_v31 = vcombine.low %v517_v15, %v525_v18  ;;  %v629_v18 = vld [vmem:[%s13645_s1 + $0x1290] sm:$0xff] }
 0x163   :  { %6676 = vmatprep.subr.bf16.mxu0 %v9004_v32  ;;  %6840 = vmatprep.subr.bf16.mxu1 %v9006_v33  ;;  %v9101_v32 = vcombine.low %v518_v19, %v526_v20  ;;  %v9116_v33 = vcombine.high %v533_v24, %v541_v26  ;;  %v9118_v34 = vcombine.high %v534_v27, %v542_v28  ;;  %v637_v19 = vld [vmem:[%s13645_s1 + $0x12d0] sm:$0xff]  ;;  %v630_v20 = vld [vmem:[%s13645_s1 + $0x1298] sm:$0xff] }
 0x166   :  { %6677 = vmatpush1.bf16.msra.mxu0 %v9003_v37  ;;  %6841 = vmatpush1.bf16.msra.mxu1 %v9005_v39  ;;  %v558_v37 = vld [vmem:[%s13645_s1 + $0x1058] sm:$0xff]  ;;  %v9115_v39 = vcombine.low %v533_v24, %v541_v26  ;;  %v645_v26 = vld [vmem:[%s13645_s1 + $0x1310] sm:$0xff] }
 0x167   :  { %6678 = vmatprep.subr.bf16.mxu0 %v9020_v40  ;;  %6842 = vmatprep.subr.bf16.mxu1 %v9022_v41  ;;  %v9117_v40 = vcombine.low %v534_v27, %v542_v28  ;;  %v9132_v41 = vcombine.high %v549_v35, %v557_v36  ;;  %v9134_v42 = vcombine.high %v550_v16, %v558_v37  ;;  %v653_v27 = vld [vmem:[%s13645_s1 + $0x1350] sm:$0xff]  ;;  %v646_v28 = vld [vmem:[%s13645_s1 + $0x1318] sm:$0xff] }
 0x16a   :  { %6679 = vmatpush1.bf16.msra.mxu0 %v9019_v48  ;;  %6843 = vmatpush1.bf16.msra.mxu1 %v9021_v49  ;;  %v574_v48 = vld [vmem:[%s13645_s1 + $0x10d8] sm:$0xff]  ;;  %v9131_v49 = vcombine.low %v549_v35, %v557_v36  ;;  %v661_v36 = vld [vmem:[%s13645_s1 + $0x1390] sm:$0xff] }
 0x16b   :  { %6680 = vmatprep.subr.bf16.mxu0 %v9036_v50  ;;  %6844 = vmatprep.subr.bf16.mxu1 %v9038_v51  ;;  %v9133_v50 = vcombine.low %v550_v16, %v558_v37  ;;  %v9148_v51 = vcombine.high %v565_v43, %v573_v44  ;;  %v9150_v52 = vcombine.high %v566_v45, %v574_v48  ;;  %v669_v16 = vld [vmem:[%s13645_s1 + $0x13d0] sm:$0xff]  ;;  %v662_v37 = vld [vmem:[%s13645_s1 + $0x1398] sm:$0xff] }
 0x16e   :  { %6681 = vmatpush1.bf16.msra.mxu0 %v9035_v56  ;;  %6845 = vmatpush1.bf16.msra.mxu1 %v9037_v59  ;;  %v590_v56 = vld [vmem:[%s13645_s1 + $0x1158] sm:$0xff]  ;;  %v9147_v59 = vcombine.low %v565_v43, %v573_v44  ;;  %v677_v44 = vld [vmem:[%s13645_s1 + $0x1410] sm:$0xff] }
 0x16f   :  { %6682 = vmatprep.subr.bf16.mxu0 %v9052_v60  ;;  %6846 = vmatprep.subr.bf16.mxu1 %v9054_v61  ;;  %v9149_v60 = vcombine.low %v566_v45, %v574_v48  ;;  %v9164_v61 = vcombine.high %v581_v53, %v589_v29  ;;  %v9166_v63 = vcombine.high %v582_v54, %v590_v56  ;;  %v685_v45 = vld [vmem:[%s13645_s1 + $0x1450] sm:$0xff]  ;;  %v678_v48 = vld [vmem:[%s13645_s1 + $0x1418] sm:$0xff] }
 0x172   :  { %6683 = vmatpush1.bf16.msra.mxu0 %v9051_v3  ;;  %6847 = vmatpush1.bf16.msra.mxu1 %v9053_v4  ;;  %v606_v3 = vld [vmem:[%s13645_s1 + $0x11d8] sm:$0xff]  ;;  %v9163_v4 = vcombine.low %v581_v53, %v589_v29  ;;  %v693_v29 = vld [vmem:[%s13645_s1 + $0x1490] sm:$0xff] }
 0x173   :  { %6684 = vmatprep.subr.bf16.mxu0 %v9068_v6  ;;  %6848 = vmatprep.subr.bf16.mxu1 %v9070_v7  ;;  %v9165_v6 = vcombine.low %v582_v54, %v590_v56  ;;  %v9180_v7 = vcombine.high %v597_v0, %v605_v1  ;;  %v9182_v8 = vcombine.high %v598_v2, %v606_v3  ;;  %v701_v54 = vld [vmem:[%s13645_s1 + $0x14d0] sm:$0xff]  ;;  %v694_v56 = vld [vmem:[%s13645_s1 + $0x1498] sm:$0xff] }
 0x176   :  { %6685 = vmatpush1.bf16.msra.mxu0 %v9067_v46  ;;  %6849 = vmatpush1.bf16.msra.mxu1 %v9069_v12  ;;  %v622_v46 = vld [vmem:[%s13645_s1 + $0x1258] sm:$0xff]  ;;  %v9179_v12 = vcombine.low %v597_v0, %v605_v1  ;;  %v709_v1 = vld [vmem:[%s13645_s1 + $0x1510] sm:$0xff] }
 0x177   :  { %6686 = vmatprep.subr.bf16.mxu0 %v9084_v13  ;;  %6850 = vmatprep.subr.bf16.mxu1 %v9086_v14  ;;  %v9181_v13 = vcombine.low %v598_v2, %v606_v3  ;;  %v9196_v14 = vcombine.high %v613_v9, %v621_v10  ;;  %v9198_v15 = vcombine.high %v614_v11, %v622_v46  ;;  %v717_v2 = vld [vmem:[%s13645_s1 + $0x1550] sm:$0xff]  ;;  %v710_v3 = vld [vmem:[%s13645_s1 + $0x1518] sm:$0xff] }
 0x17a   :  { %6687 = vmatpush1.bf16.msra.mxu0 %v9083_v21  ;;  %6851 = vmatpush1.bf16.msra.mxu1 %v9085_v22  ;;  %v638_v21 = vld [vmem:[%s13645_s1 + $0x12d8] sm:$0xff]  ;;  %v9195_v22 = vcombine.low %v613_v9, %v621_v10  ;;  %v725_v10 = vld [vmem:[%s13645_s1 + $0x1590] sm:$0xff] }
 0x17b   :  { %6688 = vmatprep.subr.bf16.mxu0 %v9100_v23  ;;  %6852 = vmatprep.subr.bf16.mxu1 %v9102_v58  ;;  %v9197_v23 = vcombine.low %v614_v11, %v622_v46  ;;  %v9212_v58 = vcombine.high %v629_v18, %v637_v19  ;;  %v9214_v24 = vcombine.high %v630_v20, %v638_v21  ;;  %v733_v11 = vld [vmem:[%s13645_s1 + $0x15d0] sm:$0xff]  ;;  %v726_v46 = vld [vmem:[%s13645_s1 + $0x1598] sm:$0xff] }
 0x17e   :  { %6689 = vmatpush1.bf16.msra.mxu0 %v9099_v31  ;;  %6853 = vmatpush1.bf16.msra.mxu1 %v9101_v32  ;;  %v654_v31 = vld [vmem:[%s13645_s1 + $0x1358] sm:$0xff]  ;;  %v9211_v32 = vcombine.low %v629_v18, %v637_v19  ;;  %v741_v19 = vld [vmem:[%s13645_s1 + $0x1610] sm:$0xff] }
 0x17f   :  { %6690 = vmatprep.subr.bf16.mxu0 %v9116_v33  ;;  %6854 = vmatprep.subr.bf16.mxu1 %v9118_v34  ;;  %v9213_v33 = vcombine.low %v630_v20, %v638_v21  ;;  %v9228_v34 = vcombine.high %v645_v26, %v653_v27  ;;  %v9230_v35 = vcombine.high %v646_v28, %v654_v31  ;;  %v749_v20 = vld [vmem:[%s13645_s1 + $0x1650] sm:$0xff]  ;;  %v742_v21 = vld [vmem:[%s13645_s1 + $0x1618] sm:$0xff] }
 0x182   :  { %6691 = vmatpush1.bf16.msra.mxu0 %v9115_v39  ;;  %6855 = vmatpush1.bf16.msra.mxu1 %v9117_v40  ;;  %v670_v39 = vld [vmem:[%s13645_s1 + $0x13d8] sm:$0xff]  ;;  %v9227_v40 = vcombine.low %v645_v26, %v653_v27  ;;  %v757_v27 = vld [vmem:[%s13645_s1 + $0x1690] sm:$0xff] }
 0x183   :  { %6701 = vmatprep.subr.bf16.mxu0 %v9132_v41  ;;  %6865 = vmatprep.subr.bf16.mxu1 %v9134_v42  ;;  %v9229_v41 = vcombine.low %v646_v28, %v654_v31  ;;  %v9244_v42 = vcombine.high %v661_v36, %v669_v16  ;;  %v9246_v43 = vcombine.high %v662_v37, %v670_v39  ;;  %v765_v28 = vld [vmem:[%s13645_s1 + $0x16d0] sm:$0xff]  ;;  %v758_v31 = vld [vmem:[%s13645_s1 + $0x1698] sm:$0xff] }
 0x185   :  { %6693 = vmatmul.mubr.bf16.vlgmr.msra.gmra.mrb[4].mxu0 %v10517_v30  ;;  %6857 = vmatmul.mubr.bf16.vlgmr.msra.gmra.mrb[4].mxu1 %v10517_v30 }
 0x186   :  { %6702 = vmatpush1.bf16.msra.mxu0 %v9131_v49  ;;  %6866 = vmatpush1.bf16.msra.mxu1 %v9133_v50  ;;  %v686_v49 = vld [vmem:[%s13645_s1 + $0x1458] sm:$0xff]  ;;  %v9243_v50 = vcombine.low %v661_v36, %v669_v16  ;;  %v773_v16 = vld [vmem:[%s13645_s1 + $0x1710] sm:$0xff] }
 0x187   :  { %6703 = vmatprep.subr.bf16.mxu0 %v9148_v51  ;;  %6867 = vmatprep.subr.bf16.mxu1 %v9150_v52  ;;  %v9245_v51 = vcombine.low %v662_v37, %v670_v39  ;;  %v9260_v52 = vcombine.high %v677_v44, %v685_v45  ;;  %v9262_v53 = vcombine.high %v678_v48, %v686_v49  ;;  %v781_v37 = vld [vmem:[%s13645_s1 + $0x1750] sm:$0xff]  ;;  %v774_v39 = vld [vmem:[%s13645_s1 + $0x1718] sm:$0xff] }
 0x188   :  { %6733 = vmatprep.mubr.bf16.mxu0 %v10533_v38  ;;  %6897 = vmatprep.mubr.bf16.mxu1 %v10533_v38 }
 0x18a   :  { %6704 = vmatpush1.bf16.msra.mxu0 %v9147_v59  ;;  %6868 = vmatpush1.bf16.msra.mxu1 %v9149_v60  ;;  %v702_v59 = vld [vmem:[%s13645_s1 + $0x14d8] sm:$0xff]  ;;  %v9259_v60 = vcombine.low %v677_v44, %v685_v45  ;;  %v789_v45 = vld [vmem:[%s13645_s1 + $0x1790] sm:$0xff] }
 0x18b   :  { %6705 = vmatprep.subr.bf16.mxu0 %v9164_v61  ;;  %6869 = vmatprep.subr.bf16.mxu1 %v9166_v63  ;;  %v9261_v61 = vcombine.low %v678_v48, %v686_v49  ;;  %v9276_v63 = vcombine.high %v693_v29, %v701_v54  ;;  %v9278_v0 = vcombine.high %v694_v56, %v702_v59  ;;  %v797_v48 = vld [vmem:[%s13645_s1 + $0x17d0] sm:$0xff]  ;;  %v790_v49 = vld [vmem:[%s13645_s1 + $0x1798] sm:$0xff] }
 0x18e   :  { %6706 = vmatpush1.bf16.msra.mxu0 %v9163_v4  ;;  %6870 = vmatpush1.bf16.msra.mxu1 %v9165_v6  ;;  %v718_v4 = vld [vmem:[%s13645_s1 + $0x1558] sm:$0xff]  ;;  %v9275_v6 = vcombine.low %v693_v29, %v701_v54  ;;  %v805_v54 = vld [vmem:[%s13645_s1 + $0x1810] sm:$0xff] }
 0x18f   :  { %6707 = vmatprep.subr.bf16.mxu0 %v9180_v7  ;;  %6871 = vmatprep.subr.bf16.mxu1 %v9182_v8  ;;  %v9277_v7 = vcombine.low %v694_v56, %v702_v59  ;;  %v9292_v8 = vcombine.high %v709_v1, %v717_v2  ;;  %v9294_v9 = vcombine.high %v710_v3, %v718_v4  ;;  %v813_v56 = vld [vmem:[%s13645_s1 + $0x1850] sm:$0xff]  ;;  %v806_v59 = vld [vmem:[%s13645_s1 + $0x1818] sm:$0xff] }
 0x192   :  { %6708 = vmatpush1.bf16.msra.mxu0 %v9179_v12  ;;  %6872 = vmatpush1.bf16.msra.mxu1 %v9181_v13  ;;  %v734_v12 = vld [vmem:[%s13645_s1 + $0x15d8] sm:$0xff]  ;;  %v9291_v13 = vcombine.low %v709_v1, %v717_v2  ;;  %v821_v2 = vld [vmem:[%s13645_s1 + $0x1890] sm:$0xff] }
 0x193   :  { %6709 = vmatprep.subr.bf16.mxu0 %v9196_v14  ;;  %6873 = vmatprep.subr.bf16.mxu1 %v9198_v15  ;;  %v9293_v14 = vcombine.low %v710_v3, %v718_v4  ;;  %v9308_v15 = vcombine.high %v725_v10, %v733_v11  ;;  %v9310_v18 = vcombine.high %v726_v46, %v734_v12  ;;  %v829_v3 = vld [vmem:[%s13645_s1 + $0x18d0] sm:$0xff]  ;;  %v822_v4 = vld [vmem:[%s13645_s1 + $0x1898] sm:$0xff] }
 0x196   :  { %6710 = vmatpush1.bf16.msra.mxu0 %v9195_v22  ;;  %6874 = vmatpush1.bf16.msra.mxu1 %v9197_v23  ;;  %v750_v22 = vld [vmem:[%s13645_s1 + $0x1658] sm:$0xff]  ;;  %v9307_v23 = vcombine.low %v725_v10, %v733_v11  ;;  %v837_v11 = vld [vmem:[%s13645_s1 + $0x1910] sm:$0xff] }
 0x197   :  { %6711 = vmatprep.subr.bf16.mxu0 %v9212_v58  ;;  %6875 = vmatprep.subr.bf16.mxu1 %v9214_v24  ;;  %v9309_v58 = vcombine.low %v726_v46, %v734_v12  ;;  %v9324_v24 = vcombine.high %v741_v19, %v749_v20  ;;  %v9326_v26 = vcombine.high %v742_v21, %v750_v22  ;;  %v845_v46 = vld [vmem:[%s13645_s1 + $0x1950] sm:$0xff]  ;;  %v838_v12 = vld [vmem:[%s13645_s1 + $0x1918] sm:$0xff] }
 0x19a   :  { %6712 = vmatpush1.bf16.msra.mxu0 %v9211_v32  ;;  %6876 = vmatpush1.bf16.msra.mxu1 %v9213_v33  ;;  %v766_v32 = vld [vmem:[%s13645_s1 + $0x16d8] sm:$0xff]  ;;  %v9323_v33 = vcombine.low %v741_v19, %v749_v20  ;;  %v853_v20 = vld [vmem:[%s13645_s1 + $0x1990] sm:$0xff] }
 0x19b   :  { %6713 = vmatprep.subr.bf16.mxu0 %v9228_v34  ;;  %6877 = vmatprep.subr.bf16.mxu1 %v9230_v35  ;;  %v9325_v34 = vcombine.low %v742_v21, %v750_v22  ;;  %v9340_v35 = vcombine.high %v757_v27, %v765_v28  ;;  %v9342_v36 = vcombine.high %v758_v31, %v766_v32  ;;  %v861_v21 = vld [vmem:[%s13645_s1 + $0x19d0] sm:$0xff]  ;;  %v854_v22 = vld [vmem:[%s13645_s1 + $0x1998] sm:$0xff] }
 0x19e   :  { %6714 = vmatpush1.bf16.msra.mxu0 %v9227_v40  ;;  %6878 = vmatpush1.bf16.msra.mxu1 %v9229_v41  ;;  %v782_v40 = vld [vmem:[%s13645_s1 + $0x1758] sm:$0xff]  ;;  %v9339_v41 = vcombine.low %v757_v27, %v765_v28  ;;  %v9436_v27 = vcombine.high %v853_v20, %v861_v21 }
 0x19f   :  { %6715 = vmatprep.subr.bf16.mxu0 %v9244_v42  ;;  %6879 = vmatprep.subr.bf16.mxu1 %v9246_v43  ;;  %v9341_v42 = vcombine.low %v758_v31, %v766_v32  ;;  %v9356_v43 = vcombine.high %v773_v16, %v781_v37  ;;  %v9358_v44 = vcombine.high %v774_v39, %v782_v40  ;;  %v869_v31 = vld [vmem:[%s13645_s1 + $0x1a10] sm:$0xff] }
 0x1a0   :  { %v877_v32 = vld [vmem:[%s13645_s1 + $0x1a50] sm:$0xff] }
 0x1a2   :  { %6716 = vmatpush1.bf16.msra.mxu0 %v9243_v50  ;;  %6880 = vmatpush1.bf16.msra.mxu1 %v9245_v51  ;;  %v798_v50 = vld [vmem:[%s13645_s1 + $0x17d8] sm:$0xff]  ;;  %v9355_v51 = vcombine.low %v773_v16, %v781_v37  ;;  %v9452_v37 = vcombine.high %v869_v31, %v877_v32 }
 0x1a3   :  { %6717 = vmatprep.subr.bf16.mxu0 %v9260_v52  ;;  %6881 = vmatprep.subr.bf16.mxu1 %v9262_v53  ;;  %v9357_v52 = vcombine.low %v774_v39, %v782_v40  ;;  %v9372_v53 = vcombine.high %v789_v45, %v797_v48  ;;  %v9374_v29 = vcombine.high %v790_v49, %v798_v50  ;;  %v885_v40 = vld [vmem:[%s13645_s1 + $0x1a90] sm:$0xff] }
 0x1a6   :  { %6718 = vmatpush1.bf16.msra.mxu0 %v9259_v60  ;;  %6882 = vmatpush1.bf16.msra.mxu1 %v9261_v61  ;;  %v814_v60 = vld [vmem:[%s13645_s1 + $0x1858] sm:$0xff]  ;;  %v9371_v61 = vcombine.low %v789_v45, %v797_v48  ;;  %v9451_v45 = vcombine.low %v869_v31, %v877_v32  ;;  %v1059_v48 = vld [vmem:[%s13647_s2] sm:$0xff]  ;;  %v933_v32 = vld [vmem:[%s13645_s1 + $0x1c10] sm:$0xff] }
 0x1a7   :  { %6719 = vmatprep.subr.bf16.mxu0 %v9276_v63  ;;  %6883 = vmatprep.subr.bf16.mxu1 %v9278_v0  ;;  %v9373_v63 = vcombine.low %v790_v49, %v798_v50  ;;  %v9388_v0 = vcombine.high %v805_v54, %v813_v56  ;;  %v9390_v1 = vcombine.high %v806_v59, %v814_v60 }
 0x1aa   :  { %6720 = vmatpush1.bf16.msra.mxu0 %v9275_v6  ;;  %6884 = vmatpush1.bf16.msra.mxu1 %v9277_v7  ;;  %v830_v6 = vld [vmem:[%s13645_s1 + $0x18d8] sm:$0xff]  ;;  %v9387_v7 = vcombine.low %v805_v54, %v813_v56  ;;  %v901_v54 = vld [vmem:[%s13645_s1 + $0x1b10] sm:$0xff] }
 0x1ab   :  { %6721 = vmatprep.subr.bf16.mxu0 %v9292_v8  ;;  %6885 = vmatprep.subr.bf16.mxu1 %v9294_v9  ;;  %v9389_v8 = vcombine.low %v806_v59, %v814_v60  ;;  %v9404_v9 = vcombine.high %v821_v2, %v829_v3  ;;  %v9406_v10 = vcombine.high %v822_v4, %v830_v6  ;;  %v909_v56 = vld [vmem:[%s13645_s1 + $0x1b50] sm:$0xff]  ;;  %v902_v60 = vld [vmem:[%s13645_s1 + $0x1b18] sm:$0xff] }
 0x1ae   :  { %6722 = vmatpush1.bf16.msra.mxu0 %v9291_v13  ;;  %6886 = vmatpush1.bf16.msra.mxu1 %v9293_v14  ;;  %v846_v13 = vld [vmem:[%s13645_s1 + $0x1958] sm:$0xff]  ;;  %v9403_v14 = vcombine.low %v821_v2, %v829_v3  ;;  %v9484_v3 = vcombine.high %v901_v54, %v909_v56 }
 0x1af   :  { %6723 = vmatprep.subr.bf16.mxu0 %v9308_v15  ;;  %6887 = vmatprep.subr.bf16.mxu1 %v9310_v18  ;;  %v9405_v15 = vcombine.low %v822_v4, %v830_v6  ;;  %v9420_v18 = vcombine.high %v837_v11, %v845_v46  ;;  %v9422_v19 = vcombine.high %v838_v12, %v846_v13 }
 0x1b2   :  { %6724 = vmatpush1.bf16.msra.mxu0 %v9307_v23  ;;  %6888 = vmatpush1.bf16.msra.mxu1 %v9309_v58  ;;  %v862_v23 = vld [vmem:[%s13645_s1 + $0x19d8] sm:$0xff]  ;;  %v1063_v58 = vlaneseq }
 0x1b3   :  { %6725 = vmatprep.subr.bf16.mxu0 %v9324_v24  ;;  %6889 = vmatprep.subr.bf16.mxu1 %v9326_v26  ;;  %v9419_v24 = vcombine.low %v837_v11, %v845_v46  ;;  %v9421_v26 = vcombine.low %v838_v12, %v846_v13  ;;  %v9438_v28 = vcombine.high %v854_v22, %v862_v23  ;;  %v918_v12 = vld [vmem:[%s13645_s1 + $0x1b98] sm:$0xff] }
 0x1b4   :  { %v9437_v16 = vcombine.low %v854_v22, %v862_v23  ;;  %v926_v13 = vld [vmem:[%s13645_s1 + $0x1bd8] sm:$0xff] }
 0x1b5   :  { %v9502_v31 = vcombine.high %v918_v12, %v926_v13 }
 0x1b6   :  { %6726 = vmatpush1.bf16.msra.mxu0 %v9323_v33  ;;  %6890 = vmatpush1.bf16.msra.mxu1 %v9325_v34  ;;  %v870_v33 = vld [vmem:[%s13645_s1 + $0x1a18] sm:$0xff] }
 0x1b7   :  { %6727 = vmatprep.subr.bf16.mxu0 %v9340_v35  ;;  %6891 = vmatprep.subr.bf16.mxu1 %v9342_v36  ;;  %v878_v34 = vld [vmem:[%s13645_s1 + $0x1a58] sm:$0xff]  ;;  %v11567_v35 = vshrl.u32 %v1063_v58, 7  ;;  %v9435_v36 = vcombine.low %v853_v20, %v861_v21  ;;  %v9483_v20 = vcombine.low %v901_v54, %v909_v56 }
 0x1b8   :  { %v9454_v39 = vcombine.high %v870_v33, %v878_v34 }
 0x1b9   :  { %v11588_v49 = vsub.s32 2, %v11567_v35  ;;  %v11591_v50 = vsub.s32 1, %v11567_v35 }
 0x1ba   :  { %6728 = vmatpush1.bf16.msra.mxu0 %v9339_v41  ;;  %6892 = vmatpush1.bf16.msra.mxu1 %v9341_v42  ;;  %v893_v41 = vld [vmem:[%s13645_s1 + $0x1ad0] sm:$0xff]  ;;  %v11576_v42 = vsub.s32 0, %v11567_v35 }
 0x1bb   :  { %6729 = vmatprep.subr.bf16.mxu0 %v9356_v43  ;;  %6893 = vmatprep.subr.bf16.mxu1 %v9358_v44  ;;  %v886_v43 = vld [vmem:[%s13645_s1 + $0x1a98] sm:$0xff] }
 0x1bc   :  { %v894_v44 = vld [vmem:[%s13645_s1 + $0x1ad8] sm:$0xff]  ;;  %v1066_v59 = vrot.slane %v1059_v48, %v11576_v42 }
 0x1bd   :  { %v9469_v2 = vcombine.low %v886_v43, %v894_v44 }
 0x1be   :  { %6730 = vmatpush1.bf16.msra.mxu0 %v9355_v51  ;;  %6894 = vmatpush1.bf16.msra.mxu1 %v9357_v52  ;;  %v9453_v51 = vcombine.low %v870_v33, %v878_v34  ;;  %v9468_v52 = vcombine.high %v885_v40, %v893_v41  ;;  %v941_v33 = vld [vmem:[%s13645_s1 + $0x1c50] sm:$0xff]  ;;  %v934_v34 = vld [vmem:[%s13645_s1 + $0x1c18] sm:$0xff] }
 0x1bf   :  { %6731 = vmatprep.subr.bf16.mxu0 %v9372_v53  ;;  %6895 = vmatprep.subr.bf16.mxu1 %v9374_v29  ;;  %v11594_v53 = vsub.s32 3, %v11567_v35  ;;  %v9470_v29 = vcombine.high %v886_v43, %v894_v44  ;;  %v9515_v56 = vcombine.low %v933_v32, %v941_v33 }
 0x1c1   :  { %v1078_v6 = vrot.slane %v1059_v48, %v11594_v53 }
 0x1c2   :  { %6732 = vmatpush1.bf16.msra.mxu0 %v9371_v61  ;;  %6896 = vmatpush1.bf16.msra.mxu1 %v9373_v63  ;;  %v910_v61 = vld [vmem:[%s13645_s1 + $0x1b58] sm:$0xff]  ;;  %v1074_v63 = vrot.slane %v1059_v48, %v11588_v49 }
 0x1c3   :  { %6742 = vmatprep.subr.bf16.mxu0 %v9388_v0  ;;  %6906 = vmatprep.subr.bf16.mxu1 %v9390_v1  ;;  %v1070_v0 = vrot.slane %v1059_v48, %v11591_v50  ;;  %v9467_v1 = vcombine.low %v885_v40, %v893_v41  ;;  %v9485_v58 = vcombine.low %v902_v60, %v910_v61  ;;  %v949_v48 = vld [vmem:[%s13645_s1 + $0x1c90] sm:$0xff] }
 0x1c4   :  { %v9501_v40 = vcombine.low %v918_v12, %v926_v13  ;;  %v9516_v41 = vcombine.high %v933_v32, %v941_v33 }
 0x1c5   :  { %6734 = vmatmul.mubr.bf16.vlgmr.msra.gmra.mrb[4].mxu0 %v10727_v47  ;;  %6898 = vmatmul.mubr.bf16.vlgmr.msra.gmra.mrb[4].mxu1 %v10727_v47 }
 0x1c6   :  { %6743 = vmatpush1.bf16.msra.mxu0 %v9387_v7  ;;  %6907 = vmatpush1.bf16.msra.mxu1 %v9389_v8  ;;  %v9486_v7 = vcombine.high %v902_v60, %v910_v61  ;;  %v917_v8 = vld [vmem:[%s13645_s1 + $0x1b90] sm:$0xff] }
 0x1c7   :  { %6744 = vmatprep.subr.bf16.mxu0 %v9404_v9  ;;  %6908 = vmatprep.subr.bf16.mxu1 %v9406_v10  ;;  %v925_v9 = vld [vmem:[%s13645_s1 + $0x1bd0] sm:$0xff] }
 0x1c8   :  { %6774 = vmatprep.mubr.bf16.mxu0 %v10743_v55  ;;  %6938 = vmatprep.mubr.bf16.mxu1 %v10743_v55 }
 0x1ca   :  { %6745 = vmatpush1.bf16.msra.mxu0 %v9403_v14  ;;  %6909 = vmatpush1.bf16.msra.mxu1 %v9405_v15 }
 0x1cb   :  { %6746 = vmatprep.subr.bf16.mxu0 %v9420_v18  ;;  %6910 = vmatprep.subr.bf16.mxu1 %v9422_v19 }
 0x1ce   :  { %6747 = vmatpush1.bf16.msra.mxu0 %v9419_v24  ;;  %6911 = vmatpush1.bf16.msra.mxu1 %v9421_v26  ;;  %v9500_v24 = vcombine.high %v917_v8, %v925_v9 }
 0x1cf   :  { %6748 = vmatprep.subr.bf16.mxu0 %v9436_v27  ;;  %6912 = vmatprep.subr.bf16.mxu1 %v9438_v28 }
 0x1d2   :  { %6749 = vmatpush1.bf16.msra.mxu0 %v9435_v36  ;;  %6913 = vmatpush1.bf16.msra.mxu1 %v9437_v16  ;;  %v942_v36 = vld [vmem:[%s13645_s1 + $0x1c58] sm:$0xff] }
 0x1d3   :  { %6750 = vmatprep.subr.bf16.mxu0 %v9452_v37  ;;  %6914 = vmatprep.subr.bf16.mxu1 %v9454_v39  ;;  %v9499_v39 = vcombine.low %v917_v8, %v925_v9  ;;  %v981_v8 = vld [vmem:[%s13645_s1 + $0x1d90] sm:$0xff] }
 0x1d4   :  { %v989_v9 = vld [vmem:[%s13645_s1 + $0x1dd0] sm:$0xff] }
 0x1d5   :  { %v9564_v13 = vcombine.high %v981_v8, %v989_v9 }
 0x1d6   :  { %6751 = vmatpush1.bf16.msra.mxu0 %v9451_v45  ;;  %6915 = vmatpush1.bf16.msra.mxu1 %v9453_v51  ;;  %v9518_v45 = vcombine.high %v934_v34, %v942_v36  ;;  %v957_v51 = vld [vmem:[%s13645_s1 + $0x1cd0] sm:$0xff] }
 0x1d7   :  { %6752 = vmatprep.subr.bf16.mxu0 %v9468_v52  ;;  %6916 = vmatprep.subr.bf16.mxu1 %v9470_v29  ;;  %v950_v52 = vld [vmem:[%s13645_s1 + $0x1c98] sm:$0xff]  ;;  %v9532_v60 = vcombine.high %v949_v48, %v957_v51 }
 0x1d8   :  { %v6448_v4 = vpop.f32.mrb[0].mxu0  ;;  %v6612_v11 = vpop.f32.mrb[0].mxu1  ;;  %v958_v29 = vld [vmem:[%s13645_s1 + $0x1cd8] sm:$0xff] }
 0x1d9   :  { %v9802_v10 = vadd.f32 %v6448_v4, %v1066_v59  ;;  %v6450_v46 = vpop.f32.mrb[1].mxu0  ;;  %v9804_v14 = vadd.f32 %v6612_v11, %v1074_v63  ;;  %v6614_v18 = vpop.f32.mrb[1].mxu1  ;;  %v9517_v59 = vcombine.low %v934_v34, %v942_v36  ;;  %v9534_v61 = vcombine.high %v950_v52, %v958_v29  ;;  %v965_v63 = vld [vmem:[%s13645_s1 + $0x1d10] sm:$0xff]  ;;  %v990_v11 = vld [vmem:[%s13645_s1 + $0x1dd8] sm:$0xff] }
 0x1da   :  { %v9803_v15 = vadd.f32 %v6450_v46, %v1070_v0  ;;  %v6452_v19 = vpop.f32.mrb[2].mxu0  ;;  %6753 = vmatpush1.bf16.msra.mxu0 %v9467_v1  ;;  %v6616_v22 = vpop.f32.mrb[2].mxu1  ;;  %6917 = vmatpush1.bf16.msra.mxu1 %v9469_v2  ;;  %v9805_v27 = vadd.f32 %v6614_v18, %v1078_v6  ;;  %v973_v0 = vld [vmem:[%s13645_s1 + $0x1d50] sm:$0xff]  ;;  %v966_v1 = vld [vmem:[%s13645_s1 + $0x1d18] sm:$0xff]  ;;  %v9533_v4 = vcombine.low %v950_v52, %v958_v29 }
 0x1db   :  { %v7603_v21 = vmax.f32 %v9802_v10, 0.0  ;;  %v6453_v23 = vpop.f32.mrb[3].mxu0  ;;  %6754 = vmatprep.subr.bf16.mxu0 %v9484_v3  ;;  %v6617_v28 = vpop.f32.mrb[3].mxu1  ;;  %6918 = vmatprep.subr.bf16.mxu1 %v9486_v7  ;;  %v7605_v16 = vmax.f32 %v9804_v14, 0.0  ;;  %v974_v2 = vld [vmem:[%s13645_s1 + $0x1d58] sm:$0xff]  ;;  %v9531_v3 = vcombine.low %v949_v48, %v957_v51  ;;  %v9548_v6 = vcombine.high %v965_v63, %v973_v0  ;;  %v1005_v18 = vld [vmem:[%s13645_s1 + $0x1e50] sm:$0xff] }
 0x1dc   :  { %v7604_v26 = vmax.f32 %v9803_v15, 0.0  ;;  %v7606_v43 = vmax.f32 %v9805_v27, 0.0  ;;  %v9550_v7 = vcombine.high %v966_v1, %v974_v2  ;;  %v982_v10 = vld [vmem:[%s13645_s1 + $0x1d98] sm:$0xff]  ;;  %v9547_v46 = vcombine.low %v965_v63, %v973_v0  ;;  %v997_v15 = vld [vmem:[%s13645_s1 + $0x1e10] sm:$0xff]  ;;  %v47_v63 = vld [vmem:[%s13645_s1 + $0x60] sm:$0xff] }
 0x1dd   :  { %v9549_v12 = vcombine.low %v966_v1, %v974_v2  ;;  %v9566_v14 = vcombine.high %v982_v10, %v990_v11  ;;  %v998_v19 = vld [vmem:[%s13645_s1 + $0x1e18] sm:$0xff]  ;;  %v9565_v22 = vcombine.low %v982_v10, %v990_v11  ;;  %v9580_v23 = vcombine.high %v997_v15, %v1005_v18  ;;  %v1029_v36 = vld [vmem:[%s13645_s1 + $0x1f10] sm:$0xff]  ;;  %v40_v0 = vld [vmem:[%s13645_s1 + $0x28] sm:$0xff] }
 0x1de   :  { %v7619_v37 = vadd.f32 %v7604_v26, %v7603_v21  ;;  %6755 = vmatpush1.bf16.msra.mxu0 %v9483_v20  ;;  %6919 = vmatpush1.bf16.msra.mxu1 %v9485_v58  ;;  %v1006_v20 = vld [vmem:[%s13645_s1 + $0x1e58] sm:$0xff]  ;;  %v9563_v21 = vcombine.low %v981_v8, %v989_v9  ;;  %v1021_v26 = vld [vmem:[%s13645_s1 + $0x1ed0] sm:$0xff]  ;;  %v48_v1 = vld [vmem:[%s13645_s1 + $0x68] sm:$0xff] }
 0x1df   :  { %6756 = vmatprep.subr.bf16.mxu0 %v9500_v24  ;;  %6920 = vmatprep.subr.bf16.mxu1 %v9502_v31  ;;  %v9582_v58 = vcombine.high %v998_v19, %v1006_v20  ;;  %v1013_v24 = vld [vmem:[%s13645_s1 + $0x1e90] sm:$0xff]  ;;  %v1014_v27 = vld [vmem:[%s13645_s1 + $0x1e98] sm:$0xff]  ;;  %v9579_v31 = vcombine.low %v997_v15, %v1005_v18  ;;  %v9581_v32 = vcombine.low %v998_v19, %v1006_v20  ;;  %v63_v8 = vld [vmem:[%s13645_s1 + $0xe0] sm:$0xff] }
 0x1e0   :  { %v7620_v44 = vadd.f32 %v7619_v37, %v7605_v16  ;;  %v1022_v28 = vld [vmem:[%s13645_s1 + $0x1ed8] sm:$0xff]  ;;  %v9596_v33 = vcombine.high %v1013_v24, %v1021_v26  ;;  %v1037_v16 = vld [vmem:[%s13645_s1 + $0x1f50] sm:$0xff]  ;;  %v56_v9 = vld [vmem:[%s13645_s1 + $0xa8] sm:$0xff] }
 0x1e1   :  { %v9598_v34 = vcombine.high %v1014_v27, %v1022_v28  ;;  %v1030_v37 = vld [vmem:[%s13645_s1 + $0x1f18] sm:$0xff]  ;;  %v1053_v48 = vld [vmem:[%s13645_s1 + $0x1fd0] sm:$0xff]  ;;  %v9611_v29 = vcombine.low %v1029_v36, %v1037_v16  ;;  %v64_v10 = vld [vmem:[%s13645_s1 + $0xe8] sm:$0xff] }
 0x1e2   :  { %v11648_v54 = vadd.f32 %v7620_v44, %v7606_v43  ;;  %6757 = vmatpush1.bf16.msra.mxu0 %v9499_v39  ;;  %6921 = vmatpush1.bf16.msra.mxu1 %v9501_v40  ;;  %v1038_v39 = vld [vmem:[%s13645_s1 + $0x1f58] sm:$0xff]  ;;  %v9595_v40 = vcombine.low %v1013_v24, %v1021_v26  ;;  %v9612_v43 = vcombine.high %v1029_v36, %v1037_v16  ;;  %v79_v15 = vld [vmem:[%s13645_s1 + $0x160] sm:$0xff]  ;;  %v72_v18 = vld [vmem:[%s13645_s1 + $0x128] sm:$0xff] }
 0x1e3   :  { %6758 = vmatprep.subr.bf16.mxu0 %v9516_v41  ;;  %6922 = vmatprep.subr.bf16.mxu1 %v9518_v45  ;;  %v9597_v41 = vcombine.low %v1014_v27, %v1022_v28  ;;  %v9614_v44 = vcombine.high %v1030_v37, %v1038_v39  ;;  %v1045_v45 = vld [vmem:[%s13645_s1 + $0x1f90] sm:$0xff]  ;;  %v1046_v51 = vld [vmem:[%s13645_s1 + $0x1f98] sm:$0xff]  ;;  %v80_v19 = vld [vmem:[%s13645_s1 + $0x168] sm:$0xff] }
 0x1e4   :  { %v1054_v52 = vld [vmem:[%s13645_s1 + $0x1fd8] sm:$0xff]  ;;  %v9627_v2 = vcombine.low %v1045_v45, %v1053_v48  ;;  %v95_v24 = vld [vmem:[%s13645_s1 + $0x1e0] sm:$0xff]  ;;  %v88_v26 = vld [vmem:[%s13645_s1 + $0x1a8] sm:$0xff] }
 0x1e5   :  { %v96_v27 = vld [vmem:[%s13645_s1 + $0x1e8] sm:$0xff]  ;;  %v111_v36 = vld [vmem:[%s13645_s1 + $0x260] sm:$0xff] }
 0x1e6   :  { %6759 = vmatpush1.bf16.msra.mxu0 %v9515_v56  ;;  %6923 = vmatpush1.bf16.msra.mxu1 %v9517_v59  ;;  %v9613_v56 = vcombine.low %v1030_v37, %v1038_v39  ;;  %v9628_v59 = vcombine.high %v1045_v45, %v1053_v48  ;;  %v104_v16 = vld [vmem:[%s13645_s1 + $0x228] sm:$0xff]  ;;  %v127_v45 = vld [vmem:[%s13645_s1 + $0x2e0] sm:$0xff] }
 0x1e7   :  { %6760 = vmatprep.subr.bf16.mxu0 %v9532_v60  ;;  %6924 = vmatprep.subr.bf16.mxu1 %v9534_v61  ;;  %v9630_v60 = vcombine.high %v1046_v51, %v1054_v52  ;;  %v39_v61 = vld [vmem:[%s13645_s1 + $0x20] sm:$0xff]  ;;  %v112_v37 = vld [vmem:[%s13645_s1 + $0x268] sm:$0xff] }
 0x1e8   :  { %v8623_v11 = vcombine.low %v39_v61, %v47_v63  ;;  %v120_v48 = vld [vmem:[%s13645_s1 + $0x2a8] sm:$0xff] }
 0x1ea   :  { %6761 = vmatpush1.bf16.msra.mxu0 %v9531_v3  ;;  %6925 = vmatpush1.bf16.msra.mxu1 %v9533_v4  ;;  %v9629_v3 = vcombine.low %v1046_v51, %v1054_v52  ;;  %v8624_v4 = vcombine.high %v39_v61, %v47_v63  ;;  %v128_v51 = vld [vmem:[%s13645_s1 + $0x2e8] sm:$0xff]  ;;  %v143_v61 = vld [vmem:[%s13645_s1 + $0x360] sm:$0xff] }
 0x1eb   :  { %6762 = vmatprep.subr.bf16.mxu0 %v9548_v6  ;;  %6926 = vmatprep.subr.bf16.mxu1 %v9550_v7  ;;  %v8626_v6 = vcombine.high %v40_v0, %v48_v1  ;;  %v55_v7 = vld [vmem:[%s13645_s1 + $0xa0] sm:$0xff]  ;;  %v136_v63 = vld [vmem:[%s13645_s1 + $0x328] sm:$0xff] }
 0x1ec   :  { %v8639_v20 = vcombine.low %v55_v7, %v63_v8 }
 0x1ee   :  { %6763 = vmatpush1.bf16.msra.mxu0 %v9547_v46  ;;  %6927 = vmatpush1.bf16.msra.mxu1 %v9549_v12  ;;  %v8625_v46 = vcombine.low %v40_v0, %v48_v1  ;;  %v8640_v12 = vcombine.high %v55_v7, %v63_v8  ;;  %v144_v0 = vld [vmem:[%s13645_s1 + $0x368] sm:$0xff]  ;;  %v159_v7 = vld [vmem:[%s13645_s1 + $0x3e0] sm:$0xff] }
 0x1ef   :  { %6764 = vmatprep.subr.bf16.mxu0 %v9564_v13  ;;  %6928 = vmatprep.subr.bf16.mxu1 %v9566_v14  ;;  %v8642_v13 = vcombine.high %v56_v9, %v64_v10  ;;  %v71_v14 = vld [vmem:[%s13645_s1 + $0x120] sm:$0xff]  ;;  %v152_v8 = vld [vmem:[%s13645_s1 + $0x3a8] sm:$0xff] }
 0x1f0   :  { %v8655_v28 = vcombine.low %v71_v14, %v79_v15 }
 0x1f2   :  { %6765 = vmatpush1.bf16.msra.mxu0 %v9563_v21  ;;  %6929 = vmatpush1.bf16.msra.mxu1 %v9565_v22  ;;  %v8641_v21 = vcombine.low %v56_v9, %v64_v10  ;;  %v8656_v22 = vcombine.high %v71_v14, %v79_v15  ;;  %v160_v9 = vld [vmem:[%s13645_s1 + $0x3e8] sm:$0xff]  ;;  %v175_v14 = vld [vmem:[%s13645_s1 + $0x460] sm:$0xff] }
 0x1f3   :  { %6766 = vmatprep.subr.bf16.mxu0 %v9580_v23  ;;  %6930 = vmatprep.subr.bf16.mxu1 %v9582_v58  ;;  %v8658_v23 = vcombine.high %v72_v18, %v80_v19  ;;  %v87_v58 = vld [vmem:[%s13645_s1 + $0x1a0] sm:$0xff]  ;;  %v168_v15 = vld [vmem:[%s13645_s1 + $0x428] sm:$0xff] }
 0x1f4   :  { %v8671_v39 = vcombine.low %v87_v58, %v95_v24 }
 0x1f6   :  { %6767 = vmatpush1.bf16.msra.mxu0 %v9579_v31  ;;  %6931 = vmatpush1.bf16.msra.mxu1 %v9581_v32  ;;  %v8657_v31 = vcombine.low %v72_v18, %v80_v19  ;;  %v8672_v32 = vcombine.high %v87_v58, %v95_v24  ;;  %v176_v18 = vld [vmem:[%s13645_s1 + $0x468] sm:$0xff]  ;;  %v191_v58 = vld [vmem:[%s13645_s1 + $0x4e0] sm:$0xff] }
 0x1f7   :  { %6768 = vmatprep.subr.bf16.mxu0 %v9596_v33  ;;  %6932 = vmatprep.subr.bf16.mxu1 %v9598_v34  ;;  %v8674_v33 = vcombine.high %v88_v26, %v96_v27  ;;  %v103_v34 = vld [vmem:[%s13645_s1 + $0x220] sm:$0xff]  ;;  %v184_v24 = vld [vmem:[%s13645_s1 + $0x4a8] sm:$0xff] }
 0x1f8   :  { %v8687_v52 = vcombine.low %v103_v34, %v111_v36 }
 0x1fa   :  { %6769 = vmatpush1.bf16.msra.mxu0 %v9595_v40  ;;  %6933 = vmatpush1.bf16.msra.mxu1 %v9597_v41  ;;  %v8673_v40 = vcombine.low %v88_v26, %v96_v27  ;;  %v8688_v41 = vcombine.high %v103_v34, %v111_v36  ;;  %v192_v26 = vld [vmem:[%s13645_s1 + $0x4e8] sm:$0xff]  ;;  %v207_v34 = vld [vmem:[%s13645_s1 + $0x560] sm:$0xff] }
 0x1fb   :  { %6770 = vmatprep.subr.bf16.mxu0 %v9612_v43  ;;  %6934 = vmatprep.subr.bf16.mxu1 %v9614_v44  ;;  %v8690_v43 = vcombine.high %v104_v16, %v112_v37  ;;  %v119_v44 = vld [vmem:[%s13645_s1 + $0x2a0] sm:$0xff]  ;;  %v200_v36 = vld [vmem:[%s13645_s1 + $0x528] sm:$0xff] }
 0x1fc   :  { %v8703_v1 = vcombine.low %v119_v44, %v127_v45 }
 0x1fe   :  { %6771 = vmatpush1.bf16.msra.mxu0 %v9611_v29  ;;  %6935 = vmatpush1.bf16.msra.mxu1 %v9613_v56  ;;  %v8689_v29 = vcombine.low %v104_v16, %v112_v37  ;;  %v8704_v56 = vcombine.high %v119_v44, %v127_v45  ;;  %v208_v16 = vld [vmem:[%s13645_s1 + $0x568] sm:$0xff]  ;;  %v223_v44 = vld [vmem:[%s13645_s1 + $0x5e0] sm:$0xff] }
 0x1ff   :  { %6772 = vmatprep.subr.bf16.mxu0 %v9628_v59  ;;  %6936 = vmatprep.subr.bf16.mxu1 %v9630_v60  ;;  %v8706_v59 = vcombine.high %v120_v48, %v128_v51  ;;  %v135_v60 = vld [vmem:[%s13645_s1 + $0x320] sm:$0xff]  ;;  %v216_v45 = vld [vmem:[%s13645_s1 + $0x5a8] sm:$0xff] }
 0x200   :  { %v8719_v10 = vcombine.low %v135_v60, %v143_v61 }
 0x202   :  { %6773 = vmatpush1.bf16.msra.mxu0 %v9627_v2  ;;  %6937 = vmatpush1.bf16.msra.mxu1 %v9629_v3  ;;  %v8705_v2 = vcombine.low %v120_v48, %v128_v51  ;;  %v8720_v3 = vcombine.high %v135_v60, %v143_v61  ;;  %v224_v48 = vld [vmem:[%s13645_s1 + $0x5e8] sm:$0xff]  ;;  %v239_v60 = vld [vmem:[%s13645_s1 + $0x660] sm:$0xff] }
 0x203   :  { %6947 = vmatprep.subr.bf16.mxu0 %v8624_v4  ;;  %7111 = vmatprep.subr.bf16.mxu1 %v8626_v6  ;;  %v8722_v4 = vcombine.high %v136_v63, %v144_v0  ;;  %v151_v6 = vld [vmem:[%s13645_s1 + $0x3a0] sm:$0xff]  ;;  %v232_v61 = vld [vmem:[%s13645_s1 + $0x628] sm:$0xff] }
 0x204   :  { %v8735_v19 = vcombine.low %v151_v6, %v159_v7 }
 0x205   :  { %6775 = vmatmul.mubr.bf16.vlgmr.msra.gmra.mrb[4].mxu0 %v10931_v5  ;;  %6939 = vmatmul.mubr.bf16.vlgmr.msra.gmra.mrb[4].mxu1 %v10931_v5 }
 0x206   :  { %6948 = vmatpush1.bf16.msra.mxu0 %v8623_v11  ;;  %7112 = vmatpush1.bf16.msra.mxu1 %v8625_v46  ;;  %v8721_v11 = vcombine.low %v136_v63, %v144_v0  ;;  %v8736_v46 = vcombine.high %v151_v6, %v159_v7  ;;  %v240_v63 = vld [vmem:[%s13645_s1 + $0x668] sm:$0xff]  ;;  %v255_v6 = vld [vmem:[%s13645_s1 + $0x6e0] sm:$0xff] }
 0x207   :  { %6949 = vmatprep.subr.bf16.mxu0 %v8640_v12  ;;  %7113 = vmatprep.subr.bf16.mxu1 %v8642_v13  ;;  %v8738_v12 = vcombine.high %v152_v8, %v160_v9  ;;  %v167_v13 = vld [vmem:[%s13645_s1 + $0x420] sm:$0xff]  ;;  %v248_v7 = vld [vmem:[%s13645_s1 + $0x6a8] sm:$0xff] }
 0x208   :  { %6979 = vmatprep.mubr.bf16.mxu0 %v10181_v62  ;;  %7143 = vmatprep.mubr.bf16.mxu1 %v10181_v62  ;;  %v8751_v27 = vcombine.low %v167_v13, %v175_v14 }
 0x20a   :  { %6950 = vmatpush1.bf16.msra.mxu0 %v8639_v20  ;;  %7114 = vmatpush1.bf16.msra.mxu1 %v8641_v21  ;;  %v8737_v20 = vcombine.low %v152_v8, %v160_v9  ;;  %v8752_v21 = vcombine.high %v167_v13, %v175_v14  ;;  %v256_v8 = vld [vmem:[%s13645_s1 + $0x6e8] sm:$0xff]  ;;  %v271_v13 = vld [vmem:[%s13645_s1 + $0x760] sm:$0xff] }
 0x20b   :  { %6951 = vmatprep.subr.bf16.mxu0 %v8656_v22  ;;  %7115 = vmatprep.subr.bf16.mxu1 %v8658_v23  ;;  %v8754_v22 = vcombine.high %v168_v15, %v176_v18  ;;  %v183_v23 = vld [vmem:[%s13645_s1 + $0x4a0] sm:$0xff]  ;;  %v264_v14 = vld [vmem:[%s13645_s1 + $0x728] sm:$0xff] }
 0x20c   :  { %v8767_v37 = vcombine.low %v183_v23, %v191_v58 }
 0x20e   :  { %6952 = vmatpush1.bf16.msra.mxu0 %v8655_v28  ;;  %7116 = vmatpush1.bf16.msra.mxu1 %v8657_v31  ;;  %v8753_v28 = vcombine.low %v168_v15, %v176_v18  ;;  %v8768_v31 = vcombine.high %v183_v23, %v191_v58  ;;  %v272_v15 = vld [vmem:[%s13645_s1 + $0x768] sm:$0xff]  ;;  %v287_v23 = vld [vmem:[%s13645_s1 + $0x7e0] sm:$0xff] }
 0x20f   :  { %6953 = vmatprep.subr.bf16.mxu0 %v8672_v32  ;;  %7117 = vmatprep.subr.bf16.mxu1 %v8674_v33  ;;  %v8770_v32 = vcombine.high %v184_v24, %v192_v26  ;;  %v199_v33 = vld [vmem:[%s13645_s1 + $0x520] sm:$0xff]  ;;  %v280_v58 = vld [vmem:[%s13645_s1 + $0x7a8] sm:$0xff] }
 0x210   :  { %v8783_v51 = vcombine.low %v199_v33, %v207_v34 }
 0x212   :  { %6954 = vmatpush1.bf16.msra.mxu0 %v8671_v39  ;;  %7118 = vmatpush1.bf16.msra.mxu1 %v8673_v40  ;;  %v8769_v39 = vcombine.low %v184_v24, %v192_v26  ;;  %v8784_v40 = vcombine.high %v199_v33, %v207_v34  ;;  %v288_v24 = vld [vmem:[%s13645_s1 + $0x7e8] sm:$0xff]  ;;  %v303_v33 = vld [vmem:[%s13645_s1 + $0x860] sm:$0xff] }
 0x213   :  { %6955 = vmatprep.subr.bf16.mxu0 %v8688_v41  ;;  %7119 = vmatprep.subr.bf16.mxu1 %v8690_v43  ;;  %v8786_v41 = vcombine.high %v200_v36, %v208_v16  ;;  %v215_v43 = vld [vmem:[%s13645_s1 + $0x5a0] sm:$0xff]  ;;  %v296_v34 = vld [vmem:[%s13645_s1 + $0x828] sm:$0xff] }
 0x214   :  { %v8799_v0 = vcombine.low %v215_v43, %v223_v44 }
 0x216   :  { %6956 = vmatpush1.bf16.msra.mxu0 %v8687_v52  ;;  %7120 = vmatpush1.bf16.msra.mxu1 %v8689_v29  ;;  %v8785_v52 = vcombine.low %v200_v36, %v208_v16  ;;  %v8800_v29 = vcombine.high %v215_v43, %v223_v44  ;;  %v304_v36 = vld [vmem:[%s13645_s1 + $0x868] sm:$0xff]  ;;  %v319_v43 = vld [vmem:[%s13645_s1 + $0x8e0] sm:$0xff] }
 0x217   :  { %6957 = vmatprep.subr.bf16.mxu0 %v8704_v56  ;;  %7121 = vmatprep.subr.bf16.mxu1 %v8706_v59  ;;  %v8802_v56 = vcombine.high %v216_v45, %v224_v48  ;;  %v231_v59 = vld [vmem:[%s13645_s1 + $0x620] sm:$0xff]  ;;  %v312_v44 = vld [vmem:[%s13645_s1 + $0x8a8] sm:$0xff] }
 0x218   :  { %v8815_v9 = vcombine.low %v231_v59, %v239_v60 }
 0x21a   :  { %6958 = vmatpush1.bf16.msra.mxu0 %v8703_v1  ;;  %7122 = vmatpush1.bf16.msra.mxu1 %v8705_v2  ;;  %v8801_v1 = vcombine.low %v216_v45, %v224_v48  ;;  %v8816_v2 = vcombine.high %v231_v59, %v239_v60  ;;  %v320_v45 = vld [vmem:[%s13645_s1 + $0x8e8] sm:$0xff]  ;;  %v335_v59 = vld [vmem:[%s13645_s1 + $0x960] sm:$0xff] }
 0x21b   :  { %6959 = vmatprep.subr.bf16.mxu0 %v8720_v3  ;;  %7123 = vmatprep.subr.bf16.mxu1 %v8722_v4  ;;  %v8818_v3 = vcombine.high %v232_v61, %v240_v63  ;;  %v247_v4 = vld [vmem:[%s13645_s1 + $0x6a0] sm:$0xff]  ;;  %v328_v60 = vld [vmem:[%s13645_s1 + $0x928] sm:$0xff] }
 0x21c   :  { %v8831_v18 = vcombine.low %v247_v4, %v255_v6 }
 0x21e   :  { %6960 = vmatpush1.bf16.msra.mxu0 %v8719_v10  ;;  %7124 = vmatpush1.bf16.msra.mxu1 %v8721_v11  ;;  %v8817_v10 = vcombine.low %v232_v61, %v240_v63  ;;  %v8832_v11 = vcombine.high %v247_v4, %v255_v6  ;;  %v336_v61 = vld [vmem:[%s13645_s1 + $0x968] sm:$0xff]  ;;  %v351_v4 = vld [vmem:[%s13645_s1 + $0x9e0] sm:$0xff] }
 0x21f   :  { %6961 = vmatprep.subr.bf16.mxu0 %v8736_v46  ;;  %7125 = vmatprep.subr.bf16.mxu1 %v8738_v12  ;;  %v8834_v46 = vcombine.high %v248_v7, %v256_v8  ;;  %v263_v12 = vld [vmem:[%s13645_s1 + $0x720] sm:$0xff]  ;;  %v344_v6 = vld [vmem:[%s13645_s1 + $0x9a8] sm:$0xff] }
 0x220   :  { %v8847_v26 = vcombine.low %v263_v12, %v271_v13 }
 0x222   :  { %6962 = vmatpush1.bf16.msra.mxu0 %v8735_v19  ;;  %7126 = vmatpush1.bf16.msra.mxu1 %v8737_v20  ;;  %v8833_v19 = vcombine.low %v248_v7, %v256_v8  ;;  %v8848_v20 = vcombine.high %v263_v12, %v271_v13  ;;  %v352_v7 = vld [vmem:[%s13645_s1 + $0x9e8] sm:$0xff]  ;;  %v367_v12 = vld [vmem:[%s13645_s1 + $0xa60] sm:$0xff] }
 0x223   :  { %6963 = vmatprep.subr.bf16.mxu0 %v8752_v21  ;;  %7127 = vmatprep.subr.bf16.mxu1 %v8754_v22  ;;  %v8850_v21 = vcombine.high %v264_v14, %v272_v15  ;;  %v279_v22 = vld [vmem:[%s13645_s1 + $0x7a0] sm:$0xff]  ;;  %v360_v13 = vld [vmem:[%s13645_s1 + $0xa28] sm:$0xff] }
 0x224   :  { %v8863_v16 = vcombine.low %v279_v22, %v287_v23 }
 0x226   :  { %6964 = vmatpush1.bf16.msra.mxu0 %v8751_v27  ;;  %7128 = vmatpush1.bf16.msra.mxu1 %v8753_v28  ;;  %v8849_v27 = vcombine.low %v264_v14, %v272_v15  ;;  %v8864_v28 = vcombine.high %v279_v22, %v287_v23  ;;  %v368_v14 = vld [vmem:[%s13645_s1 + $0xa68] sm:$0xff]  ;;  %v383_v22 = vld [vmem:[%s13645_s1 + $0xae0] sm:$0xff] }
 0x227   :  { %6965 = vmatprep.subr.bf16.mxu0 %v8768_v31  ;;  %7129 = vmatprep.subr.bf16.mxu1 %v8770_v32  ;;  %v8866_v31 = vcombine.high %v280_v58, %v288_v24  ;;  %v295_v32 = vld [vmem:[%s13645_s1 + $0x820] sm:$0xff]  ;;  %v376_v23 = vld [vmem:[%s13645_s1 + $0xaa8] sm:$0xff] }
 0x228   :  { %v8879_v48 = vcombine.low %v295_v32, %v303_v33 }
 0x22a   :  { %6966 = vmatpush1.bf16.msra.mxu0 %v8767_v37  ;;  %7130 = vmatpush1.bf16.msra.mxu1 %v8769_v39  ;;  %v8865_v37 = vcombine.low %v280_v58, %v288_v24  ;;  %v8880_v39 = vcombine.high %v295_v32, %v303_v33  ;;  %v384_v58 = vld [vmem:[%s13645_s1 + $0xae8] sm:$0xff]  ;;  %v399_v32 = vld [vmem:[%s13645_s1 + $0xb60] sm:$0xff] }
 0x22b   :  { %6967 = vmatprep.subr.bf16.mxu0 %v8784_v40  ;;  %7131 = vmatprep.subr.bf16.mxu1 %v8786_v41  ;;  %v8882_v40 = vcombine.high %v296_v34, %v304_v36  ;;  %v311_v41 = vld [vmem:[%s13645_s1 + $0x8a0] sm:$0xff]  ;;  %v392_v33 = vld [vmem:[%s13645_s1 + $0xb28] sm:$0xff] }
 0x22c   :  { %v8895_v63 = vcombine.low %v311_v41, %v319_v43 }
 0x22e   :  { %6968 = vmatpush1.bf16.msra.mxu0 %v8783_v51  ;;  %7132 = vmatpush1.bf16.msra.mxu1 %v8785_v52  ;;  %v8881_v51 = vcombine.low %v296_v34, %v304_v36  ;;  %v8896_v52 = vcombine.high %v311_v41, %v319_v43  ;;  %v400_v34 = vld [vmem:[%s13645_s1 + $0xb68] sm:$0xff]  ;;  %v415_v41 = vld [vmem:[%s13645_s1 + $0xbe0] sm:$0xff] }
 0x22f   :  { %6969 = vmatprep.subr.bf16.mxu0 %v8800_v29  ;;  %7133 = vmatprep.subr.bf16.mxu1 %v8802_v56  ;;  %v8898_v29 = vcombine.high %v312_v44, %v320_v45  ;;  %v327_v56 = vld [vmem:[%s13645_s1 + $0x920] sm:$0xff]  ;;  %v408_v43 = vld [vmem:[%s13645_s1 + $0xba8] sm:$0xff] }
 0x230   :  { %v8911_v8 = vcombine.low %v327_v56, %v335_v59 }
 0x232   :  { %6970 = vmatpush1.bf16.msra.mxu0 %v8799_v0  ;;  %7134 = vmatpush1.bf16.msra.mxu1 %v8801_v1  ;;  %v8897_v0 = vcombine.low %v312_v44, %v320_v45  ;;  %v8912_v1 = vcombine.high %v327_v56, %v335_v59  ;;  %v416_v44 = vld [vmem:[%s13645_s1 + $0xbe8] sm:$0xff]  ;;  %v431_v56 = vld [vmem:[%s13645_s1 + $0xc60] sm:$0xff] }
 0x233   :  { %6971 = vmatprep.subr.bf16.mxu0 %v8816_v2  ;;  %7135 = vmatprep.subr.bf16.mxu1 %v8818_v3  ;;  %v8914_v2 = vcombine.high %v328_v60, %v336_v61  ;;  %v343_v3 = vld [vmem:[%s13645_s1 + $0x9a0] sm:$0xff]  ;;  %v424_v59 = vld [vmem:[%s13645_s1 + $0xc28] sm:$0xff] }
 0x234   :  { %v8927_v15 = vcombine.low %v343_v3, %v351_v4 }
 0x236   :  { %6972 = vmatpush1.bf16.msra.mxu0 %v8815_v9  ;;  %7136 = vmatpush1.bf16.msra.mxu1 %v8817_v10  ;;  %v8913_v9 = vcombine.low %v328_v60, %v336_v61  ;;  %v8928_v10 = vcombine.high %v343_v3, %v351_v4  ;;  %v432_v60 = vld [vmem:[%s13645_s1 + $0xc68] sm:$0xff]  ;;  %v447_v3 = vld [vmem:[%s13645_s1 + $0xce0] sm:$0xff] }
 0x237   :  { %6973 = vmatprep.subr.bf16.mxu0 %v8832_v11  ;;  %7137 = vmatprep.subr.bf16.mxu1 %v8834_v46  ;;  %v8930_v11 = vcombine.high %v344_v6, %v352_v7  ;;  %v359_v46 = vld [vmem:[%s13645_s1 + $0xa20] sm:$0xff]  ;;  %v440_v4 = vld [vmem:[%s13645_s1 + $0xca8] sm:$0xff] }
 0x238   :  { %v8943_v24 = vcombine.low %v359_v46, %v367_v12 }
 0x23a   :  { %6974 = vmatpush1.bf16.msra.mxu0 %v8831_v18  ;;  %7138 = vmatpush1.bf16.msra.mxu1 %v8833_v19  ;;  %v8929_v18 = vcombine.low %v344_v6, %v352_v7  ;;  %v8944_v19 = vcombine.high %v359_v46, %v367_v12  ;;  %v448_v6 = vld [vmem:[%s13645_s1 + $0xce8] sm:$0xff]  ;;  %v463_v46 = vld [vmem:[%s13645_s1 + $0xd60] sm:$0xff] }
 0x23b   :  { %6975 = vmatprep.subr.bf16.mxu0 %v8848_v20  ;;  %7139 = vmatprep.subr.bf16.mxu1 %v8850_v21  ;;  %v8946_v20 = vcombine.high %v360_v13, %v368_v14  ;;  %v375_v21 = vld [vmem:[%s13645_s1 + $0xaa0] sm:$0xff]  ;;  %v456_v12 = vld [vmem:[%s13645_s1 + $0xd28] sm:$0xff] }
 0x23c   :  { %v8959_v36 = vcombine.low %v375_v21, %v383_v22 }
 0x23e   :  { %6976 = vmatpush1.bf16.msra.mxu0 %v8847_v26  ;;  %7140 = vmatpush1.bf16.msra.mxu1 %v8849_v27  ;;  %v8945_v26 = vcombine.low %v360_v13, %v368_v14  ;;  %v8960_v27 = vcombine.high %v375_v21, %v383_v22  ;;  %v464_v13 = vld [vmem:[%s13645_s1 + $0xd68] sm:$0xff]  ;;  %v479_v21 = vld [vmem:[%s13645_s1 + $0xde0] sm:$0xff] }
 0x23f   :  { %6977 = vmatprep.subr.bf16.mxu0 %v8864_v28  ;;  %7141 = vmatprep.subr.bf16.mxu1 %v8866_v31  ;;  %v8962_v28 = vcombine.high %v376_v23, %v384_v58  ;;  %v391_v31 = vld [vmem:[%s13645_s1 + $0xb20] sm:$0xff]  ;;  %v472_v22 = vld [vmem:[%s13645_s1 + $0xda8] sm:$0xff] }
 0x240   :  { %v8975_v45 = vcombine.low %v391_v31, %v399_v32 }
 0x242   :  { %6978 = vmatpush1.bf16.msra.mxu0 %v8863_v16  ;;  %7142 = vmatpush1.bf16.msra.mxu1 %v8865_v37  ;;  %v8961_v16 = vcombine.low %v376_v23, %v384_v58  ;;  %v8976_v37 = vcombine.high %v391_v31, %v399_v32  ;;  %v480_v23 = vld [vmem:[%s13645_s1 + $0xde8] sm:$0xff]  ;;  %v495_v31 = vld [vmem:[%s13645_s1 + $0xe60] sm:$0xff] }
 0x243   :  { %6988 = vmatprep.subr.bf16.mxu0 %v8880_v39  ;;  %7152 = vmatprep.subr.bf16.mxu1 %v8882_v40  ;;  %v8978_v39 = vcombine.high %v392_v33, %v400_v34  ;;  %v407_v40 = vld [vmem:[%s13645_s1 + $0xba0] sm:$0xff]  ;;  %v488_v32 = vld [vmem:[%s13645_s1 + $0xe28] sm:$0xff] }
 0x244   :  { %v8991_v61 = vcombine.low %v407_v40, %v415_v41 }
 0x245   :  { %6980 = vmatmul.mubr.bf16.vlgmr.msra.gmra.mrb[8].mxu0 %v10307_v17  ;;  %7144 = vmatmul.mubr.bf16.vlgmr.msra.gmra.mrb[8].mxu1 %v10307_v17 }
 0x246   :  { %6989 = vmatpush1.bf16.msra.mxu0 %v8879_v48  ;;  %7153 = vmatpush1.bf16.msra.mxu1 %v8881_v51  ;;  %v8977_v48 = vcombine.low %v392_v33, %v400_v34  ;;  %v8992_v51 = vcombine.high %v407_v40, %v415_v41  ;;  %v496_v33 = vld [vmem:[%s13645_s1 + $0xe68] sm:$0xff]  ;;  %v511_v40 = vld [vmem:[%s13645_s1 + $0xee0] sm:$0xff] }
 0x247   :  { %6990 = vmatprep.subr.bf16.mxu0 %v8896_v52  ;;  %7154 = vmatprep.subr.bf16.mxu1 %v8898_v29  ;;  %v8994_v52 = vcombine.high %v408_v43, %v416_v44  ;;  %v423_v29 = vld [vmem:[%s13645_s1 + $0xc20] sm:$0xff]  ;;  %v504_v41 = vld [vmem:[%s13645_s1 + $0xea8] sm:$0xff] }
 0x248   :  { %7020 = vmatprep.mubr.bf16.mxu0 %v10323_v25  ;;  %7184 = vmatprep.mubr.bf16.mxu1 %v10323_v25  ;;  %v9007_v7 = vcombine.low %v423_v29, %v431_v56 }
 0x24a   :  { %6991 = vmatpush1.bf16.msra.mxu0 %v8895_v63  ;;  %7155 = vmatpush1.bf16.msra.mxu1 %v8897_v0  ;;  %v8993_v63 = vcombine.low %v408_v43, %v416_v44  ;;  %v9008_v0 = vcombine.high %v423_v29, %v431_v56  ;;  %v512_v43 = vld [vmem:[%s13645_s1 + $0xee8] sm:$0xff]  ;;  %v527_v29 = vld [vmem:[%s13645_s1 + $0xf60] sm:$0xff] }
 0x24b   :  { %6992 = vmatprep.subr.bf16.mxu0 %v8912_v1  ;;  %7156 = vmatprep.subr.bf16.mxu1 %v8914_v2  ;;  %v9010_v1 = vcombine.high %v424_v59, %v432_v60  ;;  %v439_v2 = vld [vmem:[%s13645_s1 + $0xca0] sm:$0xff]  ;;  %v520_v56 = vld [vmem:[%s13645_s1 + $0xf28] sm:$0xff] }
 0x24c   :  { %v9023_v14 = vcombine.low %v439_v2, %v447_v3 }
 0x24e   :  { %6993 = vmatpush1.bf16.msra.mxu0 %v8911_v8  ;;  %7157 = vmatpush1.bf16.msra.mxu1 %v8913_v9  ;;  %v9009_v8 = vcombine.low %v424_v59, %v432_v60  ;;  %v9024_v9 = vcombine.high %v439_v2, %v447_v3  ;;  %v528_v59 = vld [vmem:[%s13645_s1 + $0xf68] sm:$0xff]  ;;  %v543_v2 = vld [vmem:[%s13645_s1 + $0xfe0] sm:$0xff] }
 0x24f   :  { %6994 = vmatprep.subr.bf16.mxu0 %v8928_v10  ;;  %7158 = vmatprep.subr.bf16.mxu1 %v8930_v11  ;;  %v9026_v10 = vcombine.high %v440_v4, %v448_v6  ;;  %v455_v11 = vld [vmem:[%s13645_s1 + $0xd20] sm:$0xff]  ;;  %v536_v3 = vld [vmem:[%s13645_s1 + $0xfa8] sm:$0xff] }
 0x250   :  { %v9039_v58 = vcombine.low %v455_v11, %v463_v46 }
 0x252   :  { %6995 = vmatpush1.bf16.msra.mxu0 %v8927_v15  ;;  %7159 = vmatpush1.bf16.msra.mxu1 %v8929_v18  ;;  %v9025_v15 = vcombine.low %v440_v4, %v448_v6  ;;  %v9040_v18 = vcombine.high %v455_v11, %v463_v46  ;;  %v544_v4 = vld [vmem:[%s13645_s1 + $0xfe8] sm:$0xff]  ;;  %v559_v11 = vld [vmem:[%s13645_s1 + $0x1060] sm:$0xff] }
 0x253   :  { %6996 = vmatprep.subr.bf16.mxu0 %v8944_v19  ;;  %7160 = vmatprep.subr.bf16.mxu1 %v8946_v20  ;;  %v9042_v19 = vcombine.high %v456_v12, %v464_v13  ;;  %v471_v20 = vld [vmem:[%s13645_s1 + $0xda0] sm:$0xff]  ;;  %v552_v46 = vld [vmem:[%s13645_s1 + $0x1028] sm:$0xff] }
 0x254   :  { %v9055_v34 = vcombine.low %v471_v20, %v479_v21 }
 0x256   :  { %6997 = vmatpush1.bf16.msra.mxu0 %v8943_v24  ;;  %7161 = vmatpush1.bf16.msra.mxu1 %v8945_v26  ;;  %v9041_v24 = vcombine.low %v456_v12, %v464_v13  ;;  %v9056_v26 = vcombine.high %v471_v20, %v479_v21  ;;  %v560_v12 = vld [vmem:[%s13645_s1 + $0x1068] sm:$0xff]  ;;  %v575_v20 = vld [vmem:[%s13645_s1 + $0x10e0] sm:$0xff] }
 0x257   :  { %6998 = vmatprep.subr.bf16.mxu0 %v8960_v27  ;;  %7162 = vmatprep.subr.bf16.mxu1 %v8962_v28  ;;  %v9058_v27 = vcombine.high %v472_v22, %v480_v23  ;;  %v487_v28 = vld [vmem:[%s13645_s1 + $0xe20] sm:$0xff]  ;;  %v568_v21 = vld [vmem:[%s13645_s1 + $0x10a8] sm:$0xff] }
 0x258   :  { %v9071_v44 = vcombine.low %v487_v28, %v495_v31 }
 0x25a   :  { %6999 = vmatpush1.bf16.msra.mxu0 %v8959_v36  ;;  %7163 = vmatpush1.bf16.msra.mxu1 %v8961_v16  ;;  %v9057_v36 = vcombine.low %v472_v22, %v480_v23  ;;  %v9072_v16 = vcombine.high %v487_v28, %v495_v31  ;;  %v576_v22 = vld [vmem:[%s13645_s1 + $0x10e8] sm:$0xff]  ;;  %v591_v28 = vld [vmem:[%s13645_s1 + $0x1160] sm:$0xff] }
 0x25b   :  { %7000 = vmatprep.subr.bf16.mxu0 %v8976_v37  ;;  %7164 = vmatprep.subr.bf16.mxu1 %v8978_v39  ;;  %v9074_v37 = vcombine.high %v488_v32, %v496_v33  ;;  %v503_v39 = vld [vmem:[%s13645_s1 + $0xea0] sm:$0xff]  ;;  %v584_v31 = vld [vmem:[%s13645_s1 + $0x1128] sm:$0xff] }
 0x25c   :  { %v9087_v60 = vcombine.low %v503_v39, %v511_v40 }
 0x25e   :  { %7001 = vmatpush1.bf16.msra.mxu0 %v8975_v45  ;;  %7165 = vmatpush1.bf16.msra.mxu1 %v8977_v48  ;;  %v9073_v45 = vcombine.low %v488_v32, %v496_v33  ;;  %v9088_v48 = vcombine.high %v503_v39, %v511_v40  ;;  %v592_v32 = vld [vmem:[%s13645_s1 + $0x1168] sm:$0xff]  ;;  %v607_v39 = vld [vmem:[%s13645_s1 + $0x11e0] sm:$0xff] }
 0x25f   :  { %7002 = vmatprep.subr.bf16.mxu0 %v8992_v51  ;;  %7166 = vmatprep.subr.bf16.mxu1 %v8994_v52  ;;  %v9090_v51 = vcombine.high %v504_v41, %v512_v43  ;;  %v519_v52 = vld [vmem:[%s13645_s1 + $0xf20] sm:$0xff]  ;;  %v600_v40 = vld [vmem:[%s13645_s1 + $0x11a8] sm:$0xff] }
 0x260   :  { %v9103_v6 = vcombine.low %v519_v52, %v527_v29 }
 0x262   :  { %7003 = vmatpush1.bf16.msra.mxu0 %v8991_v61  ;;  %7167 = vmatpush1.bf16.msra.mxu1 %v8993_v63  ;;  %v9089_v61 = vcombine.low %v504_v41, %v512_v43  ;;  %v9104_v63 = vcombine.high %v519_v52, %v527_v29  ;;  %v608_v41 = vld [vmem:[%s13645_s1 + $0x11e8] sm:$0xff]  ;;  %v623_v52 = vld [vmem:[%s13645_s1 + $0x1260] sm:$0xff] }
 0x263   :  { %7004 = vmatprep.subr.bf16.mxu0 %v9008_v0  ;;  %7168 = vmatprep.subr.bf16.mxu1 %v9010_v1  ;;  %v9106_v0 = vcombine.high %v520_v56, %v528_v59  ;;  %v535_v1 = vld [vmem:[%s13645_s1 + $0xfa0] sm:$0xff]  ;;  %v616_v29 = vld [vmem:[%s13645_s1 + $0x1228] sm:$0xff] }
 0x264   :  { %v9119_v13 = vcombine.low %v535_v1, %v543_v2 }
 0x266   :  { %7005 = vmatpush1.bf16.msra.mxu0 %v9007_v7  ;;  %7169 = vmatpush1.bf16.msra.mxu1 %v9009_v8  ;;  %v9105_v7 = vcombine.low %v520_v56, %v528_v59  ;;  %v9120_v8 = vcombine.high %v535_v1, %v543_v2  ;;  %v624_v56 = vld [vmem:[%s13645_s1 + $0x1268] sm:$0xff]  ;;  %v639_v1 = vld [vmem:[%s13645_s1 + $0x12e0] sm:$0xff] }
 0x267   :  { %7006 = vmatprep.subr.bf16.mxu0 %v9024_v9  ;;  %7170 = vmatprep.subr.bf16.mxu1 %v9026_v10  ;;  %v9122_v9 = vcombine.high %v536_v3, %v544_v4  ;;  %v551_v10 = vld [vmem:[%s13645_s1 + $0x1020] sm:$0xff]  ;;  %v632_v2 = vld [vmem:[%s13645_s1 + $0x12a8] sm:$0xff] }
 0x268   :  { %v9135_v23 = vcombine.low %v551_v10, %v559_v11 }
 0x26a   :  { %7007 = vmatpush1.bf16.msra.mxu0 %v9023_v14  ;;  %7171 = vmatpush1.bf16.msra.mxu1 %v9025_v15  ;;  %v9121_v14 = vcombine.low %v536_v3, %v544_v4  ;;  %v9136_v15 = vcombine.high %v551_v10, %v559_v11  ;;  %v640_v3 = vld [vmem:[%s13645_s1 + $0x12e8] sm:$0xff]  ;;  %v655_v10 = vld [vmem:[%s13645_s1 + $0x1360] sm:$0xff] }
 0x26b   :  { %7008 = vmatprep.subr.bf16.mxu0 %v9040_v18  ;;  %7172 = vmatprep.subr.bf16.mxu1 %v9042_v19  ;;  %v9138_v18 = vcombine.high %v552_v46, %v560_v12  ;;  %v567_v19 = vld [vmem:[%s13645_s1 + $0x10a0] sm:$0xff]  ;;  %v648_v11 = vld [vmem:[%s13645_s1 + $0x1328] sm:$0xff] }
 0x26c   :  { %v9151_v33 = vcombine.low %v567_v19, %v575_v20 }
 0x26e   :  { %7009 = vmatpush1.bf16.msra.mxu0 %v9039_v58  ;;  %7173 = vmatpush1.bf16.msra.mxu1 %v9041_v24  ;;  %v9137_v58 = vcombine.low %v552_v46, %v560_v12  ;;  %v9152_v24 = vcombine.high %v567_v19, %v575_v20  ;;  %v656_v46 = vld [vmem:[%s13645_s1 + $0x1368] sm:$0xff]  ;;  %v671_v19 = vld [vmem:[%s13645_s1 + $0x13e0] sm:$0xff] }
 0x26f   :  { %7010 = vmatprep.subr.bf16.mxu0 %v9056_v26  ;;  %7174 = vmatprep.subr.bf16.mxu1 %v9058_v27  ;;  %v9154_v26 = vcombine.high %v568_v21, %v576_v22  ;;  %v583_v27 = vld [vmem:[%s13645_s1 + $0x1120] sm:$0xff]  ;;  %v664_v20 = vld [vmem:[%s13645_s1 + $0x13a8] sm:$0xff] }
 0x270   :  { %v9167_v43 = vcombine.low %v583_v27, %v591_v28 }
 0x272   :  { %7011 = vmatpush1.bf16.msra.mxu0 %v9055_v34  ;;  %7175 = vmatpush1.bf16.msra.mxu1 %v9057_v36  ;;  %v9153_v34 = vcombine.low %v568_v21, %v576_v22  ;;  %v9168_v36 = vcombine.high %v583_v27, %v591_v28  ;;  %v672_v21 = vld [vmem:[%s13645_s1 + $0x13e8] sm:$0xff]  ;;  %v687_v27 = vld [vmem:[%s13645_s1 + $0x1460] sm:$0xff] }
 0x273   :  { %7012 = vmatprep.subr.bf16.mxu0 %v9072_v16  ;;  %7176 = vmatprep.subr.bf16.mxu1 %v9074_v37  ;;  %v9170_v16 = vcombine.high %v584_v31, %v592_v32  ;;  %v599_v37 = vld [vmem:[%s13645_s1 + $0x11a0] sm:$0xff]  ;;  %v680_v28 = vld [vmem:[%s13645_s1 + $0x1428] sm:$0xff] }
 0x274   :  { %v9183_v59 = vcombine.low %v599_v37, %v607_v39 }
 0x276   :  { %7013 = vmatpush1.bf16.msra.mxu0 %v9071_v44  ;;  %7177 = vmatpush1.bf16.msra.mxu1 %v9073_v45  ;;  %v9169_v44 = vcombine.low %v584_v31, %v592_v32  ;;  %v9184_v45 = vcombine.high %v599_v37, %v607_v39  ;;  %v688_v31 = vld [vmem:[%s13645_s1 + $0x1468] sm:$0xff]  ;;  %v703_v37 = vld [vmem:[%s13645_s1 + $0x14e0] sm:$0xff] }
 0x277   :  { %7014 = vmatprep.subr.bf16.mxu0 %v9088_v48  ;;  %7178 = vmatprep.subr.bf16.mxu1 %v9090_v51  ;;  %v9186_v48 = vcombine.high %v600_v40, %v608_v41  ;;  %v615_v51 = vld [vmem:[%s13645_s1 + $0x1220] sm:$0xff]  ;;  %v696_v39 = vld [vmem:[%s13645_s1 + $0x14a8] sm:$0xff] }
 0x278   :  { %v9199_v4 = vcombine.low %v615_v51, %v623_v52 }
 0x27a   :  { %7015 = vmatpush1.bf16.msra.mxu0 %v9087_v60  ;;  %7179 = vmatpush1.bf16.msra.mxu1 %v9089_v61  ;;  %v9185_v60 = vcombine.low %v600_v40, %v608_v41  ;;  %v9200_v61 = vcombine.high %v615_v51, %v623_v52  ;;  %v704_v40 = vld [vmem:[%s13645_s1 + $0x14e8] sm:$0xff]  ;;  %v719_v51 = vld [vmem:[%s13645_s1 + $0x1560] sm:$0xff] }
 0x27b   :  { %7016 = vmatprep.subr.bf16.mxu0 %v9104_v63  ;;  %7180 = vmatprep.subr.bf16.mxu1 %v9106_v0  ;;  %v9202_v63 = vcombine.high %v616_v29, %v624_v56  ;;  %v631_v0 = vld [vmem:[%s13645_s1 + $0x12a0] sm:$0xff]  ;;  %v712_v52 = vld [vmem:[%s13645_s1 + $0x1528] sm:$0xff] }
 0x27c   :  { %v9215_v12 = vcombine.low %v631_v0, %v639_v1 }
 0x27e   :  { %7017 = vmatpush1.bf16.msra.mxu0 %v9103_v6  ;;  %7181 = vmatpush1.bf16.msra.mxu1 %v9105_v7  ;;  %v9201_v6 = vcombine.low %v616_v29, %v624_v56  ;;  %v9216_v7 = vcombine.high %v631_v0, %v639_v1  ;;  %v720_v29 = vld [vmem:[%s13645_s1 + $0x1568] sm:$0xff]  ;;  %v735_v0 = vld [vmem:[%s13645_s1 + $0x15e0] sm:$0xff] }
 0x27f   :  { %7018 = vmatprep.subr.bf16.mxu0 %v9120_v8  ;;  %7182 = vmatprep.subr.bf16.mxu1 %v9122_v9  ;;  %v9218_v8 = vcombine.high %v632_v2, %v640_v3  ;;  %v647_v9 = vld [vmem:[%s13645_s1 + $0x1320] sm:$0xff]  ;;  %v728_v1 = vld [vmem:[%s13645_s1 + $0x15a8] sm:$0xff] }
 0x280   :  { %v9231_v22 = vcombine.low %v647_v9, %v655_v10 }
 0x282   :  { %7019 = vmatpush1.bf16.msra.mxu0 %v9119_v13  ;;  %7183 = vmatpush1.bf16.msra.mxu1 %v9121_v14  ;;  %v9217_v13 = vcombine.low %v632_v2, %v640_v3  ;;  %v9232_v14 = vcombine.high %v647_v9, %v655_v10  ;;  %v736_v2 = vld [vmem:[%s13645_s1 + $0x15e8] sm:$0xff]  ;;  %v751_v9 = vld [vmem:[%s13645_s1 + $0x1660] sm:$0xff] }
 0x283   :  { %7029 = vmatprep.subr.bf16.mxu0 %v9136_v15  ;;  %7193 = vmatprep.subr.bf16.mxu1 %v9138_v18  ;;  %v9234_v15 = vcombine.high %v648_v11, %v656_v46  ;;  %v663_v18 = vld [vmem:[%s13645_s1 + $0x13a0] sm:$0xff]  ;;  %v744_v10 = vld [vmem:[%s13645_s1 + $0x1628] sm:$0xff] }
 0x284   :  { %v9247_v32 = vcombine.low %v663_v18, %v671_v19 }
 0x285   :  { %7021 = vmatmul.mubr.bf16.vlgmr.msra.gmra.mrb[8].mxu0 %v10517_v30  ;;  %7185 = vmatmul.mubr.bf16.vlgmr.msra.gmra.mrb[8].mxu1 %v10517_v30 }
 0x286   :  { %7030 = vmatpush1.bf16.msra.mxu0 %v9135_v23  ;;  %7194 = vmatpush1.bf16.msra.mxu1 %v9137_v58  ;;  %v9233_v23 = vcombine.low %v648_v11, %v656_v46  ;;  %v9248_v58 = vcombine.high %v663_v18, %v671_v19  ;;  %v752_v11 = vld [vmem:[%s13645_s1 + $0x1668] sm:$0xff]  ;;  %v767_v18 = vld [vmem:[%s13645_s1 + $0x16e0] sm:$0xff] }
 0x287   :  { %7031 = vmatprep.subr.bf16.mxu0 %v9152_v24  ;;  %7195 = vmatprep.subr.bf16.mxu1 %v9154_v26  ;;  %v9250_v24 = vcombine.high %v664_v20, %v672_v21  ;;  %v679_v26 = vld [vmem:[%s13645_s1 + $0x1420] sm:$0xff]  ;;  %v760_v19 = vld [vmem:[%s13645_s1 + $0x16a8] sm:$0xff] }
 0x288   :  { %7061 = vmatprep.mubr.bf16.mxu0 %v10533_v38  ;;  %7225 = vmatprep.mubr.bf16.mxu1 %v10533_v38  ;;  %v9263_v41 = vcombine.low %v679_v26, %v687_v27 }
 0x28a   :  { %7032 = vmatpush1.bf16.msra.mxu0 %v9151_v33  ;;  %7196 = vmatpush1.bf16.msra.mxu1 %v9153_v34  ;;  %v9249_v33 = vcombine.low %v664_v20, %v672_v21  ;;  %v9264_v34 = vcombine.high %v679_v26, %v687_v27  ;;  %v768_v20 = vld [vmem:[%s13645_s1 + $0x16e8] sm:$0xff]  ;;  %v783_v26 = vld [vmem:[%s13645_s1 + $0x1760] sm:$0xff] }
 0x28b   :  { %7033 = vmatprep.subr.bf16.mxu0 %v9168_v36  ;;  %7197 = vmatprep.subr.bf16.mxu1 %v9170_v16  ;;  %v9266_v36 = vcombine.high %v680_v28, %v688_v31  ;;  %v695_v16 = vld [vmem:[%s13645_s1 + $0x14a0] sm:$0xff]  ;;  %v776_v27 = vld [vmem:[%s13645_s1 + $0x1728] sm:$0xff] }
 0x28c   :  { %v9279_v56 = vcombine.low %v695_v16, %v703_v37 }
 0x28e   :  { %7034 = vmatpush1.bf16.msra.mxu0 %v9167_v43  ;;  %7198 = vmatpush1.bf16.msra.mxu1 %v9169_v44  ;;  %v9265_v43 = vcombine.low %v680_v28, %v688_v31  ;;  %v9280_v44 = vcombine.high %v695_v16, %v703_v37  ;;  %v784_v28 = vld [vmem:[%s13645_s1 + $0x1768] sm:$0xff]  ;;  %v799_v16 = vld [vmem:[%s13645_s1 + $0x17e0] sm:$0xff] }
 0x28f   :  { %7035 = vmatprep.subr.bf16.mxu0 %v9184_v45  ;;  %7199 = vmatprep.subr.bf16.mxu1 %v9186_v48  ;;  %v9282_v45 = vcombine.high %v696_v39, %v704_v40  ;;  %v711_v48 = vld [vmem:[%s13645_s1 + $0x1520] sm:$0xff]  ;;  %v792_v37 = vld [vmem:[%s13645_s1 + $0x17a8] sm:$0xff] }
 0x290   :  { %v9295_v3 = vcombine.low %v711_v48, %v719_v51 }
 0x292   :  { %7036 = vmatpush1.bf16.msra.mxu0 %v9183_v59  ;;  %7200 = vmatpush1.bf16.msra.mxu1 %v9185_v60  ;;  %v9281_v59 = vcombine.low %v696_v39, %v704_v40  ;;  %v9296_v60 = vcombine.high %v711_v48, %v719_v51  ;;  %v800_v39 = vld [vmem:[%s13645_s1 + $0x17e8] sm:$0xff]  ;;  %v815_v48 = vld [vmem:[%s13645_s1 + $0x1860] sm:$0xff] }
 0x293   :  { %7037 = vmatprep.subr.bf16.mxu0 %v9200_v61  ;;  %7201 = vmatprep.subr.bf16.mxu1 %v9202_v63  ;;  %v9298_v61 = vcombine.high %v712_v52, %v720_v29  ;;  %v727_v63 = vld [vmem:[%s13645_s1 + $0x15a0] sm:$0xff]  ;;  %v808_v51 = vld [vmem:[%s13645_s1 + $0x1828] sm:$0xff] }
 0x294   :  { %v9311_v46 = vcombine.low %v727_v63, %v735_v0 }
 0x296   :  { %7038 = vmatpush1.bf16.msra.mxu0 %v9199_v4  ;;  %7202 = vmatpush1.bf16.msra.mxu1 %v9201_v6  ;;  %v9297_v4 = vcombine.low %v712_v52, %v720_v29  ;;  %v9312_v6 = vcombine.high %v727_v63, %v735_v0  ;;  %v816_v52 = vld [vmem:[%s13645_s1 + $0x1868] sm:$0xff]  ;;  %v831_v63 = vld [vmem:[%s13645_s1 + $0x18e0] sm:$0xff] }
 0x297   :  { %7039 = vmatprep.subr.bf16.mxu0 %v9216_v7  ;;  %7203 = vmatprep.subr.bf16.mxu1 %v9218_v8  ;;  %v9314_v7 = vcombine.high %v728_v1, %v736_v2  ;;  %v743_v8 = vld [vmem:[%s13645_s1 + $0x1620] sm:$0xff]  ;;  %v824_v0 = vld [vmem:[%s13645_s1 + $0x18a8] sm:$0xff] }
 0x298   :  { %v9327_v21 = vcombine.low %v743_v8, %v751_v9 }
 0x29a   :  { %7040 = vmatpush1.bf16.msra.mxu0 %v9215_v12  ;;  %7204 = vmatpush1.bf16.msra.mxu1 %v9217_v13  ;;  %v9313_v12 = vcombine.low %v728_v1, %v736_v2  ;;  %v9328_v13 = vcombine.high %v743_v8, %v751_v9  ;;  %v832_v1 = vld [vmem:[%s13645_s1 + $0x18e8] sm:$0xff]  ;;  %v847_v8 = vld [vmem:[%s13645_s1 + $0x1960] sm:$0xff] }
 0x29b   :  { %7041 = vmatprep.subr.bf16.mxu0 %v9232_v14  ;;  %7205 = vmatprep.subr.bf16.mxu1 %v9234_v15  ;;  %v9330_v14 = vcombine.high %v744_v10, %v752_v11  ;;  %v759_v15 = vld [vmem:[%s13645_s1 + $0x16a0] sm:$0xff]  ;;  %v840_v9 = vld [vmem:[%s13645_s1 + $0x1928] sm:$0xff] }
 0x29c   :  { %v9343_v31 = vcombine.low %v759_v15, %v767_v18 }
 0x29e   :  { %7042 = vmatpush1.bf16.msra.mxu0 %v9231_v22  ;;  %7206 = vmatpush1.bf16.msra.mxu1 %v9233_v23  ;;  %v9329_v22 = vcombine.low %v744_v10, %v752_v11  ;;  %v9344_v23 = vcombine.high %v759_v15, %v767_v18  ;;  %v848_v10 = vld [vmem:[%s13645_s1 + $0x1968] sm:$0xff]  ;;  %v863_v15 = vld [vmem:[%s13645_s1 + $0x19e0] sm:$0xff] }
 0x29f   :  { %7043 = vmatprep.subr.bf16.mxu0 %v9248_v58  ;;  %7207 = vmatprep.subr.bf16.mxu1 %v9250_v24  ;;  %v9346_v58 = vcombine.high %v760_v19, %v768_v20  ;;  %v775_v24 = vld [vmem:[%s13645_s1 + $0x1720] sm:$0xff]  ;;  %v856_v18 = vld [vmem:[%s13645_s1 + $0x19a8] sm:$0xff] }
 0x2a0   :  { %v9359_v40 = vcombine.low %v775_v24, %v783_v26 }
 0x2a2   :  { %7044 = vmatpush1.bf16.msra.mxu0 %v9247_v32  ;;  %7208 = vmatpush1.bf16.msra.mxu1 %v9249_v33  ;;  %v9345_v32 = vcombine.low %v760_v19, %v768_v20  ;;  %v9360_v33 = vcombine.high %v775_v24, %v783_v26  ;;  %v864_v19 = vld [vmem:[%s13645_s1 + $0x19e8] sm:$0xff]  ;;  %v879_v24 = vld [vmem:[%s13645_s1 + $0x1a60] sm:$0xff] }
 0x2a3   :  { %7045 = vmatprep.subr.bf16.mxu0 %v9264_v34  ;;  %7209 = vmatprep.subr.bf16.mxu1 %v9266_v36  ;;  %v9362_v34 = vcombine.high %v776_v27, %v784_v28  ;;  %v791_v36 = vld [vmem:[%s13645_s1 + $0x17a0] sm:$0xff]  ;;  %v872_v26 = vld [vmem:[%s13645_s1 + $0x1a28] sm:$0xff] }
 0x2a4   :  { %v9375_v29 = vcombine.low %v791_v36, %v799_v16 }
 0x2a6   :  { %7046 = vmatpush1.bf16.msra.mxu0 %v9263_v41  ;;  %7210 = vmatpush1.bf16.msra.mxu1 %v9265_v43  ;;  %v9361_v41 = vcombine.low %v776_v27, %v784_v28  ;;  %v9376_v43 = vcombine.high %v791_v36, %v799_v16  ;;  %v880_v27 = vld [vmem:[%s13645_s1 + $0x1a68] sm:$0xff]  ;;  %v895_v36 = vld [vmem:[%s13645_s1 + $0x1ae0] sm:$0xff]  ;;  %v12381_v16 = vsub.s32 4, %v11567_v35 }
 0x2a7   :  { %7047 = vmatprep.subr.bf16.mxu0 %v9280_v44  ;;  %7211 = vmatprep.subr.bf16.mxu1 %v9282_v45  ;;  %v9378_v44 = vcombine.high %v792_v37, %v800_v39  ;;  %v807_v45 = vld [vmem:[%s13645_s1 + $0x1820] sm:$0xff] }
 0x2a8   :  { %v9391_v2 = vcombine.low %v807_v45, %v815_v48 }
 0x2aa   :  { %7048 = vmatpush1.bf16.msra.mxu0 %v9279_v56  ;;  %7212 = vmatpush1.bf16.msra.mxu1 %v9281_v59  ;;  %v9377_v56 = vcombine.low %v792_v37, %v800_v39  ;;  %v9392_v59 = vcombine.high %v807_v45, %v815_v48  ;;  %v888_v37 = vld [vmem:[%s13645_s1 + $0x1aa8] sm:$0xff] }
 0x2ab   :  { %7049 = vmatprep.subr.bf16.mxu0 %v9296_v60  ;;  %7213 = vmatprep.subr.bf16.mxu1 %v9298_v61  ;;  %v9394_v60 = vcombine.high %v808_v51, %v816_v52  ;;  %v823_v61 = vld [vmem:[%s13645_s1 + $0x18a0] sm:$0xff]  ;;  %v896_v39 = vld [vmem:[%s13645_s1 + $0x1ae8] sm:$0xff] }
 0x2ac   :  { %v9407_v11 = vcombine.low %v823_v61, %v831_v63  ;;  %v9474_v48 = vcombine.high %v888_v37, %v896_v39 }
 0x2ae   :  { %7050 = vmatpush1.bf16.msra.mxu0 %v9295_v3  ;;  %7214 = vmatpush1.bf16.msra.mxu1 %v9297_v4  ;;  %v9393_v3 = vcombine.low %v808_v51, %v816_v52  ;;  %v9408_v4 = vcombine.high %v823_v61, %v831_v63  ;;  %v903_v51 = vld [vmem:[%s13645_s1 + $0x1b20] sm:$0xff]  ;;  %v912_v61 = vld [vmem:[%s13645_s1 + $0x1b68] sm:$0xff] }
 0x2af   :  { %7051 = vmatprep.subr.bf16.mxu0 %v9312_v6  ;;  %7215 = vmatprep.subr.bf16.mxu1 %v9314_v7  ;;  %v9410_v6 = vcombine.high %v824_v0, %v832_v1  ;;  %v839_v7 = vld [vmem:[%s13645_s1 + $0x1920] sm:$0xff] }
 0x2b0   :  { %v9423_v20 = vcombine.low %v839_v7, %v847_v8  ;;  %v911_v52 = vld [vmem:[%s13645_s1 + $0x1b60] sm:$0xff] }
 0x2b2   :  { %7052 = vmatpush1.bf16.msra.mxu0 %v9311_v46  ;;  %7216 = vmatpush1.bf16.msra.mxu1 %v9313_v12  ;;  %v9409_v46 = vcombine.low %v824_v0, %v832_v1  ;;  %v9424_v12 = vcombine.high %v839_v7, %v847_v8  ;;  %v919_v7 = vld [vmem:[%s13645_s1 + $0x1ba0] sm:$0xff] }
 0x2b3   :  { %7053 = vmatprep.subr.bf16.mxu0 %v9328_v13  ;;  %7217 = vmatprep.subr.bf16.mxu1 %v9330_v14  ;;  %v9426_v13 = vcombine.high %v840_v9, %v848_v10  ;;  %v855_v14 = vld [vmem:[%s13645_s1 + $0x19a0] sm:$0xff] }
 0x2b4   :  { %v9439_v28 = vcombine.low %v855_v14, %v863_v15  ;;  %v927_v8 = vld [vmem:[%s13645_s1 + $0x1be0] sm:$0xff] }
 0x2b6   :  { %7054 = vmatpush1.bf16.msra.mxu0 %v9327_v21  ;;  %7218 = vmatpush1.bf16.msra.mxu1 %v9329_v22  ;;  %v9425_v21 = vcombine.low %v840_v9, %v848_v10  ;;  %v9440_v22 = vcombine.high %v855_v14, %v863_v15 }
 0x2b7   :  { %7055 = vmatprep.subr.bf16.mxu0 %v9344_v23  ;;  %7219 = vmatprep.subr.bf16.mxu1 %v9346_v58  ;;  %v9442_v23 = vcombine.high %v856_v18, %v864_v19  ;;  %v871_v58 = vld [vmem:[%s13645_s1 + $0x1a20] sm:$0xff] }
 0x2ba   :  { %7056 = vmatpush1.bf16.msra.mxu0 %v9343_v31  ;;  %7220 = vmatpush1.bf16.msra.mxu1 %v9345_v32  ;;  %v9441_v31 = vcombine.low %v856_v18, %v864_v19  ;;  %v9456_v32 = vcombine.high %v871_v58, %v879_v24  ;;  %v9487_v19 = vcombine.low %v903_v51, %v911_v52 }
 0x2bb   :  { %7057 = vmatprep.subr.bf16.mxu0 %v9360_v33  ;;  %7221 = vmatprep.subr.bf16.mxu1 %v9362_v34  ;;  %v9458_v33 = vcombine.high %v872_v26, %v880_v27  ;;  %v887_v34 = vld [vmem:[%s13645_s1 + $0x1aa0] sm:$0xff] }
 0x2bc   :  { %v9472_v45 = vcombine.high %v887_v34, %v895_v36  ;;  %v9471_v0 = vcombine.low %v887_v34, %v895_v36  ;;  %v936_v36 = vld [vmem:[%s13645_s1 + $0x1c28] sm:$0xff] }
 0x2be   :  { %7058 = vmatpush1.bf16.msra.mxu0 %v9359_v40  ;;  %7222 = vmatpush1.bf16.msra.mxu1 %v9361_v41  ;;  %v9455_v40 = vcombine.low %v871_v58, %v879_v24  ;;  %v12390_v41 = vsub.s32 5, %v11567_v35  ;;  %v9504_v24 = vcombine.high %v919_v7, %v927_v8 }
 0x2bf   :  { %7059 = vmatprep.subr.bf16.mxu0 %v9376_v43  ;;  %7223 = vmatprep.subr.bf16.mxu1 %v9378_v44  ;;  %v9457_v43 = vcombine.low %v872_v26, %v880_v27  ;;  %v1089_v44 = vsub.s32 6, %v11567_v35 }
 0x2c2   :  { %7060 = vmatpush1.bf16.msra.mxu0 %v9375_v29  ;;  %7224 = vmatpush1.bf16.msra.mxu1 %v9377_v56  ;;  %v10035_v29 = vld [vmem:[%s13647_s2] sm:$0xff] }
 0x2c3   :  { %7070 = vmatprep.subr.bf16.mxu0 %v9392_v59  ;;  %7234 = vmatprep.subr.bf16.mxu1 %v9394_v60  ;;  %v1082_v56 = vrot.slane %v10035_v29, %v12381_v16  ;;  %v1093_v59 = vsub.s32 7, %v11567_v35  ;;  %v904_v60 = vld [vmem:[%s13645_s1 + $0x1b28] sm:$0xff]  ;;  %v1086_v63 = vrot.slane %v10035_v29, %v12390_v41  ;;  %v1090_v1 = vrot.slane %v10035_v29, %v1089_v44 }
 0x2c4   :  { %v9489_v58 = vcombine.low %v904_v60, %v912_v61 }
 0x2c5   :  { %7062 = vmatmul.mubr.bf16.vlgmr.msra.gmra.mrb[8].mxu0 %v10727_v47  ;;  %7226 = vmatmul.mubr.bf16.vlgmr.msra.gmra.mrb[8].mxu1 %v10727_v47 }
 0x2c6   :  { %7071 = vmatpush1.bf16.msra.mxu0 %v9391_v2  ;;  %7235 = vmatpush1.bf16.msra.mxu1 %v9393_v3  ;;  %v9473_v2 = vcombine.low %v888_v37, %v896_v39  ;;  %v9488_v3 = vcombine.high %v903_v51, %v911_v52  ;;  %v944_v37 = vld [vmem:[%s13645_s1 + $0x1c68] sm:$0xff]  ;;  %v9503_v39 = vcombine.low %v919_v7, %v927_v8  ;;  %v959_v52 = vld [vmem:[%s13645_s1 + $0x1ce0] sm:$0xff] }
 0x2c7   :  { %7072 = vmatprep.subr.bf16.mxu0 %v9408_v4  ;;  %7236 = vmatprep.subr.bf16.mxu1 %v9410_v6  ;;  %v9490_v6 = vcombine.high %v904_v60, %v912_v61  ;;  %v9522_v51 = vcombine.high %v936_v36, %v944_v37  ;;  %v952_v60 = vld [vmem:[%s13645_s1 + $0x1ca8] sm:$0xff] }
 0x2c8   :  { %7102 = vmatprep.mubr.bf16.mxu0 %v10743_v55  ;;  %7266 = vmatprep.mubr.bf16.mxu1 %v10743_v55  ;;  %v960_v61 = vld [vmem:[%s13645_s1 + $0x1ce8] sm:$0xff] }
 0x2c9   :  { %v968_v7 = vld [vmem:[%s13645_s1 + $0x1d28] sm:$0xff] }
 0x2ca   :  { %7073 = vmatpush1.bf16.msra.mxu0 %v9407_v11  ;;  %7237 = vmatpush1.bf16.msra.mxu1 %v9409_v46  ;;  %v1094_v46 = vrot.slane %v10035_v29, %v1093_v59  ;;  %v976_v8 = vld [vmem:[%s13645_s1 + $0x1d68] sm:$0xff] }
 0x2cb   :  { %7074 = vmatprep.subr.bf16.mxu0 %v9424_v12  ;;  %7238 = vmatprep.subr.bf16.mxu1 %v9426_v13  ;;  %v920_v12 = vld [vmem:[%s13645_s1 + $0x1ba8] sm:$0xff] }
 0x2cc   :  { %v928_v13 = vld [vmem:[%s13645_s1 + $0x1be8] sm:$0xff] }
 0x2ce   :  { %7075 = vmatpush1.bf16.msra.mxu0 %v9423_v20  ;;  %7239 = vmatpush1.bf16.msra.mxu1 %v9425_v21 }
 0x2cf   :  { %7076 = vmatprep.subr.bf16.mxu0 %v9440_v22  ;;  %7240 = vmatprep.subr.bf16.mxu1 %v9442_v23 }
 0x2d2   :  { %7077 = vmatpush1.bf16.msra.mxu0 %v9439_v28  ;;  %7241 = vmatpush1.bf16.msra.mxu1 %v9441_v31  ;;  %v9506_v28 = vcombine.high %v920_v12, %v928_v13  ;;  %v935_v31 = vld [vmem:[%s13645_s1 + $0x1c20] sm:$0xff] }
 0x2d3   :  { %7078 = vmatprep.subr.bf16.mxu0 %v9456_v32  ;;  %7242 = vmatprep.subr.bf16.mxu1 %v9458_v33  ;;  %v943_v32 = vld [vmem:[%s13645_s1 + $0x1c60] sm:$0xff] }
 0x2d6   :  { %7079 = vmatpush1.bf16.msra.mxu0 %v9455_v40  ;;  %7243 = vmatpush1.bf16.msra.mxu1 %v9457_v43 }
 0x2d7   :  { %7080 = vmatprep.subr.bf16.mxu0 %v9472_v45  ;;  %7244 = vmatprep.subr.bf16.mxu1 %v9474_v48  ;;  %v9505_v45 = vcombine.low %v920_v12, %v928_v13  ;;  %v9520_v48 = vcombine.high %v935_v31, %v943_v32  ;;  %v983_v12 = vld [vmem:[%s13645_s1 + $0x1da0] sm:$0xff] }
 0x2d8   :  { %v6776_v4 = vpop.f32.mrb[4].mxu0  ;;  %v6940_v10 = vpop.f32.mrb[4].mxu1  ;;  %v991_v13 = vld [vmem:[%s13645_s1 + $0x1de0] sm:$0xff] }
 0x2d9   :  { %v9806_v9 = vadd.f32 %v6776_v4, %v1082_v56  ;;  %v6778_v11 = vpop.f32.mrb[5].mxu0  ;;  %v6942_v15 = vpop.f32.mrb[5].mxu1  ;;  %v9808_v21 = vadd.f32 %v6940_v10, %v1090_v1  ;;  %v9521_v1 = vcombine.low %v936_v36, %v944_v37  ;;  %v967_v4 = vld [vmem:[%s13645_s1 + $0x1d20] sm:$0xff]  ;;  %v9537_v10 = vcombine.low %v952_v60, %v960_v61  ;;  %v1024_v36 = vld [vmem:[%s13645_s1 + $0x1ee8] sm:$0xff] }
 0x2da   :  { %v9807_v14 = vadd.f32 %v6778_v11, %v1086_v63  ;;  %v6780_v18 = vpop.f32.mrb[6].mxu0  ;;  %7081 = vmatpush1.bf16.msra.mxu0 %v9471_v0  ;;  %v6944_v22 = vpop.f32.mrb[6].mxu1  ;;  %7245 = vmatpush1.bf16.msra.mxu1 %v9473_v2  ;;  %v9809_v34 = vadd.f32 %v6942_v15, %v1094_v46  ;;  %v9519_v63 = vcombine.low %v935_v31, %v943_v32  ;;  %v992_v15 = vld [vmem:[%s13645_s1 + $0x1de8] sm:$0xff]  ;;  %v1015_v32 = vld [vmem:[%s13645_s1 + $0x1ea0] sm:$0xff] }
 0x2db   :  { %v7607_v20 = vmax.f32 %v9806_v9, 0.0  ;;  %v6781_v23 = vpop.f32.mrb[7].mxu0  ;;  %7082 = vmatprep.subr.bf16.mxu0 %v9488_v3  ;;  %v6945_v27 = vpop.f32.mrb[7].mxu1  ;;  %7246 = vmatprep.subr.bf16.mxu1 %v9490_v6  ;;  %v7609_v40 = vmax.f32 %v9808_v21, 0.0  ;;  %v9538_v3 = vcombine.high %v952_v60, %v960_v61  ;;  %v975_v6 = vld [vmem:[%s13645_s1 + $0x1d60] sm:$0xff]  ;;  %v9554_v46 = vcombine.high %v968_v7, %v976_v8 }
 0x2dc   :  { %v7608_v26 = vmax.f32 %v9807_v14, 0.0  ;;  %v7610_v29 = vmax.f32 %v9809_v34, 0.0  ;;  %v9552_v11 = vcombine.high %v967_v4, %v975_v6  ;;  %v984_v14 = vld [vmem:[%s13645_s1 + $0x1da8] sm:$0xff]  ;;  %v9551_v18 = vcombine.low %v967_v4, %v975_v6  ;;  %v999_v22 = vld [vmem:[%s13645_s1 + $0x1e20] sm:$0xff] }
 0x2dd   :  { %v7622_v33 = vadd.f32 %v11648_v54, %v7607_v20  ;;  %v951_v54 = vld [vmem:[%s13645_s1 + $0x1ca0] sm:$0xff]  ;;  %v9568_v20 = vcombine.high %v983_v12, %v991_v13  ;;  %v9570_v21 = vcombine.high %v984_v14, %v992_v15  ;;  %v9569_v27 = vcombine.low %v984_v14, %v992_v15  ;;  %v1016_v34 = vld [vmem:[%s13645_s1 + $0x1ea8] sm:$0xff]  ;;  %v57_v15 = vld [vmem:[%s13645_s1 + $0xb0] sm:$0xff] }
 0x2de   :  { %7083 = vmatpush1.bf16.msra.mxu0 %v9487_v19  ;;  %7247 = vmatpush1.bf16.msra.mxu1 %v9489_v58  ;;  %v9536_v2 = vcombine.high %v951_v54, %v959_v52  ;;  %v9535_v9 = vcombine.low %v951_v54, %v959_v52  ;;  %v9553_v19 = vcombine.low %v968_v7, %v976_v8  ;;  %v1007_v23 = vld [vmem:[%s13645_s1 + $0x1e60] sm:$0xff]  ;;  %v1000_v58 = vld [vmem:[%s13645_s1 + $0x1e28] sm:$0xff]  ;;  %v41_v8 = vld [vmem:[%s13645_s1 + $0x30] sm:$0xff] }
 0x2df   :  { %v7623_v43 = vadd.f32 %v7622_v33, %v7608_v26  ;;  %7084 = vmatprep.subr.bf16.mxu0 %v9504_v24  ;;  %7248 = vmatprep.subr.bf16.mxu1 %v9506_v28  ;;  %v1008_v24 = vld [vmem:[%s13645_s1 + $0x1e68] sm:$0xff]  ;;  %v9567_v26 = vcombine.low %v983_v12, %v991_v13  ;;  %v9584_v28 = vcombine.high %v999_v22, %v1007_v23  ;;  %v1023_v33 = vld [vmem:[%s13645_s1 + $0x1ee0] sm:$0xff] }
 0x2e0   :  { %v9586_v31 = vcombine.high %v1000_v58, %v1008_v24  ;;  %v9583_v37 = vcombine.low %v999_v22, %v1007_v23  ;;  %v1040_v54 = vld [vmem:[%s13645_s1 + $0x1f68] sm:$0xff]  ;;  %v9599_v52 = vcombine.low %v1015_v32, %v1023_v33  ;;  %v1047_v61 = vld [vmem:[%s13645_s1 + $0x1fa0] sm:$0xff] }
 0x2e1   :  { %v7624_v56 = vadd.f32 %v7623_v43, %v7609_v40  ;;  %v9600_v40 = vcombine.high %v1015_v32, %v1023_v33  ;;  %v9602_v43 = vcombine.high %v1016_v34, %v1024_v36 }
 0x2e2   :  { %7085 = vmatpush1.bf16.msra.mxu0 %v9503_v39  ;;  %7249 = vmatpush1.bf16.msra.mxu1 %v9505_v45  ;;  %v9585_v39 = vcombine.low %v1000_v58, %v1008_v24  ;;  %v1031_v45 = vld [vmem:[%s13645_s1 + $0x1f20] sm:$0xff]  ;;  %v73_v24 = vld [vmem:[%s13645_s1 + $0x130] sm:$0xff] }
 0x2e3   :  { %v12452_v0 = vadd.f32 %v7624_v56, %v7610_v29  ;;  %7086 = vmatprep.subr.bf16.mxu0 %v9520_v48  ;;  %7250 = vmatprep.subr.bf16.mxu1 %v9522_v51  ;;  %v1039_v48 = vld [vmem:[%s13645_s1 + $0x1f60] sm:$0xff]  ;;  %v1032_v51 = vld [vmem:[%s13645_s1 + $0x1f28] sm:$0xff]  ;;  %v9601_v29 = vcombine.low %v1016_v34, %v1024_v36  ;;  %v89_v36 = vld [vmem:[%s13645_s1 + $0x1b0] sm:$0xff] }
 0x2e4   :  { %v9616_v56 = vcombine.high %v1031_v45, %v1039_v48  ;;  %v9618_v60 = vcombine.high %v1032_v51, %v1040_v54  ;;  %v9617_v4 = vcombine.low %v1032_v51, %v1040_v54  ;;  %v105_v54 = vld [vmem:[%s13645_s1 + $0x230] sm:$0xff] }
 0x2e6   :  { %7087 = vmatpush1.bf16.msra.mxu0 %v9519_v63  ;;  %7251 = vmatpush1.bf16.msra.mxu1 %v9521_v1  ;;  %v1055_v63 = vld [vmem:[%s13645_s1 + $0x1fe0] sm:$0xff]  ;;  %v1048_v1 = vld [vmem:[%s13645_s1 + $0x1fa8] sm:$0xff] }
 0x2e7   :  { %7088 = vmatprep.subr.bf16.mxu0 %v9536_v2  ;;  %7252 = vmatprep.subr.bf16.mxu1 %v9538_v3  ;;  %v1056_v2 = vld [vmem:[%s13645_s1 + $0x1fe8] sm:$0xff]  ;;  %v9615_v3 = vcombine.low %v1031_v45, %v1039_v48  ;;  %v9632_v6 = vcombine.high %v1047_v61, %v1055_v63 }
 0x2e8   :  { %v9634_v7 = vcombine.high %v1048_v1, %v1056_v2  ;;  %v9633_v12 = vcombine.low %v1048_v1, %v1056_v2  ;;  %v121_v1 = vld [vmem:[%s13645_s1 + $0x2b0] sm:$0xff] }
 0x2e9   :  { %v129_v2 = vld [vmem:[%s13645_s1 + $0x2f0] sm:$0xff] }
 0x2ea   :  { %7089 = vmatpush1.bf16.msra.mxu0 %v9535_v9  ;;  %7253 = vmatpush1.bf16.msra.mxu1 %v9537_v10  ;;  %v49_v9 = vld [vmem:[%s13645_s1 + $0x70] sm:$0xff]  ;;  %v42_v10 = vld [vmem:[%s13645_s1 + $0x38] sm:$0xff] }
 0x2eb   :  { %7090 = vmatprep.subr.bf16.mxu0 %v9552_v11  ;;  %7254 = vmatprep.subr.bf16.mxu1 %v9554_v46  ;;  %v50_v11 = vld [vmem:[%s13645_s1 + $0x78] sm:$0xff]  ;;  %v9631_v46 = vcombine.low %v1047_v61, %v1055_v63  ;;  %v8628_v13 = vcombine.high %v41_v8, %v49_v9 }
 0x2ec   :  { %v8630_v14 = vcombine.high %v42_v10, %v50_v11  ;;  %v8629_v22 = vcombine.low %v42_v10, %v50_v11  ;;  %v137_v10 = vld [vmem:[%s13645_s1 + $0x330] sm:$0xff] }
 0x2ed   :  { %v145_v11 = vld [vmem:[%s13645_s1 + $0x370] sm:$0xff] }
 0x2ee   :  { %7091 = vmatpush1.bf16.msra.mxu0 %v9551_v18  ;;  %7255 = vmatpush1.bf16.msra.mxu1 %v9553_v19  ;;  %v65_v18 = vld [vmem:[%s13645_s1 + $0xf0] sm:$0xff]  ;;  %v58_v19 = vld [vmem:[%s13645_s1 + $0xb8] sm:$0xff] }
 0x2ef   :  { %7092 = vmatprep.subr.bf16.mxu0 %v9568_v20  ;;  %7256 = vmatprep.subr.bf16.mxu1 %v9570_v21  ;;  %v66_v20 = vld [vmem:[%s13645_s1 + $0xf8] sm:$0xff]  ;;  %v8627_v21 = vcombine.low %v41_v8, %v49_v9  ;;  %v8644_v23 = vcombine.high %v57_v15, %v65_v18  ;;  %v8708_v8 = vcombine.high %v121_v1, %v129_v2 }
 0x2f0   :  { %v8646_v58 = vcombine.high %v58_v19, %v66_v20  ;;  %v8645_v32 = vcombine.low %v58_v19, %v66_v20  ;;  %v153_v19 = vld [vmem:[%s13645_s1 + $0x3b0] sm:$0xff] }
 0x2f1   :  { %v161_v20 = vld [vmem:[%s13645_s1 + $0x3f0] sm:$0xff] }
 0x2f2   :  { %7093 = vmatpush1.bf16.msra.mxu0 %v9567_v26  ;;  %7257 = vmatpush1.bf16.msra.mxu1 %v9569_v27  ;;  %v81_v26 = vld [vmem:[%s13645_s1 + $0x170] sm:$0xff]  ;;  %v74_v27 = vld [vmem:[%s13645_s1 + $0x138] sm:$0xff] }
 0x2f3   :  { %7094 = vmatprep.subr.bf16.mxu0 %v9584_v28  ;;  %7258 = vmatprep.subr.bf16.mxu1 %v9586_v31  ;;  %v82_v28 = vld [vmem:[%s13645_s1 + $0x178] sm:$0xff]  ;;  %v8643_v31 = vcombine.low %v57_v15, %v65_v18  ;;  %v8660_v33 = vcombine.high %v73_v24, %v81_v26  ;;  %v8724_v15 = vcombine.high %v137_v10, %v145_v11 }
 0x2f4   :  { %v8662_v34 = vcombine.high %v74_v27, %v82_v28  ;;  %v8661_v45 = vcombine.low %v74_v27, %v82_v28  ;;  %v169_v27 = vld [vmem:[%s13645_s1 + $0x430] sm:$0xff] }
 0x2f5   :  { %v177_v28 = vld [vmem:[%s13645_s1 + $0x470] sm:$0xff] }
 0x2f6   :  { %7095 = vmatpush1.bf16.msra.mxu0 %v9583_v37  ;;  %7259 = vmatpush1.bf16.msra.mxu1 %v9585_v39  ;;  %v97_v37 = vld [vmem:[%s13645_s1 + $0x1f0] sm:$0xff]  ;;  %v90_v39 = vld [vmem:[%s13645_s1 + $0x1b8] sm:$0xff] }
 0x2f7   :  { %7096 = vmatprep.subr.bf16.mxu0 %v9600_v40  ;;  %7260 = vmatprep.subr.bf16.mxu1 %v9602_v43  ;;  %v98_v40 = vld [vmem:[%s13645_s1 + $0x1f8] sm:$0xff]  ;;  %v8659_v43 = vcombine.low %v73_v24, %v81_v26  ;;  %v8676_v48 = vcombine.high %v89_v36, %v97_v37  ;;  %v8740_v24 = vcombine.high %v153_v19, %v161_v20 }
 0x2f8   :  { %v8678_v51 = vcombine.high %v90_v39, %v98_v40 }
 0x2fa   :  { %7097 = vmatpush1.bf16.msra.mxu0 %v9599_v52  ;;  %7261 = vmatpush1.bf16.msra.mxu1 %v9601_v29  ;;  %v113_v52 = vld [vmem:[%s13645_s1 + $0x270] sm:$0xff]  ;;  %v114_v29 = vld [vmem:[%s13645_s1 + $0x278] sm:$0xff] }
 0x2fb   :  { %7098 = vmatprep.subr.bf16.mxu0 %v9616_v56  ;;  %7262 = vmatprep.subr.bf16.mxu1 %v9618_v60  ;;  %v8675_v56 = vcombine.low %v89_v36, %v97_v37  ;;  %v8677_v60 = vcombine.low %v90_v39, %v98_v40  ;;  %v8692_v61 = vcombine.high %v105_v54, %v113_v52  ;;  %v185_v39 = vld [vmem:[%s13645_s1 + $0x4b0] sm:$0xff] }
 0x2fc   :  { %v8756_v36 = vcombine.high %v169_v27, %v177_v28  ;;  %v193_v40 = vld [vmem:[%s13645_s1 + $0x4f0] sm:$0xff] }
 0x2fe   :  { %7099 = vmatpush1.bf16.msra.mxu0 %v9615_v3  ;;  %7263 = vmatpush1.bf16.msra.mxu1 %v9617_v4  ;;  %v122_v3 = vld [vmem:[%s13645_s1 + $0x2b8] sm:$0xff] }
 0x2ff   :  { %7100 = vmatprep.subr.bf16.mxu0 %v9632_v6  ;;  %7264 = vmatprep.subr.bf16.mxu1 %v9634_v7  ;;  %v130_v4 = vld [vmem:[%s13645_s1 + $0x2f8] sm:$0xff]  ;;  %v8691_v6 = vcombine.low %v105_v54, %v113_v52  ;;  %v8772_v54 = vcombine.high %v185_v39, %v193_v40 }
 0x300   :  { %v8710_v9 = vcombine.high %v122_v3, %v130_v4 }
 0x302   :  { %7101 = vmatpush1.bf16.msra.mxu0 %v9631_v46  ;;  %7265 = vmatpush1.bf16.msra.mxu1 %v9633_v12  ;;  %v138_v46 = vld [vmem:[%s13645_s1 + $0x338] sm:$0xff] }
 0x303   :  { %7275 = vmatprep.subr.bf16.mxu0 %v8628_v13  ;;  %7439 = vmatprep.subr.bf16.mxu1 %v8630_v14  ;;  %v146_v12 = vld [vmem:[%s13645_s1 + $0x378] sm:$0xff]  ;;  %v8707_v13 = vcombine.low %v121_v1, %v129_v2  ;;  %v8709_v14 = vcombine.low %v122_v3, %v130_v4  ;;  %v217_v3 = vld [vmem:[%s13645_s1 + $0x5b0] sm:$0xff] }
 0x304   :  { %v8726_v18 = vcombine.high %v138_v46, %v146_v12  ;;  %v225_v4 = vld [vmem:[%s13645_s1 + $0x5f0] sm:$0xff] }
 0x305   :  { %7103 = vmatmul.mubr.bf16.vlgmr.msra.gmra.mrb[8].mxu0 %v10931_v5  ;;  %7267 = vmatmul.mubr.bf16.vlgmr.msra.gmra.mrb[8].mxu1 %v10931_v5 }
 0x306   :  { %7276 = vmatpush1.bf16.msra.mxu0 %v8627_v21  ;;  %7440 = vmatpush1.bf16.msra.mxu1 %v8629_v22  ;;  %v154_v21 = vld [vmem:[%s13645_s1 + $0x3b8] sm:$0xff] }
 0x307   :  { %7277 = vmatprep.subr.bf16.mxu0 %v8644_v23  ;;  %7441 = vmatprep.subr.bf16.mxu1 %v8646_v58  ;;  %v162_v22 = vld [vmem:[%s13645_s1 + $0x3f8] sm:$0xff]  ;;  %v8723_v23 = vcombine.low %v137_v10, %v145_v11  ;;  %v8725_v58 = vcombine.low %v138_v46, %v146_v12  ;;  %v8804_v10 = vcombine.high %v217_v3, %v225_v4  ;;  %v233_v46 = vld [vmem:[%s13645_s1 + $0x630] sm:$0xff] }
 0x308   :  { %7307 = vmatprep.mubr.bf16.mxu0 %v10181_v62  ;;  %7471 = vmatprep.mubr.bf16.mxu1 %v10181_v62  ;;  %v106_v62 = vld [vmem:[%s13645_s1 + $0x238] sm:$0xff]  ;;  %v8742_v26 = vcombine.high %v154_v21, %v162_v22  ;;  %v241_v12 = vld [vmem:[%s13645_s1 + $0x670] sm:$0xff] }
 0x309   :  { %v8694_v63 = vcombine.high %v106_v62, %v114_v29  ;;  %v8693_v7 = vcombine.low %v106_v62, %v114_v29  ;;  %v201_v62 = vld [vmem:[%s13645_s1 + $0x530] sm:$0xff] }
 0x30a   :  { %7278 = vmatpush1.bf16.msra.mxu0 %v8643_v31  ;;  %7442 = vmatpush1.bf16.msra.mxu1 %v8645_v32  ;;  %v170_v31 = vld [vmem:[%s13645_s1 + $0x438] sm:$0xff]  ;;  %v209_v29 = vld [vmem:[%s13645_s1 + $0x570] sm:$0xff] }
 0x30b   :  { %7279 = vmatprep.subr.bf16.mxu0 %v8660_v33  ;;  %7443 = vmatprep.subr.bf16.mxu1 %v8662_v34  ;;  %v178_v32 = vld [vmem:[%s13645_s1 + $0x478] sm:$0xff]  ;;  %v8739_v33 = vcombine.low %v153_v19, %v161_v20  ;;  %v8741_v34 = vcombine.low %v154_v21, %v162_v22  ;;  %v8788_v1 = vcombine.high %v201_v62, %v209_v29  ;;  %v249_v21 = vld [vmem:[%s13645_s1 + $0x6b0] sm:$0xff] }
 0x30c   :  { %v8758_v37 = vcombine.high %v170_v31, %v178_v32  ;;  %v8820_v19 = vcombine.high %v233_v46, %v241_v12  ;;  %v257_v22 = vld [vmem:[%s13645_s1 + $0x6f0] sm:$0xff] }
 0x30e   :  { %7280 = vmatpush1.bf16.msra.mxu0 %v8659_v43  ;;  %7444 = vmatpush1.bf16.msra.mxu1 %v8661_v45  ;;  %v186_v43 = vld [vmem:[%s13645_s1 + $0x4b8] sm:$0xff] }
 0x30f   :  { %7281 = vmatprep.subr.bf16.mxu0 %v8676_v48  ;;  %7445 = vmatprep.subr.bf16.mxu1 %v8678_v51  ;;  %v194_v45 = vld [vmem:[%s13645_s1 + $0x4f8] sm:$0xff]  ;;  %v8755_v48 = vcombine.low %v169_v27, %v177_v28  ;;  %v8757_v51 = vcombine.low %v170_v31, %v178_v32  ;;  %v8836_v27 = vcombine.high %v249_v21, %v257_v22  ;;  %v265_v31 = vld [vmem:[%s13645_s1 + $0x730] sm:$0xff] }
 0x310   :  { %v8774_v52 = vcombine.high %v186_v43, %v194_v45  ;;  %v273_v32 = vld [vmem:[%s13645_s1 + $0x770] sm:$0xff] }
 0x312   :  { %7282 = vmatpush1.bf16.msra.mxu0 %v8675_v56  ;;  %7446 = vmatpush1.bf16.msra.mxu1 %v8677_v60  ;;  %v202_v56 = vld [vmem:[%s13645_s1 + $0x538] sm:$0xff] }
 0x313   :  { %7283 = vmatprep.subr.bf16.mxu0 %v8692_v61  ;;  %7447 = vmatprep.subr.bf16.mxu1 %v8694_v63  ;;  %v210_v60 = vld [vmem:[%s13645_s1 + $0x578] sm:$0xff]  ;;  %v8771_v61 = vcombine.low %v185_v39, %v193_v40  ;;  %v8773_v63 = vcombine.low %v186_v43, %v194_v45  ;;  %v8852_v39 = vcombine.high %v265_v31, %v273_v32  ;;  %v281_v43 = vld [vmem:[%s13645_s1 + $0x7b0] sm:$0xff] }
 0x314   :  { %v8790_v2 = vcombine.high %v202_v56, %v210_v60  ;;  %v289_v45 = vld [vmem:[%s13645_s1 + $0x7f0] sm:$0xff] }
 0x316   :  { %7284 = vmatpush1.bf16.msra.mxu0 %v8691_v6  ;;  %7448 = vmatpush1.bf16.msra.mxu1 %v8693_v7  ;;  %v218_v6 = vld [vmem:[%s13645_s1 + $0x5b8] sm:$0xff] }
 0x317   :  { %7285 = vmatprep.subr.bf16.mxu0 %v8708_v8  ;;  %7449 = vmatprep.subr.bf16.mxu1 %v8710_v9  ;;  %v226_v7 = vld [vmem:[%s13645_s1 + $0x5f8] sm:$0xff]  ;;  %v8787_v8 = vcombine.low %v201_v62, %v209_v29  ;;  %v8789_v9 = vcombine.low %v202_v56, %v210_v60  ;;  %v8868_v62 = vcombine.high %v281_v43, %v289_v45  ;;  %v297_v56 = vld [vmem:[%s13645_s1 + $0x830] sm:$0xff] }
 0x318   :  { %v8806_v11 = vcombine.high %v218_v6, %v226_v7  ;;  %v305_v60 = vld [vmem:[%s13645_s1 + $0x870] sm:$0xff] }
 0x31a   :  { %7286 = vmatpush1.bf16.msra.mxu0 %v8707_v13  ;;  %7450 = vmatpush1.bf16.msra.mxu1 %v8709_v14  ;;  %v234_v13 = vld [vmem:[%s13645_s1 + $0x638] sm:$0xff] }
 0x31b   :  { %7287 = vmatprep.subr.bf16.mxu0 %v8724_v15  ;;  %7451 = vmatprep.subr.bf16.mxu1 %v8726_v18  ;;  %v242_v14 = vld [vmem:[%s13645_s1 + $0x678] sm:$0xff]  ;;  %v8803_v15 = vcombine.low %v217_v3, %v225_v4  ;;  %v8805_v18 = vcombine.low %v218_v6, %v226_v7  ;;  %v8884_v3 = vcombine.high %v297_v56, %v305_v60  ;;  %v313_v6 = vld [vmem:[%s13645_s1 + $0x8b0] sm:$0xff] }
 0x31c   :  { %v8822_v20 = vcombine.high %v234_v13, %v242_v14  ;;  %v321_v7 = vld [vmem:[%s13645_s1 + $0x8f0] sm:$0xff] }
 0x31e   :  { %7288 = vmatpush1.bf16.msra.mxu0 %v8723_v23  ;;  %7452 = vmatpush1.bf16.msra.mxu1 %v8725_v58  ;;  %v250_v23 = vld [vmem:[%s13645_s1 + $0x6b8] sm:$0xff] }
 0x31f   :  { %7289 = vmatprep.subr.bf16.mxu0 %v8740_v24  ;;  %7453 = vmatprep.subr.bf16.mxu1 %v8742_v26  ;;  %v258_v58 = vld [vmem:[%s13645_s1 + $0x6f8] sm:$0xff]  ;;  %v8819_v24 = vcombine.low %v233_v46, %v241_v12  ;;  %v8821_v26 = vcombine.low %v234_v13, %v242_v14  ;;  %v8900_v46 = vcombine.high %v313_v6, %v321_v7  ;;  %v329_v13 = vld [vmem:[%s13645_s1 + $0x930] sm:$0xff] }
 0x320   :  { %v8838_v28 = vcombine.high %v250_v23, %v258_v58  ;;  %v337_v14 = vld [vmem:[%s13645_s1 + $0x970] sm:$0xff] }
 0x322   :  { %7290 = vmatpush1.bf16.msra.mxu0 %v8739_v33  ;;  %7454 = vmatpush1.bf16.msra.mxu1 %v8741_v34  ;;  %v266_v33 = vld [vmem:[%s13645_s1 + $0x738] sm:$0xff] }
 0x323   :  { %7291 = vmatprep.subr.bf16.mxu0 %v8756_v36  ;;  %7455 = vmatprep.subr.bf16.mxu1 %v8758_v37  ;;  %v274_v34 = vld [vmem:[%s13645_s1 + $0x778] sm:$0xff]  ;;  %v8835_v36 = vcombine.low %v249_v21, %v257_v22  ;;  %v8837_v37 = vcombine.low %v250_v23, %v258_v58  ;;  %v8916_v21 = vcombine.high %v329_v13, %v337_v14  ;;  %v345_v23 = vld [vmem:[%s13645_s1 + $0x9b0] sm:$0xff] }
 0x324   :  { %v8854_v40 = vcombine.high %v266_v33, %v274_v34  ;;  %v353_v58 = vld [vmem:[%s13645_s1 + $0x9f0] sm:$0xff] }
 0x326   :  { %7292 = vmatpush1.bf16.msra.mxu0 %v8755_v48  ;;  %7456 = vmatpush1.bf16.msra.mxu1 %v8757_v51  ;;  %v282_v48 = vld [vmem:[%s13645_s1 + $0x7b8] sm:$0xff] }
 0x327   :  { %7293 = vmatprep.subr.bf16.mxu0 %v8772_v54  ;;  %7457 = vmatprep.subr.bf16.mxu1 %v8774_v52  ;;  %v290_v51 = vld [vmem:[%s13645_s1 + $0x7f8] sm:$0xff]  ;;  %v8851_v54 = vcombine.low %v265_v31, %v273_v32  ;;  %v8853_v52 = vcombine.low %v266_v33, %v274_v34  ;;  %v361_v32 = vld [vmem:[%s13645_s1 + $0xa30] sm:$0xff] }
 0x328   :  { %v8870_v29 = vcombine.high %v282_v48, %v290_v51  ;;  %v369_v33 = vld [vmem:[%s13645_s1 + $0xa70] sm:$0xff]  ;;  %v370_v34 = vld [vmem:[%s13645_s1 + $0xa78] sm:$0xff] }
 0x32a   :  { %7294 = vmatpush1.bf16.msra.mxu0 %v8771_v61  ;;  %7458 = vmatpush1.bf16.msra.mxu1 %v8773_v63  ;;  %v298_v61 = vld [vmem:[%s13645_s1 + $0x838] sm:$0xff] }
 0x32b   :  { %7295 = vmatprep.subr.bf16.mxu0 %v8788_v1  ;;  %7459 = vmatprep.subr.bf16.mxu1 %v8790_v2  ;;  %v306_v63 = vld [vmem:[%s13645_s1 + $0x878] sm:$0xff]  ;;  %v8867_v1 = vcombine.low %v281_v43, %v289_v45  ;;  %v8869_v2 = vcombine.low %v282_v48, %v290_v51  ;;  %v377_v43 = vld [vmem:[%s13645_s1 + $0xab0] sm:$0xff] }
 0x32c   :  { %v8886_v4 = vcombine.high %v298_v61, %v306_v63  ;;  %v385_v45 = vld [vmem:[%s13645_s1 + $0xaf0] sm:$0xff]  ;;  %v378_v48 = vld [vmem:[%s13645_s1 + $0xab8] sm:$0xff] }
 0x32d   :  { %v386_v51 = vld [vmem:[%s13645_s1 + $0xaf8] sm:$0xff] }
 0x32e   :  { %7296 = vmatpush1.bf16.msra.mxu0 %v8787_v8  ;;  %7460 = vmatpush1.bf16.msra.mxu1 %v8789_v9  ;;  %v314_v8 = vld [vmem:[%s13645_s1 + $0x8b8] sm:$0xff] }
 0x32f   :  { %7297 = vmatprep.subr.bf16.mxu0 %v8804_v10  ;;  %7461 = vmatprep.subr.bf16.mxu1 %v8806_v11  ;;  %v322_v9 = vld [vmem:[%s13645_s1 + $0x8f8] sm:$0xff]  ;;  %v8883_v10 = vcombine.low %v297_v56, %v305_v60  ;;  %v8885_v11 = vcombine.low %v298_v61, %v306_v63  ;;  %v393_v56 = vld [vmem:[%s13645_s1 + $0xb30] sm:$0xff] }
 0x330   :  { %v8902_v12 = vcombine.high %v314_v8, %v322_v9  ;;  %v401_v60 = vld [vmem:[%s13645_s1 + $0xb70] sm:$0xff]  ;;  %v394_v61 = vld [vmem:[%s13645_s1 + $0xb38] sm:$0xff] }
 0x331   :  { %v402_v63 = vld [vmem:[%s13645_s1 + $0xb78] sm:$0xff] }
 0x332   :  { %7298 = vmatpush1.bf16.msra.mxu0 %v8803_v15  ;;  %7462 = vmatpush1.bf16.msra.mxu1 %v8805_v18  ;;  %v330_v15 = vld [vmem:[%s13645_s1 + $0x938] sm:$0xff] }
 0x333   :  { %7299 = vmatprep.subr.bf16.mxu0 %v8820_v19  ;;  %7463 = vmatprep.subr.bf16.mxu1 %v8822_v20  ;;  %v338_v18 = vld [vmem:[%s13645_s1 + $0x978] sm:$0xff]  ;;  %v8899_v19 = vcombine.low %v313_v6, %v321_v7  ;;  %v8901_v20 = vcombine.low %v314_v8, %v322_v9  ;;  %v409_v6 = vld [vmem:[%s13645_s1 + $0xbb0] sm:$0xff] }
 0x334   :  { %v8918_v22 = vcombine.high %v330_v15, %v338_v18  ;;  %v417_v7 = vld [vmem:[%s13645_s1 + $0xbf0] sm:$0xff]  ;;  %v410_v8 = vld [vmem:[%s13645_s1 + $0xbb8] sm:$0xff] }
 0x335   :  { %v418_v9 = vld [vmem:[%s13645_s1 + $0xbf8] sm:$0xff] }
 0x336   :  { %7300 = vmatpush1.bf16.msra.mxu0 %v8819_v24  ;;  %7464 = vmatpush1.bf16.msra.mxu1 %v8821_v26  ;;  %v354_v24 = vld [vmem:[%s13645_s1 + $0x9f8] sm:$0xff]  ;;  %v8915_v26 = vcombine.low %v329_v13, %v337_v14  ;;  %v425_v13 = vld [vmem:[%s13645_s1 + $0xc30] sm:$0xff] }
 0x337   :  { %7301 = vmatprep.subr.bf16.mxu0 %v8836_v27  ;;  %7465 = vmatprep.subr.bf16.mxu1 %v8838_v28  ;;  %v8917_v27 = vcombine.low %v330_v15, %v338_v18  ;;  %v8932_v28 = vcombine.high %v345_v23, %v353_v58  ;;  %v433_v14 = vld [vmem:[%s13645_s1 + $0xc70] sm:$0xff]  ;;  %v426_v15 = vld [vmem:[%s13645_s1 + $0xc38] sm:$0xff] }
 0x338   :  { %v434_v18 = vld [vmem:[%s13645_s1 + $0xc78] sm:$0xff] }
 0x33a   :  { %7302 = vmatpush1.bf16.msra.mxu0 %v8835_v36  ;;  %7466 = vmatpush1.bf16.msra.mxu1 %v8837_v37  ;;  %v8931_v36 = vcombine.low %v345_v23, %v353_v58  ;;  %v441_v23 = vld [vmem:[%s13645_s1 + $0xcb0] sm:$0xff] }
 0x33b   :  { %7303 = vmatprep.subr.bf16.mxu0 %v8852_v39  ;;  %7467 = vmatprep.subr.bf16.mxu1 %v8854_v40  ;;  %v8948_v39 = vcombine.high %v361_v32, %v369_v33  ;;  %v449_v58 = vld [vmem:[%s13645_s1 + $0xcf0] sm:$0xff] }
 0x33e   :  { %7304 = vmatpush1.bf16.msra.mxu0 %v8851_v54  ;;  %7468 = vmatpush1.bf16.msra.mxu1 %v8853_v52  ;;  %v8947_v54 = vcombine.low %v361_v32, %v369_v33  ;;  %v457_v32 = vld [vmem:[%s13645_s1 + $0xd30] sm:$0xff] }
 0x33f   :  { %7305 = vmatprep.subr.bf16.mxu0 %v8868_v62  ;;  %7469 = vmatprep.subr.bf16.mxu1 %v8870_v29  ;;  %v8964_v62 = vcombine.high %v377_v43, %v385_v45  ;;  %v8966_v29 = vcombine.high %v378_v48, %v386_v51  ;;  %v465_v33 = vld [vmem:[%s13645_s1 + $0xd70] sm:$0xff] }
 0x342   :  { %7306 = vmatpush1.bf16.msra.mxu0 %v8867_v1  ;;  %7470 = vmatpush1.bf16.msra.mxu1 %v8869_v2  ;;  %v8963_v1 = vcombine.low %v377_v43, %v385_v45  ;;  %v8965_v2 = vcombine.low %v378_v48, %v386_v51  ;;  %v473_v43 = vld [vmem:[%s13645_s1 + $0xdb0] sm:$0xff]  ;;  %v474_v48 = vld [vmem:[%s13645_s1 + $0xdb8] sm:$0xff] }
 0x343   :  { %7316 = vmatprep.subr.bf16.mxu0 %v8884_v3  ;;  %7480 = vmatprep.subr.bf16.mxu1 %v8886_v4  ;;  %v8980_v3 = vcombine.high %v393_v56, %v401_v60  ;;  %v8982_v4 = vcombine.high %v394_v61, %v402_v63  ;;  %v481_v45 = vld [vmem:[%s13645_s1 + $0xdf0] sm:$0xff]  ;;  %v482_v51 = vld [vmem:[%s13645_s1 + $0xdf8] sm:$0xff] }
 0x345   :  { %7308 = vmatmul.mubr.bf16.vlgmr.msra.gmra.mrb[12].mxu0 %v10307_v17  ;;  %7472 = vmatmul.mubr.bf16.vlgmr.msra.gmra.mrb[12].mxu1 %v10307_v17  ;;  %v346_v17 = vld [vmem:[%s13645_s1 + $0x9b8] sm:$0xff] }
 0x346   :  { %7317 = vmatpush1.bf16.msra.mxu0 %v8883_v10  ;;  %7481 = vmatpush1.bf16.msra.mxu1 %v8885_v11  ;;  %v8934_v31 = vcombine.high %v346_v17, %v354_v24  ;;  %v8933_v37 = vcombine.low %v346_v17, %v354_v24  ;;  %v8979_v10 = vcombine.low %v393_v56, %v401_v60  ;;  %v442_v17 = vld [vmem:[%s13645_s1 + $0xcb8] sm:$0xff]  ;;  %v489_v56 = vld [vmem:[%s13645_s1 + $0xe30] sm:$0xff] }
 0x347   :  { %7318 = vmatprep.subr.bf16.mxu0 %v8900_v46  ;;  %7482 = vmatprep.subr.bf16.mxu1 %v8902_v12  ;;  %v8981_v11 = vcombine.low %v394_v61, %v402_v63  ;;  %v8996_v46 = vcombine.high %v409_v6, %v417_v7  ;;  %v8998_v12 = vcombine.high %v410_v8, %v418_v9  ;;  %v450_v24 = vld [vmem:[%s13645_s1 + $0xcf8] sm:$0xff]  ;;  %v497_v60 = vld [vmem:[%s13645_s1 + $0xe70] sm:$0xff] }
 0x348   :  { %7348 = vmatprep.mubr.bf16.mxu0 %v10323_v25  ;;  %7512 = vmatprep.mubr.bf16.mxu1 %v10323_v25  ;;  %v362_v25 = vld [vmem:[%s13645_s1 + $0xa38] sm:$0xff] }
 0x349   :  { %v8950_v40 = vcombine.high %v362_v25, %v370_v34  ;;  %v8949_v52 = vcombine.low %v362_v25, %v370_v34  ;;  %v458_v25 = vld [vmem:[%s13645_s1 + $0xd38] sm:$0xff] }
 0x34a   :  { %7319 = vmatpush1.bf16.msra.mxu0 %v8899_v19  ;;  %7483 = vmatpush1.bf16.msra.mxu1 %v8901_v20  ;;  %v8995_v19 = vcombine.low %v409_v6, %v417_v7  ;;  %v8997_v20 = vcombine.low %v410_v8, %v418_v9  ;;  %v466_v34 = vld [vmem:[%s13645_s1 + $0xd78] sm:$0xff]  ;;  %v505_v6 = vld [vmem:[%s13645_s1 + $0xeb0] sm:$0xff] }
 0x34b   :  { %7320 = vmatprep.subr.bf16.mxu0 %v8916_v21  ;;  %7484 = vmatprep.subr.bf16.mxu1 %v8918_v22  ;;  %v9012_v21 = vcombine.high %v425_v13, %v433_v14  ;;  %v9014_v22 = vcombine.high %v426_v15, %v434_v18  ;;  %v490_v61 = vld [vmem:[%s13645_s1 + $0xe38] sm:$0xff]  ;;  %v513_v7 = vld [vmem:[%s13645_s1 + $0xef0] sm:$0xff] }
 0x34c   :  { %v498_v63 = vld [vmem:[%s13645_s1 + $0xe78] sm:$0xff] }
 0x34d   :  { %v506_v8 = vld [vmem:[%s13645_s1 + $0xeb8] sm:$0xff] }
 0x34e   :  { %7321 = vmatpush1.bf16.msra.mxu0 %v8915_v26  ;;  %7485 = vmatpush1.bf16.msra.mxu1 %v8917_v27  ;;  %v9011_v26 = vcombine.low %v425_v13, %v433_v14  ;;  %v9013_v27 = vcombine.low %v426_v15, %v434_v18  ;;  %v514_v9 = vld [vmem:[%s13645_s1 + $0xef8] sm:$0xff]  ;;  %v521_v13 = vld [vmem:[%s13645_s1 + $0xf30] sm:$0xff] }
 0x34f   :  { %7322 = vmatprep.subr.bf16.mxu0 %v8932_v28  ;;  %7486 = vmatprep.subr.bf16.mxu1 %v8934_v31  ;;  %v9028_v28 = vcombine.high %v441_v23, %v449_v58  ;;  %v9030_v31 = vcombine.high %v442_v17, %v450_v24  ;;  %v529_v14 = vld [vmem:[%s13645_s1 + $0xf70] sm:$0xff]  ;;  %v522_v15 = vld [vmem:[%s13645_s1 + $0xf38] sm:$0xff] }
 0x350   :  { %v530_v18 = vld [vmem:[%s13645_s1 + $0xf78] sm:$0xff] }
 0x352   :  { %7323 = vmatpush1.bf16.msra.mxu0 %v8931_v36  ;;  %7487 = vmatpush1.bf16.msra.mxu1 %v8933_v37  ;;  %v9027_v36 = vcombine.low %v441_v23, %v449_v58  ;;  %v9029_v37 = vcombine.low %v442_v17, %v450_v24  ;;  %v537_v23 = vld [vmem:[%s13645_s1 + $0xfb0] sm:$0xff]  ;;  %v538_v17 = vld [vmem:[%s13645_s1 + $0xfb8] sm:$0xff] }
 0x353   :  { %7324 = vmatprep.subr.bf16.mxu0 %v8948_v39  ;;  %7488 = vmatprep.subr.bf16.mxu1 %v8950_v40  ;;  %v9044_v39 = vcombine.high %v457_v32, %v465_v33  ;;  %v9046_v40 = vcombine.high %v458_v25, %v466_v34  ;;  %v545_v58 = vld [vmem:[%s13645_s1 + $0xff0] sm:$0xff]  ;;  %v546_v24 = vld [vmem:[%s13645_s1 + $0xff8] sm:$0xff] }
 0x356   :  { %7325 = vmatpush1.bf16.msra.mxu0 %v8947_v54  ;;  %7489 = vmatpush1.bf16.msra.mxu1 %v8949_v52  ;;  %v9043_v54 = vcombine.low %v457_v32, %v465_v33  ;;  %v9045_v52 = vcombine.low %v458_v25, %v466_v34  ;;  %v553_v32 = vld [vmem:[%s13645_s1 + $0x1030] sm:$0xff]  ;;  %v554_v25 = vld [vmem:[%s13645_s1 + $0x1038] sm:$0xff] }
 0x357   :  { %7326 = vmatprep.subr.bf16.mxu0 %v8964_v62  ;;  %7490 = vmatprep.subr.bf16.mxu1 %v8966_v29  ;;  %v9060_v62 = vcombine.high %v473_v43, %v481_v45  ;;  %v9062_v29 = vcombine.high %v474_v48, %v482_v51  ;;  %v561_v33 = vld [vmem:[%s13645_s1 + $0x1070] sm:$0xff]  ;;  %v562_v34 = vld [vmem:[%s13645_s1 + $0x1078] sm:$0xff] }
 0x35a   :  { %7327 = vmatpush1.bf16.msra.mxu0 %v8963_v1  ;;  %7491 = vmatpush1.bf16.msra.mxu1 %v8965_v2  ;;  %v9059_v1 = vcombine.low %v473_v43, %v481_v45  ;;  %v9061_v2 = vcombine.low %v474_v48, %v482_v51  ;;  %v569_v43 = vld [vmem:[%s13645_s1 + $0x10b0] sm:$0xff]  ;;  %v570_v48 = vld [vmem:[%s13645_s1 + $0x10b8] sm:$0xff] }
 0x35b   :  { %7328 = vmatprep.subr.bf16.mxu0 %v8980_v3  ;;  %7492 = vmatprep.subr.bf16.mxu1 %v8982_v4  ;;  %v9076_v3 = vcombine.high %v489_v56, %v497_v60  ;;  %v9078_v4 = vcombine.high %v490_v61, %v498_v63  ;;  %v577_v45 = vld [vmem:[%s13645_s1 + $0x10f0] sm:$0xff]  ;;  %v578_v51 = vld [vmem:[%s13645_s1 + $0x10f8] sm:$0xff] }
 0x35e   :  { %7329 = vmatpush1.bf16.msra.mxu0 %v8979_v10  ;;  %7493 = vmatpush1.bf16.msra.mxu1 %v8981_v11  ;;  %v9075_v10 = vcombine.low %v489_v56, %v497_v60  ;;  %v9077_v11 = vcombine.low %v490_v61, %v498_v63  ;;  %v585_v56 = vld [vmem:[%s13645_s1 + $0x1130] sm:$0xff]  ;;  %v586_v61 = vld [vmem:[%s13645_s1 + $0x1138] sm:$0xff] }
 0x35f   :  { %7330 = vmatprep.subr.bf16.mxu0 %v8996_v46  ;;  %7494 = vmatprep.subr.bf16.mxu1 %v8998_v12  ;;  %v9092_v46 = vcombine.high %v505_v6, %v513_v7  ;;  %v9094_v12 = vcombine.high %v506_v8, %v514_v9  ;;  %v593_v60 = vld [vmem:[%s13645_s1 + $0x1170] sm:$0xff]  ;;  %v594_v63 = vld [vmem:[%s13645_s1 + $0x1178] sm:$0xff] }
 0x362   :  { %7331 = vmatpush1.bf16.msra.mxu0 %v8995_v19  ;;  %7495 = vmatpush1.bf16.msra.mxu1 %v8997_v20  ;;  %v9091_v19 = vcombine.low %v505_v6, %v513_v7  ;;  %v9093_v20 = vcombine.low %v506_v8, %v514_v9  ;;  %v9174_v6 = vcombine.high %v586_v61, %v594_v63  ;;  %v609_v7 = vld [vmem:[%s13645_s1 + $0x11f0] sm:$0xff]  ;;  %v610_v8 = vld [vmem:[%s13645_s1 + $0x11f8] sm:$0xff] }
 0x363   :  { %7332 = vmatprep.subr.bf16.mxu0 %v9012_v21  ;;  %7496 = vmatprep.subr.bf16.mxu1 %v9014_v22  ;;  %v9108_v21 = vcombine.high %v521_v13, %v529_v14  ;;  %v9110_v22 = vcombine.high %v522_v15, %v530_v18  ;;  %v9171_v9 = vcombine.low %v585_v56, %v593_v60 }
 0x366   :  { %7333 = vmatpush1.bf16.msra.mxu0 %v9011_v26  ;;  %7497 = vmatpush1.bf16.msra.mxu1 %v9013_v27  ;;  %v9107_v26 = vcombine.low %v521_v13, %v529_v14  ;;  %v9109_v27 = vcombine.low %v522_v15, %v530_v18  ;;  %v625_v13 = vld [vmem:[%s13645_s1 + $0x1270] sm:$0xff]  ;;  %v626_v14 = vld [vmem:[%s13645_s1 + $0x1278] sm:$0xff] }
 0x367   :  { %7334 = vmatprep.subr.bf16.mxu0 %v9028_v28  ;;  %7498 = vmatprep.subr.bf16.mxu1 %v9030_v31  ;;  %v9124_v28 = vcombine.high %v537_v23, %v545_v58  ;;  %v9126_v31 = vcombine.high %v538_v17, %v546_v24  ;;  %v633_v18 = vld [vmem:[%s13645_s1 + $0x12b0] sm:$0xff] }
 0x36a   :  { %7335 = vmatpush1.bf16.msra.mxu0 %v9027_v36  ;;  %7499 = vmatpush1.bf16.msra.mxu1 %v9029_v37  ;;  %v9123_v36 = vcombine.low %v537_v23, %v545_v58  ;;  %v9125_v37 = vcombine.low %v538_v17, %v546_v24  ;;  %v642_v58 = vld [vmem:[%s13645_s1 + $0x12f8] sm:$0xff]  ;;  %v649_v24 = vld [vmem:[%s13645_s1 + $0x1330] sm:$0xff] }
 0x36b   :  { %7336 = vmatprep.subr.bf16.mxu0 %v9044_v39  ;;  %7500 = vmatprep.subr.bf16.mxu1 %v9046_v40  ;;  %v9140_v39 = vcombine.high %v553_v32, %v561_v33  ;;  %v9142_v40 = vcombine.high %v554_v25, %v562_v34 }
 0x36e   :  { %7337 = vmatpush1.bf16.msra.mxu0 %v9043_v54  ;;  %7501 = vmatpush1.bf16.msra.mxu1 %v9045_v52  ;;  %v9139_v54 = vcombine.low %v553_v32, %v561_v33  ;;  %v9141_v52 = vcombine.low %v554_v25, %v562_v34  ;;  %v658_v32 = vld [vmem:[%s13645_s1 + $0x1378] sm:$0xff]  ;;  %v665_v34 = vld [vmem:[%s13645_s1 + $0x13b0] sm:$0xff] }
 0x36f   :  { %7338 = vmatprep.subr.bf16.mxu0 %v9060_v62  ;;  %7502 = vmatprep.subr.bf16.mxu1 %v9062_v29  ;;  %v9156_v62 = vcombine.high %v569_v43, %v577_v45  ;;  %v9158_v29 = vcombine.high %v570_v48, %v578_v51 }
 0x372   :  { %7339 = vmatpush1.bf16.msra.mxu0 %v9059_v1  ;;  %7503 = vmatpush1.bf16.msra.mxu1 %v9061_v2  ;;  %v9155_v1 = vcombine.low %v569_v43, %v577_v45  ;;  %v9157_v2 = vcombine.low %v570_v48, %v578_v51  ;;  %v674_v43 = vld [vmem:[%s13645_s1 + $0x13f8] sm:$0xff] }
 0x373   :  { %7340 = vmatprep.subr.bf16.mxu0 %v9076_v3  ;;  %7504 = vmatprep.subr.bf16.mxu1 %v9078_v4  ;;  %v9172_v3 = vcombine.high %v585_v56, %v593_v60  ;;  %v601_v4 = vld [vmem:[%s13645_s1 + $0x11b0] sm:$0xff]  ;;  %v682_v56 = vld [vmem:[%s13645_s1 + $0x1438] sm:$0xff] }
 0x374   :  { %v9187_v15 = vcombine.low %v601_v4, %v609_v7  ;;  %v690_v60 = vld [vmem:[%s13645_s1 + $0x1478] sm:$0xff] }
 0x376   :  { %7341 = vmatpush1.bf16.msra.mxu0 %v9075_v10  ;;  %7505 = vmatpush1.bf16.msra.mxu1 %v9077_v11  ;;  %v9173_v10 = vcombine.low %v586_v61, %v594_v63  ;;  %v9188_v11 = vcombine.high %v601_v4, %v609_v7  ;;  %v705_v4 = vld [vmem:[%s13645_s1 + $0x14f0] sm:$0xff]  ;;  %v706_v7 = vld [vmem:[%s13645_s1 + $0x14f8] sm:$0xff] }
 0x377   :  { %7342 = vmatprep.subr.bf16.mxu0 %v9092_v46  ;;  %7506 = vmatprep.subr.bf16.mxu1 %v9094_v12  ;;  %v617_v46 = vld [vmem:[%s13645_s1 + $0x1230] sm:$0xff] }
 0x378   :  { %v9203_v17 = vcombine.low %v617_v46, %v625_v13 }
 0x37a   :  { %7343 = vmatpush1.bf16.msra.mxu0 %v9091_v19  ;;  %7507 = vmatpush1.bf16.msra.mxu1 %v9093_v20  ;;  %v641_v19 = vld [vmem:[%s13645_s1 + $0x12f0] sm:$0xff] }
 0x37b   :  { %7344 = vmatprep.subr.bf16.mxu0 %v9108_v21  ;;  %7508 = vmatprep.subr.bf16.mxu1 %v9110_v22  ;;  %v9204_v21 = vcombine.high %v617_v46, %v625_v13  ;;  %v634_v22 = vld [vmem:[%s13645_s1 + $0x12b8] sm:$0xff]  ;;  %v9219_v25 = vcombine.low %v633_v18, %v641_v19  ;;  %v721_v46 = vld [vmem:[%s13645_s1 + $0x1570] sm:$0xff] }
 0x37c   :  { %v9222_v33 = vcombine.high %v634_v22, %v642_v58  ;;  %v722_v13 = vld [vmem:[%s13645_s1 + $0x1578] sm:$0xff] }
 0x37e   :  { %7345 = vmatpush1.bf16.msra.mxu0 %v9107_v26  ;;  %7509 = vmatpush1.bf16.msra.mxu1 %v9109_v27  ;;  %v657_v26 = vld [vmem:[%s13645_s1 + $0x1370] sm:$0xff] }
 0x37f   :  { %7346 = vmatprep.subr.bf16.mxu0 %v9124_v28  ;;  %7510 = vmatprep.subr.bf16.mxu1 %v9126_v31  ;;  %v9220_v28 = vcombine.high %v633_v18, %v641_v19  ;;  %v650_v31 = vld [vmem:[%s13645_s1 + $0x1338] sm:$0xff]  ;;  %v9235_v48 = vcombine.low %v649_v24, %v657_v26  ;;  %v729_v19 = vld [vmem:[%s13645_s1 + $0x15b0] sm:$0xff] }
 0x380   :  { %v9238_v45 = vcombine.high %v650_v31, %v658_v32  ;;  %v9237_v51 = vcombine.low %v650_v31, %v658_v32  ;;  %v754_v31 = vld [vmem:[%s13645_s1 + $0x1678] sm:$0xff] }
 0x382   :  { %7347 = vmatpush1.bf16.msra.mxu0 %v9123_v36  ;;  %7511 = vmatpush1.bf16.msra.mxu1 %v9125_v37  ;;  %v673_v36 = vld [vmem:[%s13645_s1 + $0x13f0] sm:$0xff]  ;;  %v9221_v37 = vcombine.low %v634_v22, %v642_v58  ;;  %v738_v22 = vld [vmem:[%s13645_s1 + $0x15f8] sm:$0xff] }
 0x383   :  { %7357 = vmatprep.subr.bf16.mxu0 %v9140_v39  ;;  %7521 = vmatprep.subr.bf16.mxu1 %v9142_v40  ;;  %v9236_v39 = vcombine.high %v649_v24, %v657_v26  ;;  %v666_v40 = vld [vmem:[%s13645_s1 + $0x13b8] sm:$0xff]  ;;  %v9251_v61 = vcombine.low %v665_v34, %v673_v36  ;;  %v745_v26 = vld [vmem:[%s13645_s1 + $0x1630] sm:$0xff] }
 0x384   :  { %v9253_v63 = vcombine.low %v666_v40, %v674_v43 }
 0x385   :  { %7349 = vmatmul.mubr.bf16.vlgmr.msra.gmra.mrb[12].mxu0 %v10517_v30  ;;  %7513 = vmatmul.mubr.bf16.vlgmr.msra.gmra.mrb[12].mxu1 %v10517_v30  ;;  %v602_v30 = vld [vmem:[%s13645_s1 + $0x11b8] sm:$0xff] }
 0x386   :  { %7358 = vmatpush1.bf16.msra.mxu0 %v9139_v54  ;;  %7522 = vmatpush1.bf16.msra.mxu1 %v9141_v52  ;;  %v9190_v12 = vcombine.high %v602_v30, %v610_v8  ;;  %v9189_v20 = vcombine.low %v602_v30, %v610_v8  ;;  %v9252_v54 = vcombine.high %v665_v34, %v673_v36  ;;  %v761_v36 = vld [vmem:[%s13645_s1 + $0x16b0] sm:$0xff] }
 0x387   :  { %7359 = vmatprep.subr.bf16.mxu0 %v9156_v62  ;;  %7523 = vmatprep.subr.bf16.mxu1 %v9158_v29  ;;  %v9254_v52 = vcombine.high %v666_v40, %v674_v43  ;;  %v681_v62 = vld [vmem:[%s13645_s1 + $0x1430] sm:$0xff]  ;;  %v9269_v8 = vcombine.low %v682_v56, %v690_v60  ;;  %v770_v40 = vld [vmem:[%s13645_s1 + $0x16f8] sm:$0xff] }
 0x388   :  { %7389 = vmatprep.mubr.bf16.mxu0 %v10533_v38  ;;  %7553 = vmatprep.mubr.bf16.mxu1 %v10533_v38  ;;  %v618_v38 = vld [vmem:[%s13645_s1 + $0x1238] sm:$0xff]  ;;  %v689_v29 = vld [vmem:[%s13645_s1 + $0x1470] sm:$0xff] }
 0x389   :  { %v9206_v23 = vcombine.high %v618_v38, %v626_v14  ;;  %v9205_v27 = vcombine.low %v618_v38, %v626_v14  ;;  %v9267_v30 = vcombine.low %v681_v62, %v689_v29 }
 0x38a   :  { %7360 = vmatpush1.bf16.msra.mxu0 %v9155_v1  ;;  %7524 = vmatpush1.bf16.msra.mxu1 %v9157_v2  ;;  %v9268_v1 = vcombine.high %v681_v62, %v689_v29  ;;  %v9270_v2 = vcombine.high %v682_v56, %v690_v60  ;;  %v778_v62 = vld [vmem:[%s13645_s1 + $0x1738] sm:$0xff] }
 0x38b   :  { %7361 = vmatprep.subr.bf16.mxu0 %v9172_v3  ;;  %7525 = vmatprep.subr.bf16.mxu1 %v9174_v6  ;;  %v697_v3 = vld [vmem:[%s13645_s1 + $0x14b0] sm:$0xff]  ;;  %v698_v6 = vld [vmem:[%s13645_s1 + $0x14b8] sm:$0xff] }
 0x38c   :  { %v9283_v38 = vcombine.low %v697_v3, %v705_v4  ;;  %v9285_v14 = vcombine.low %v698_v6, %v706_v7  ;;  %v786_v29 = vld [vmem:[%s13645_s1 + $0x1778] sm:$0xff] }
 0x38e   :  { %7362 = vmatpush1.bf16.msra.mxu0 %v9171_v9  ;;  %7526 = vmatpush1.bf16.msra.mxu1 %v9173_v10  ;;  %v9284_v9 = vcombine.high %v697_v3, %v705_v4  ;;  %v9286_v10 = vcombine.high %v698_v6, %v706_v7  ;;  %v794_v3 = vld [vmem:[%s13645_s1 + $0x17b8] sm:$0xff]  ;;  %v9365_v7 = vcombine.low %v778_v62, %v786_v29 }
 0x38f   :  { %7363 = vmatprep.subr.bf16.mxu0 %v9188_v11  ;;  %7527 = vmatprep.subr.bf16.mxu1 %v9190_v12  ;;  %v713_v11 = vld [vmem:[%s13645_s1 + $0x1530] sm:$0xff]  ;;  %v714_v12 = vld [vmem:[%s13645_s1 + $0x1538] sm:$0xff] }
 0x390   :  { %v9302_v18 = vcombine.high %v714_v12, %v722_v13  ;;  %v9301_v58 = vcombine.low %v714_v12, %v722_v13  ;;  %v802_v4 = vld [vmem:[%s13645_s1 + $0x17f8] sm:$0xff] }
 0x391   :  { %v9381_v13 = vcombine.low %v794_v3, %v802_v4 }
 0x392   :  { %7364 = vmatpush1.bf16.msra.mxu0 %v9187_v15  ;;  %7528 = vmatpush1.bf16.msra.mxu1 %v9189_v20  ;;  %v9300_v15 = vcombine.high %v713_v11, %v721_v46  ;;  %v737_v20 = vld [vmem:[%s13645_s1 + $0x15f0] sm:$0xff] }
 0x393   :  { %7365 = vmatprep.subr.bf16.mxu0 %v9204_v21  ;;  %7529 = vmatprep.subr.bf16.mxu1 %v9206_v23  ;;  %v730_v21 = vld [vmem:[%s13645_s1 + $0x15b8] sm:$0xff]  ;;  %v9299_v23 = vcombine.low %v713_v11, %v721_v46  ;;  %v9315_v32 = vcombine.low %v729_v19, %v737_v20 }
 0x394   :  { %v9318_v24 = vcombine.high %v730_v21, %v738_v22  ;;  %v810_v11 = vld [vmem:[%s13645_s1 + $0x1838] sm:$0xff] }
 0x395   :  { %v818_v46 = vld [vmem:[%s13645_s1 + $0x1878] sm:$0xff] }
 0x396   :  { %7366 = vmatpush1.bf16.msra.mxu0 %v9203_v17  ;;  %7530 = vmatpush1.bf16.msra.mxu1 %v9205_v27  ;;  %v9316_v17 = vcombine.high %v729_v19, %v737_v20  ;;  %v753_v27 = vld [vmem:[%s13645_s1 + $0x1670] sm:$0xff]  ;;  %v826_v19 = vld [vmem:[%s13645_s1 + $0x18b8] sm:$0xff] }
 0x397   :  { %7367 = vmatprep.subr.bf16.mxu0 %v9220_v28  ;;  %7531 = vmatprep.subr.bf16.mxu1 %v9222_v33  ;;  %v746_v28 = vld [vmem:[%s13645_s1 + $0x1638] sm:$0xff]  ;;  %v9317_v33 = vcombine.low %v730_v21, %v738_v22  ;;  %v9331_v43 = vcombine.low %v745_v26, %v753_v27  ;;  %v9397_v22 = vcombine.low %v810_v11, %v818_v46 }
 0x398   :  { %v9334_v34 = vcombine.high %v746_v28, %v754_v31  ;;  %v834_v20 = vld [vmem:[%s13645_s1 + $0x18f8] sm:$0xff] }
 0x39a   :  { %7368 = vmatpush1.bf16.msra.mxu0 %v9219_v25  ;;  %7532 = vmatpush1.bf16.msra.mxu1 %v9221_v37  ;;  %v9332_v25 = vcombine.high %v745_v26, %v753_v27  ;;  %v769_v37 = vld [vmem:[%s13645_s1 + $0x16f0] sm:$0xff]  ;;  %v842_v26 = vld [vmem:[%s13645_s1 + $0x1938] sm:$0xff] }
 0x39b   :  { %7369 = vmatprep.subr.bf16.mxu0 %v9236_v39  ;;  %7533 = vmatprep.subr.bf16.mxu1 %v9238_v45  ;;  %v762_v39 = vld [vmem:[%s13645_s1 + $0x16b8] sm:$0xff]  ;;  %v9333_v45 = vcombine.low %v746_v28, %v754_v31  ;;  %v9347_v56 = vcombine.low %v761_v36, %v769_v37  ;;  %v9413_v31 = vcombine.low %v826_v19, %v834_v20 }
 0x39c   :  { %v9349_v60 = vcombine.low %v762_v39, %v770_v40  ;;  %v850_v27 = vld [vmem:[%s13645_s1 + $0x1978] sm:$0xff] }
 0x39e   :  { %7370 = vmatpush1.bf16.msra.mxu0 %v9235_v48  ;;  %7534 = vmatpush1.bf16.msra.mxu1 %v9237_v51  ;;  %v9348_v48 = vcombine.high %v761_v36, %v769_v37  ;;  %v9350_v51 = vcombine.high %v762_v39, %v770_v40  ;;  %v866_v36 = vld [vmem:[%s13645_s1 + $0x19f8] sm:$0xff]  ;;  %v9429_v39 = vcombine.low %v842_v26, %v850_v27 }
 0x39f   :  { %7371 = vmatprep.subr.bf16.mxu0 %v9252_v54  ;;  %7535 = vmatprep.subr.bf16.mxu1 %v9254_v52  ;;  %v777_v54 = vld [vmem:[%s13645_s1 + $0x1730] sm:$0xff] }
 0x3a0   :  { %v785_v52 = vld [vmem:[%s13645_s1 + $0x1770] sm:$0xff] }
 0x3a1   :  { %v9363_v6 = vcombine.low %v777_v54, %v785_v52 }
 0x3a2   :  { %7372 = vmatpush1.bf16.msra.mxu0 %v9251_v61  ;;  %7536 = vmatpush1.bf16.msra.mxu1 %v9253_v63  ;;  %v9364_v61 = vcombine.high %v777_v54, %v785_v52  ;;  %v9366_v63 = vcombine.high %v778_v62, %v786_v29 }
 0x3a3   :  { %7373 = vmatprep.subr.bf16.mxu0 %v9268_v1  ;;  %7537 = vmatprep.subr.bf16.mxu1 %v9270_v2  ;;  %v793_v1 = vld [vmem:[%s13645_s1 + $0x17b0] sm:$0xff] }
 0x3a4   :  { %v801_v2 = vld [vmem:[%s13645_s1 + $0x17f0] sm:$0xff] }
 0x3a5   :  { %v9379_v12 = vcombine.low %v793_v1, %v801_v2 }
 0x3a6   :  { %7374 = vmatpush1.bf16.msra.mxu0 %v9267_v30  ;;  %7538 = vmatpush1.bf16.msra.mxu1 %v9269_v8  ;;  %v9380_v30 = vcombine.high %v793_v1, %v801_v2  ;;  %v9382_v8 = vcombine.high %v794_v3, %v802_v4  ;;  %v13193_v2 = vld [vmem:[%s13647_s2 + $0x8] sm:$0xff] }
 0x3a7   :  { %7375 = vmatprep.subr.bf16.mxu0 %v9284_v9  ;;  %7539 = vmatprep.subr.bf16.mxu1 %v9286_v10  ;;  %v809_v9 = vld [vmem:[%s13645_s1 + $0x1830] sm:$0xff] }
 0x3a8   :  { %v817_v10 = vld [vmem:[%s13645_s1 + $0x1870] sm:$0xff] }
 0x3a9   :  { %v9395_v21 = vcombine.low %v809_v9, %v817_v10 }
 0x3aa   :  { %7376 = vmatpush1.bf16.msra.mxu0 %v9283_v38  ;;  %7540 = vmatpush1.bf16.msra.mxu1 %v9285_v14  ;;  %v9396_v38 = vcombine.high %v809_v9, %v817_v10  ;;  %v9398_v14 = vcombine.high %v810_v11, %v818_v46  ;;  %v906_v9 = vld [vmem:[%s13645_s1 + $0x1b38] sm:$0xff]  ;;  %v1102_v11 = vrot.slane %v13193_v2, %v11591_v50 }
 0x3ab   :  { %7377 = vmatprep.subr.bf16.mxu0 %v9300_v15  ;;  %7541 = vmatprep.subr.bf16.mxu1 %v9302_v18  ;;  %v825_v15 = vld [vmem:[%s13645_s1 + $0x18b0] sm:$0xff]  ;;  %v914_v10 = vld [vmem:[%s13645_s1 + $0x1b78] sm:$0xff] }
 0x3ac   :  { %v833_v18 = vld [vmem:[%s13645_s1 + $0x18f0] sm:$0xff] }
 0x3ad   :  { %v9411_v28 = vcombine.low %v825_v15, %v833_v18 }
 0x3ae   :  { %7378 = vmatpush1.bf16.msra.mxu0 %v9299_v23  ;;  %7542 = vmatpush1.bf16.msra.mxu1 %v9301_v58  ;;  %v9412_v23 = vcombine.high %v825_v15, %v833_v18  ;;  %v9414_v58 = vcombine.high %v826_v19, %v834_v20  ;;  %v9494_v15 = vcombine.high %v906_v9, %v914_v10  ;;  %v921_v18 = vld [vmem:[%s13645_s1 + $0x1bb0] sm:$0xff] }
 0x3af   :  { %7379 = vmatprep.subr.bf16.mxu0 %v9316_v17  ;;  %7543 = vmatprep.subr.bf16.mxu1 %v9318_v24  ;;  %v841_v17 = vld [vmem:[%s13645_s1 + $0x1930] sm:$0xff] }
 0x3b0   :  { %v849_v24 = vld [vmem:[%s13645_s1 + $0x1970] sm:$0xff] }
 0x3b1   :  { %v9427_v37 = vcombine.low %v841_v17, %v849_v24  ;;  %v929_v19 = vld [vmem:[%s13645_s1 + $0x1bf0] sm:$0xff] }
 0x3b2   :  { %7380 = vmatpush1.bf16.msra.mxu0 %v9315_v32  ;;  %7544 = vmatpush1.bf16.msra.mxu1 %v9317_v33  ;;  %v9428_v32 = vcombine.high %v841_v17, %v849_v24  ;;  %v9430_v33 = vcombine.high %v842_v26, %v850_v27  ;;  %v930_v17 = vld [vmem:[%s13645_s1 + $0x1bf8] sm:$0xff] }
 0x3b3   :  { %7381 = vmatprep.subr.bf16.mxu0 %v9332_v25  ;;  %7545 = vmatprep.subr.bf16.mxu1 %v9334_v34  ;;  %v857_v25 = vld [vmem:[%s13645_s1 + $0x19b0] sm:$0xff] }
 0x3b4   :  { %v865_v34 = vld [vmem:[%s13645_s1 + $0x19f0] sm:$0xff] }
 0x3b5   :  { %v9444_v40 = vcombine.high %v857_v25, %v865_v34  ;;  %v9443_v54 = vcombine.low %v857_v25, %v865_v34  ;;  %v9493_v34 = vcombine.low %v906_v9, %v914_v10  ;;  %v969_v10 = vld [vmem:[%s13645_s1 + $0x1d30] sm:$0xff] }
 0x3b6   :  { %7382 = vmatpush1.bf16.msra.mxu0 %v9331_v43  ;;  %7546 = vmatpush1.bf16.msra.mxu1 %v9333_v45  ;;  %v873_v45 = vld [vmem:[%s13645_s1 + $0x1a30] sm:$0xff] }
 0x3b7   :  { %7383 = vmatprep.subr.bf16.mxu0 %v9348_v48  ;;  %7547 = vmatprep.subr.bf16.mxu1 %v9350_v51  ;;  %v881_v48 = vld [vmem:[%s13645_s1 + $0x1a70] sm:$0xff]  ;;  %v882_v51 = vld [vmem:[%s13645_s1 + $0x1a78] sm:$0xff] }
 0x3b8   :  { %v9460_v62 = vcombine.high %v873_v45, %v881_v48  ;;  %v9459_v1 = vcombine.low %v873_v45, %v881_v48 }
 0x3ba   :  { %7384 = vmatpush1.bf16.msra.mxu0 %v9347_v56  ;;  %7548 = vmatpush1.bf16.msra.mxu1 %v9349_v60  ;;  %v889_v56 = vld [vmem:[%s13645_s1 + $0x1ab0] sm:$0xff] }
 0x3bb   :  { %7385 = vmatprep.subr.bf16.mxu0 %v9364_v61  ;;  %7549 = vmatprep.subr.bf16.mxu1 %v9366_v63  ;;  %v897_v60 = vld [vmem:[%s13645_s1 + $0x1af0] sm:$0xff]  ;;  %v890_v61 = vld [vmem:[%s13645_s1 + $0x1ab8] sm:$0xff] }
 0x3bc   :  { %v898_v63 = vld [vmem:[%s13645_s1 + $0x1af8] sm:$0xff]  ;;  %v9476_v4 = vcombine.high %v889_v56, %v897_v60  ;;  %v9475_v46 = vcombine.low %v889_v56, %v897_v60 }
 0x3be   :  { %7386 = vmatpush1.bf16.msra.mxu0 %v9363_v6  ;;  %7550 = vmatpush1.bf16.msra.mxu1 %v9365_v7  ;;  %v9478_v6 = vcombine.high %v890_v61, %v898_v63  ;;  %v905_v7 = vld [vmem:[%s13645_s1 + $0x1b30] sm:$0xff] }
 0x3bf   :  { %7387 = vmatprep.subr.bf16.mxu0 %v9380_v30  ;;  %7551 = vmatprep.subr.bf16.mxu1 %v9382_v8  ;;  %v913_v30 = vld [vmem:[%s13645_s1 + $0x1b70] sm:$0xff]  ;;  %v1098_v8 = vrot.slane %v13193_v2, %v11576_v42 }
 0x3c2   :  { %7388 = vmatpush1.bf16.msra.mxu0 %v9379_v12  ;;  %7552 = vmatpush1.bf16.msra.mxu1 %v9381_v13  ;;  %v1106_v12 = vrot.slane %v13193_v2, %v11588_v49  ;;  %v9477_v13 = vcombine.low %v890_v61, %v898_v63  ;;  %v961_v61 = vld [vmem:[%s13645_s1 + $0x1cf0] sm:$0xff] }
 0x3c3   :  { %7398 = vmatprep.subr.bf16.mxu0 %v9396_v38  ;;  %7562 = vmatprep.subr.bf16.mxu1 %v9398_v14  ;;  %v9492_v38 = vcombine.high %v905_v7, %v913_v30 }
 0x3c5   :  { %7390 = vmatmul.mubr.bf16.vlgmr.msra.gmra.mrb[12].mxu0 %v10727_v47  ;;  %7554 = vmatmul.mubr.bf16.vlgmr.msra.gmra.mrb[12].mxu1 %v10727_v47  ;;  %v858_v47 = vld [vmem:[%s13645_s1 + $0x19b8] sm:$0xff] }
 0x3c6   :  { %7399 = vmatpush1.bf16.msra.mxu0 %v9395_v21  ;;  %7563 = vmatpush1.bf16.msra.mxu1 %v9397_v22  ;;  %v9446_v43 = vcombine.high %v858_v47, %v866_v36  ;;  %v9445_v52 = vcombine.low %v858_v47, %v866_v36  ;;  %v9508_v47 = vcombine.high %v921_v18, %v929_v19 }
 0x3c7   :  { %7400 = vmatprep.subr.bf16.mxu0 %v9412_v23  ;;  %7564 = vmatprep.subr.bf16.mxu1 %v9414_v58  ;;  %v1110_v23 = vrot.slane %v13193_v2, %v11594_v53  ;;  %v922_v58 = vld [vmem:[%s13645_s1 + $0x1bb8] sm:$0xff] }
 0x3c8   :  { %7430 = vmatprep.mubr.bf16.mxu0 %v10743_v55  ;;  %7594 = vmatprep.mubr.bf16.mxu1 %v10743_v55  ;;  %v874_v55 = vld [vmem:[%s13645_s1 + $0x1a38] sm:$0xff] }
 0x3c9   :  { %v9462_v29 = vcombine.high %v874_v55, %v882_v51  ;;  %v9461_v3 = vcombine.low %v874_v55, %v882_v51  ;;  %v938_v55 = vld [vmem:[%s13645_s1 + $0x1c38] sm:$0xff] }
 0x3ca   :  { %7401 = vmatpush1.bf16.msra.mxu0 %v9411_v28  ;;  %7565 = vmatpush1.bf16.msra.mxu1 %v9413_v31  ;;  %v9491_v28 = vcombine.low %v905_v7, %v913_v30  ;;  %v946_v51 = vld [vmem:[%s13645_s1 + $0x1c78] sm:$0xff] }
 0x3cb   :  { %7402 = vmatprep.subr.bf16.mxu0 %v9428_v32  ;;  %7566 = vmatprep.subr.bf16.mxu1 %v9430_v33  ;;  %v9526_v60 = vcombine.high %v938_v55, %v946_v51  ;;  %v9525_v30 = vcombine.low %v938_v55, %v946_v51  ;;  %v1041_v55 = vld [vmem:[%s13645_s1 + $0x1f70] sm:$0xff]  ;;  %v1034_v51 = vld [vmem:[%s13645_s1 + $0x1f38] sm:$0xff] }
 0x3ce   :  { %7403 = vmatpush1.bf16.msra.mxu0 %v9427_v37  ;;  %7567 = vmatpush1.bf16.msra.mxu1 %v9429_v39  ;;  %v9510_v39 = vcombine.high %v922_v58, %v930_v17 }
 0x3cf   :  { %7404 = vmatprep.subr.bf16.mxu0 %v9444_v40  ;;  %7568 = vmatprep.subr.bf16.mxu1 %v9446_v43  ;;  %v937_v40 = vld [vmem:[%s13645_s1 + $0x1c30] sm:$0xff] }
 0x3d0   :  { %v945_v43 = vld [vmem:[%s13645_s1 + $0x1c70] sm:$0xff] }
 0x3d1   :  { %v9524_v56 = vcombine.high %v937_v40, %v945_v43 }
 0x3d2   :  { %7405 = vmatpush1.bf16.msra.mxu0 %v9443_v54  ;;  %7569 = vmatpush1.bf16.msra.mxu1 %v9445_v52  ;;  %v9507_v54 = vcombine.low %v921_v18, %v929_v19  ;;  %v985_v18 = vld [vmem:[%s13645_s1 + $0x1db0] sm:$0xff] }
 0x3d3   :  { %7406 = vmatprep.subr.bf16.mxu0 %v9460_v62  ;;  %7570 = vmatprep.subr.bf16.mxu1 %v9462_v29  ;;  %v9509_v29 = vcombine.low %v922_v58, %v930_v17  ;;  %v993_v19 = vld [vmem:[%s13645_s1 + $0x1df0] sm:$0xff] }
 0x3d4   :  { %v9572_v58 = vcombine.high %v985_v18, %v993_v19 }
 0x3d6   :  { %7407 = vmatpush1.bf16.msra.mxu0 %v9459_v1  ;;  %7571 = vmatpush1.bf16.msra.mxu1 %v9461_v3  ;;  %v954_v3 = vld [vmem:[%s13645_s1 + $0x1cb8] sm:$0xff] }
 0x3d7   :  { %7408 = vmatprep.subr.bf16.mxu0 %v9476_v4  ;;  %7572 = vmatprep.subr.bf16.mxu1 %v9478_v6  ;;  %v962_v4 = vld [vmem:[%s13645_s1 + $0x1cf8] sm:$0xff]  ;;  %v9523_v6 = vcombine.low %v937_v40, %v945_v43 }
 0x3d8   :  { %v7104_v14 = vpop.f32.mrb[8].mxu0  ;;  %v7268_v21 = vpop.f32.mrb[8].mxu1  ;;  %v9542_v9 = vcombine.high %v954_v3, %v962_v4 }
 0x3d9   :  { %v9810_v20 = vadd.f32 %v7104_v14, %v1098_v8  ;;  %v7106_v22 = vpop.f32.mrb[9].mxu0  ;;  %v7270_v26 = vpop.f32.mrb[9].mxu1  ;;  %v9812_v32 = vadd.f32 %v7268_v21, %v1106_v12  ;;  %v978_v12 = vld [vmem:[%s13645_s1 + $0x1d78] sm:$0xff] }
 0x3da   :  { %v9811_v24 = vadd.f32 %v7106_v22, %v1102_v11  ;;  %v7108_v27 = vpop.f32.mrb[10].mxu0  ;;  %7409 = vmatpush1.bf16.msra.mxu0 %v9475_v46  ;;  %v7272_v33 = vpop.f32.mrb[10].mxu1  ;;  %7573 = vmatpush1.bf16.msra.mxu1 %v9477_v13  ;;  %v9813_v48 = vadd.f32 %v7270_v26, %v1110_v23  ;;  %v977_v11 = vld [vmem:[%s13645_s1 + $0x1d70] sm:$0xff]  ;;  %v970_v46 = vld [vmem:[%s13645_s1 + $0x1d38] sm:$0xff] }
 0x3db   :  { %v7611_v31 = vmax.f32 %v9810_v20, 0.0  ;;  %v7109_v25 = vpop.f32.mrb[11].mxu0  ;;  %7410 = vmatprep.subr.bf16.mxu0 %v9492_v38  ;;  %v7273_v37 = vpop.f32.mrb[11].mxu1  ;;  %7574 = vmatprep.subr.bf16.mxu1 %v9494_v15  ;;  %v7613_v52 = vmax.f32 %v9812_v32, 0.0  ;;  %v9541_v38 = vcombine.low %v954_v3, %v962_v4  ;;  %v9556_v14 = vcombine.high %v969_v10, %v977_v11  ;;  %v986_v20 = vld [vmem:[%s13645_s1 + $0x1db8] sm:$0xff]  ;;  %v1009_v26 = vld [vmem:[%s13645_s1 + $0x1e70] sm:$0xff] }
 0x3dc   :  { %v7612_v36 = vmax.f32 %v9811_v24, 0.0  ;;  %v7614_v63 = vmax.f32 %v9813_v48, 0.0  ;;  %v9558_v15 = vcombine.high %v970_v46, %v978_v12  ;;  %v994_v21 = vld [vmem:[%s13645_s1 + $0x1df8] sm:$0xff]  ;;  %v9555_v22 = vcombine.low %v969_v10, %v977_v11  ;;  %v1001_v24 = vld [vmem:[%s13645_s1 + $0x1e30] sm:$0xff]  ;;  %v9920_v10 = vld [vmem:[%s13648_s3 + $0xc] ss:$24 sps:$4 sm:$0xff]  }
 0x3dd   :  { %v7626_v45 = vadd.f32 %v12452_v0, %v7611_v31  ;;  %v953_v0 = vld [vmem:[%s13645_s1 + $0x1cb0] sm:$0xff]  ;;  %v9557_v23 = vcombine.low %v970_v46, %v978_v12  ;;  %v9574_v17 = vcombine.high %v986_v20, %v994_v21  ;;  %v1002_v27 = vld [vmem:[%s13645_s1 + $0x1e38] sm:$0xff]  ;;  %v9571_v31 = vcombine.low %v985_v18, %v993_v19  ;;  %v9918_v46 = vld [vmem:[%s13648_s3 + $0x8] ss:$24 sps:$4 sm:$0xff]  }
 0x3de   :  { %7411 = vmatpush1.bf16.msra.mxu0 %v9491_v28  ;;  %7575 = vmatpush1.bf16.msra.mxu1 %v9493_v34  ;;  %v9540_v8 = vcombine.high %v953_v0, %v961_v61  ;;  %v9539_v13 = vcombine.low %v953_v0, %v961_v61  ;;  %v1010_v28 = vld [vmem:[%s13645_s1 + $0x1e78] sm:$0xff]  ;;  %v9573_v32 = vcombine.low %v986_v20, %v994_v21  ;;  %v1017_v34 = vld [vmem:[%s13645_s1 + $0x1eb0] sm:$0xff]  ;;  %v9930_v19 = vld [vmem:[%s13648_s3 + $0x68] ss:$24 sps:$4 sm:$0xff]  }
 0x3df   :  { %v7627_v62 = vadd.f32 %v7626_v45, %v7612_v36  ;;  %7412 = vmatprep.subr.bf16.mxu0 %v9508_v47  ;;  %7576 = vmatprep.subr.bf16.mxu1 %v9510_v39  ;;  %v9588_v33 = vcombine.high %v1001_v24, %v1009_v26  ;;  %v9590_v25 = vcombine.high %v1002_v27, %v1010_v28  ;;  %v1025_v47 = vld [vmem:[%s13645_s1 + $0x1ef0] sm:$0xff]  ;;  %v1018_v36 = vld [vmem:[%s13645_s1 + $0x1eb8] sm:$0xff] }
 0x3e0   :  { %v1026_v37 = vld [vmem:[%s13645_s1 + $0x1ef8] sm:$0xff]  ;;  %v9587_v39 = vcombine.low %v1001_v24, %v1009_v26  ;;  %v9589_v40 = vcombine.low %v1002_v27, %v1010_v28  ;;  %v9604_v43 = vcombine.high %v1017_v34, %v1025_v47  ;;  %v1033_v48 = vld [vmem:[%s13645_s1 + $0x1f30] sm:$0xff]  ;;  %v9944_v24 = vld [vmem:[%s13648_s3 + $0xcc] ss:$24 sps:$4 sm:$0xff]  }
 0x3e1   :  { %v7628_v1 = vadd.f32 %v7627_v62, %v7613_v52  ;;  %v9606_v45 = vcombine.high %v1018_v36, %v1026_v37  ;;  %v9603_v52 = vcombine.low %v1017_v34, %v1025_v47  ;;  %v9605_v62 = vcombine.low %v1018_v36, %v1026_v37  ;;  %v1057_v0 = vld [vmem:[%s13645_s1 + $0x1ff0] sm:$0xff]  ;;  %v1050_v61 = vld [vmem:[%s13645_s1 + $0x1fb8] sm:$0xff]  ;;  %v9942_v26 = vld [vmem:[%s13648_s3 + $0xc8] ss:$24 sps:$4 sm:$0xff]  }
 0x3e2   :  { %7413 = vmatpush1.bf16.msra.mxu0 %v9507_v54  ;;  %7577 = vmatpush1.bf16.msra.mxu1 %v9509_v29  ;;  %v1042_v54 = vld [vmem:[%s13645_s1 + $0x1f78] sm:$0xff]  ;;  %v9620_v29 = vcombine.high %v1033_v48, %v1041_v55  ;;  %v9923_v12 = vld [vmem:[%s13648_s3 + $0x34] ss:$24 sps:$4 sm:$0xff]   ;;  %v9945_v28 = vld [vmem:[%s13648_s3 + $0xf0] ss:$24 sps:$4 sm:$0xff]  }
 0x3e3   :  { %v13252_v7 = vadd.f32 %v7628_v1, %v7614_v63  ;;  %7414 = vmatprep.subr.bf16.mxu0 %v9524_v56  ;;  %7578 = vmatprep.subr.bf16.mxu1 %v9526_v60  ;;  %v9622_v56 = vcombine.high %v1034_v51, %v1042_v54  ;;  %v1049_v60 = vld [vmem:[%s13645_s1 + $0x1fb0] sm:$0xff]  ;;  %v1058_v63 = vld [vmem:[%s13645_s1 + $0x1ff8] sm:$0xff]  ;;  %v9619_v1 = vcombine.low %v1033_v48, %v1041_v55  ;;  %v9956_v34 = vld [vmem:[%s13648_s3 + $0x12c] ss:$24 sps:$4 sm:$0xff]  }
 0x3e4   :  { %v9621_v3 = vcombine.low %v1034_v51, %v1042_v54  ;;  %v9636_v4 = vcombine.high %v1049_v60, %v1057_v0  ;;  %v9915_v11 = vld [vmem:[%s13648_s3] ss:$24 sps:$4 sm:$0xff]   ;;  %v9935_v20 = vld [vmem:[%s13648_s3 + $0x94] ss:$24 sps:$4 sm:$0xff]   ;;  %v9957_v37 = vld [vmem:[%s13648_s3 + $0x150] ss:$24 sps:$4 sm:$0xff]   ;;  %v1114_v48 = vrot.slane %v13193_v2, %v12381_v16  ;;  %v1118_v55 = vrot.slane %v13193_v2, %v12390_v41 }
 0x3e5   :  { %v9927_v18 = vld [vmem:[%s13648_s3 + $0x60] ss:$24 sps:$4 sm:$0xff]   ;;  %v9938_v21 = vld [vmem:[%s13648_s3 + $0x9c] ss:$24 sps:$4 sm:$0xff]   ;;  %v1122_v51 = vrot.slane %v13193_v2, %v1089_v44 }
 0x3e6   :  { %7415 = vmatpush1.bf16.msra.mxu0 %v9523_v6  ;;  %7579 = vmatpush1.bf16.msra.mxu1 %v9525_v30  ;;  %v9638_v6 = vcombine.high %v1050_v61, %v1058_v63  ;;  %v9635_v30 = vcombine.low %v1049_v60, %v1057_v0  ;;  %v9947_v27 = vld [vmem:[%s13648_s3 + $0xf4] ss:$24 sps:$4 sm:$0xff]   ;;  %v9954_v47 = vld [vmem:[%s13648_s3 + $0x128] ss:$24 sps:$4 sm:$0xff]  }
 0x3e7   :  { %7416 = vmatprep.subr.bf16.mxu0 %v9540_v8  ;;  %7580 = vmatprep.subr.bf16.mxu1 %v9542_v9  ;;  %v9637_v8 = vcombine.low %v1050_v61, %v1058_v63  ;;  %v9917_v9 = vld [vmem:[%s13648_s3 + $0x4] ss:$24 sps:$4 sm:$0xff]   ;;  %v9959_v36 = vld [vmem:[%s13648_s3 + $0x154] ss:$24 sps:$4 sm:$0xff]  }
 0x3ea   :  { %7417 = vmatpush1.bf16.msra.mxu0 %v9539_v13  ;;  %7581 = vmatpush1.bf16.msra.mxu1 %v9541_v38  ;;  %v9926_v13 = vld [vmem:[%s13648_s3 + $0x3c] ss:$24 sps:$4 sm:$0xff]   ;;  %v9921_v38 = vld [vmem:[%s13648_s3 + $0x30] ss:$24 sps:$4 sm:$0xff]  }
 0x3eb   :  { %7418 = vmatprep.subr.bf16.mxu0 %v9556_v14  ;;  %7582 = vmatprep.subr.bf16.mxu1 %v9558_v15  ;;  %v9924_v14 = vld [vmem:[%s13648_s3 + $0x38] ss:$24 sps:$4 sm:$0xff]   ;;  %v9929_v15 = vld [vmem:[%s13648_s3 + $0x64] ss:$24 sps:$4 sm:$0xff]  }
 0x3ee   :  { %7419 = vmatpush1.bf16.msra.mxu0 %v9555_v22  ;;  %7583 = vmatpush1.bf16.msra.mxu1 %v9557_v23  ;;  %v9933_v22 = vld [vmem:[%s13648_s3 + $0x90] ss:$24 sps:$4 sm:$0xff]  }
 0x3ef   :  { %7420 = vmatprep.subr.bf16.mxu0 %v9572_v58  ;;  %7584 = vmatprep.subr.bf16.mxu1 %v9574_v17  ;;  %v9936_v23 = vld [vmem:[%s13648_s3 + $0x98] ss:$24 sps:$4 sm:$0xff]   ;;  %v9941_v58 = vld [vmem:[%s13648_s3 + $0xc4] ss:$24 sps:$4 sm:$0xff]  }
 0x3f0   :  { %v9939_v17 = vld [vmem:[%s13648_s3 + $0xc0] ss:$24 sps:$4 sm:$0xff]  }
 0x3f2   :  { %7421 = vmatpush1.bf16.msra.mxu0 %v9571_v31  ;;  %7585 = vmatpush1.bf16.msra.mxu1 %v9573_v32  ;;  %v9950_v31 = vld [vmem:[%s13648_s3 + $0xfc] ss:$24 sps:$4 sm:$0xff]   ;;  %v9948_v32 = vld [vmem:[%s13648_s3 + $0xf8] ss:$24 sps:$4 sm:$0xff]  }
 0x3f3   :  { %7422 = vmatprep.subr.bf16.mxu0 %v9588_v33  ;;  %7586 = vmatprep.subr.bf16.mxu1 %v9590_v25  ;;  %v9953_v33 = vld [vmem:[%s13648_s3 + $0x124] ss:$24 sps:$4 sm:$0xff]   ;;  %v9951_v25 = vld [vmem:[%s13648_s3 + $0x120] ss:$24 sps:$4 sm:$0xff]  }
 0x3f6   :  { %7423 = vmatpush1.bf16.msra.mxu0 %v9587_v39  ;;  %7587 = vmatpush1.bf16.msra.mxu1 %v9589_v40  ;;  %v9962_v39 = vld [vmem:[%s13648_s3 + $0x15c] ss:$24 sps:$4 sm:$0xff]   ;;  %v9960_v40 = vld [vmem:[%s13648_s3 + $0x158] ss:$24 sps:$4 sm:$0xff]  }
 0x3f7   :  { %7424 = vmatprep.subr.bf16.mxu0 %v9604_v43  ;;  %7588 = vmatprep.subr.bf16.mxu1 %v9606_v45  ;;  %v9965_v43 = vld [vmem:[%s13648_s3 + $0x14] ss:$24 sps:$4 sm:$0xff]   ;;  %v9987_v45 = vld [vmem:[%s13649_s5 + $0x40] sm:$0xff]  }
 0x3fa   :  { %7425 = vmatpush1.bf16.msra.mxu0 %v9603_v52  ;;  %7589 = vmatpush1.bf16.msra.mxu1 %v9605_v62 }
 0x3fb   :  { %7426 = vmatprep.subr.bf16.mxu0 %v9620_v29  ;;  %7590 = vmatprep.subr.bf16.mxu1 %v9622_v56  ;;  %v1126_v56 = vrot.slane %v13193_v2, %v1093_v59  ;;  %v9963_v59 = vld [vmem:[%s13648_s3 + $0x10] ss:$24 sps:$4 sm:$0xff]  }
 0x3fe   :  { %7427 = vmatpush1.bf16.msra.mxu0 %v9619_v1  ;;  %7591 = vmatpush1.bf16.msra.mxu1 %v9621_v3 }
 0x3ff   :  { %7428 = vmatprep.subr.bf16.mxu0 %v9636_v4  ;;  %7592 = vmatprep.subr.bf16.mxu1 %v9638_v6 }
 0x402   :  { %7429 = vmatpush1.bf16.msra.mxu0 %v9635_v30  ;;  %7593 = vmatpush1.bf16.msra.mxu1 %v9637_v8 }
 0x403   :  { %7956 = vmatprep.subr.bf16.mxu0 %v9917_v9  ;;  %7997 = vmatprep.subr.bf16.mxu1 %v9920_v10 }
 0x405   :  { %7431 = vmatmul.mubr.bf16.vlgmr.msra.gmra.mrb[12].mxu0 %v10931_v5  ;;  %7595 = vmatmul.mubr.bf16.vlgmr.msra.gmra.mrb[12].mxu1 %v10931_v5  ;;  %v9932_v5 = vld [vmem:[%s13648_s3 + $0x6c] ss:$24 sps:$4 sm:$0xff]  }
 0x406   :  { %7957 = vmatpush1.bf16.msra.mxu0 %v9915_v11  ;;  %7998 = vmatpush1.bf16.msra.mxu1 %v9918_v46 }
 0x407   :  { %7958 = vmatprep.subr.bf16.mxu0 %v9923_v12  ;;  %7999 = vmatprep.subr.bf16.mxu1 %v9926_v13  ;;  %v9968_v13 = vld [vmem:[%s13648_s3 + $0x44] ss:$24 sps:$4 sm:$0xff]  }
 0x408   :  { %7988 = vmatprep.mubr.bf16.mxu0 %v10036_v57  ;;  %8029 = vmatprep.mubr.bf16.mxu1 %v10036_v57 }
 0x40a   :  { %7959 = vmatpush1.bf16.msra.mxu0 %v9921_v38  ;;  %8000 = vmatpush1.bf16.msra.mxu1 %v9924_v14  ;;  %v9991_v38 = vld [vmem:[%s13649_s5 + $0x48] sm:$0xff]   ;;  %v9966_v14 = vld [vmem:[%s13648_s3 + $0x40] ss:$24 sps:$4 sm:$0xff]  }
 0x40b   :  { %7960 = vmatprep.subr.bf16.mxu0 %v9929_v15  ;;  %8001 = vmatprep.subr.bf16.mxu1 %v9932_v5  ;;  %v9971_v15 = vld [vmem:[%s13648_s3 + $0x74] ss:$24 sps:$4 sm:$0xff]  }
 0x40c   :  { %v9992_v5 = vld [vmem:[%s13649_s5 + $0x8] sm:$0xff]  }
 0x40e   :  { %7961 = vmatpush1.bf16.msra.mxu0 %v9927_v18  ;;  %8002 = vmatpush1.bf16.msra.mxu1 %v9930_v19  ;;  %v9995_v18 = vld [vmem:[%s13649_s5 + $0x50] sm:$0xff]   ;;  %v9974_v19 = vld [vmem:[%s13648_s3 + $0xa4] ss:$24 sps:$4 sm:$0xff]  }
 0x40f   :  { %7962 = vmatprep.subr.bf16.mxu0 %v9935_v20  ;;  %8003 = vmatprep.subr.bf16.mxu1 %v9938_v21  ;;  %v9996_v20 = vld [vmem:[%s13649_s5 + $0x10] sm:$0xff]   ;;  %v9999_v21 = vld [vmem:[%s13649_s5 + $0x58] sm:$0xff]  }
 0x412   :  { %7963 = vmatpush1.bf16.msra.mxu0 %v9933_v22  ;;  %8004 = vmatpush1.bf16.msra.mxu1 %v9936_v23  ;;  %v9972_v22 = vld [vmem:[%s13648_s3 + $0xa0] ss:$24 sps:$4 sm:$0xff]   ;;  %v9977_v23 = vld [vmem:[%s13648_s3 + $0xd4] ss:$24 sps:$4 sm:$0xff]  }
 0x413   :  { %7964 = vmatprep.subr.bf16.mxu0 %v9941_v58  ;;  %8005 = vmatprep.subr.bf16.mxu1 %v9944_v24  ;;  %v10000_v58 = vld [vmem:[%s13649_s5 + $0x18] sm:$0xff]   ;;  %v9975_v24 = vld [vmem:[%s13648_s3 + $0xd0] ss:$24 sps:$4 sm:$0xff]  }
 0x416   :  { %7965 = vmatpush1.bf16.msra.mxu0 %v9939_v17  ;;  %8006 = vmatpush1.bf16.msra.mxu1 %v9942_v26  ;;  %v10003_v17 = vld [vmem:[%s13649_s5 + $0x60] sm:$0xff]  }
 0x417   :  { %7966 = vmatprep.subr.bf16.mxu0 %v9947_v27  ;;  %8007 = vmatprep.subr.bf16.mxu1 %v9950_v31  ;;  %v9980_v26 = vld [vmem:[%s13648_s3 + $0x104] ss:$24 sps:$4 sm:$0xff]   ;;  %v9978_v31 = vld [vmem:[%s13648_s3 + $0x100] ss:$24 sps:$4 sm:$0xff]  }
 0x418   :  { %v10004_v27 = vld [vmem:[%s13649_s5 + $0x20] sm:$0xff]  }
 0x41a   :  { %7967 = vmatpush1.bf16.msra.mxu0 %v9945_v28  ;;  %8008 = vmatpush1.bf16.msra.mxu1 %v9948_v32  ;;  %v10007_v28 = vld [vmem:[%s13649_s5 + $0x68] sm:$0xff]  }
 0x41b   :  { %7968 = vmatprep.subr.bf16.mxu0 %v9953_v33  ;;  %8009 = vmatprep.subr.bf16.mxu1 %v9956_v34  ;;  %v9983_v32 = vld [vmem:[%s13648_s3 + $0x134] ss:$24 sps:$4 sm:$0xff]   ;;  %v9986_v34 = vld [vmem:[%s13648_s3 + $0x164] ss:$24 sps:$4 sm:$0xff]  }
 0x41c   :  { %v10008_v33 = vld [vmem:[%s13649_s5 + $0x28] sm:$0xff]  }
 0x41e   :  { %7969 = vmatpush1.bf16.msra.mxu0 %v9951_v25  ;;  %8010 = vmatpush1.bf16.msra.mxu1 %v9954_v47  ;;  %v9981_v25 = vld [vmem:[%s13648_s3 + $0x130] ss:$24 sps:$4 sm:$0xff]   ;;  %v9984_v47 = vld [vmem:[%s13648_s3 + $0x160] ss:$24 sps:$4 sm:$0xff]  }
 0x41f   :  { %7970 = vmatprep.subr.bf16.mxu0 %v9959_v36  ;;  %8011 = vmatprep.subr.bf16.mxu1 %v9962_v39  ;;  %v9989_v36 = vld [vmem:[%s13649_s5 + $0xc0] sm:$0xff]   ;;  %v9993_v39 = vld [vmem:[%s13649_s5 + $0xc8] sm:$0xff]  }
 0x422   :  { %7971 = vmatpush1.bf16.msra.mxu0 %v9957_v37  ;;  %8012 = vmatpush1.bf16.msra.mxu1 %v9960_v40  ;;  %v9990_v37 = vld [vmem:[%s13649_s5 + $0x80] sm:$0xff]   ;;  %v9994_v40 = vld [vmem:[%s13649_s5 + $0x88] sm:$0xff]  }
 0x423   :  { %8038 = vmatprep.subr.bf16.mxu0 %v9965_v43  ;;  %9736 = vmatprep.subr.bf16.mxu1 %v9987_v45  ;;  %v9997_v43 = vld [vmem:[%s13649_s5 + $0xd0] sm:$0xff]  }
 0x424   :  { %v9998_v45 = vld [vmem:[%s13649_s5 + $0x90] sm:$0xff]  }
 0x4d8   :  { %v7432_v54 = vpop.f32.mrb[12].mxu0  ;;  %v7596_v62 = vpop.f32.mrb[12].mxu1 }
 0x4d9   :  { %v9814_v52 = vadd.f32 %v7432_v54, %v1114_v48  ;;  %v7434_v29 = vpop.f32.mrb[13].mxu0  ;;  %v7598_v0 = vpop.f32.mrb[13].mxu1  ;;  %v9816_v1 = vadd.f32 %v7596_v62, %v1122_v51  ;;  %v10001_v48 = vld [vmem:[%s13649_s5 + $0xd8] sm:$0xff]   ;;  %v10005_v51 = vld [vmem:[%s13649_s5 + $0xe0] sm:$0xff]   ;;  %v10010_v62 = vld [vmem:[%s13649_s5 + $0xa8] sm:$0xff]  }
 0x4da   :  { %v9815_v60 = vadd.f32 %v7434_v29, %v1118_v55  ;;  %v7436_v61 = vpop.f32.mrb[14].mxu0  ;;  %v7600_v3 = vpop.f32.mrb[14].mxu1  ;;  %v9817_v44 = vadd.f32 %v7598_v0, %v1126_v56  ;;  %v10002_v55 = vld [vmem:[%s13649_s5 + $0x98] sm:$0xff]   ;;  %v10006_v54 = vld [vmem:[%s13649_s5 + $0xa0] sm:$0xff]   ;;  %v10011_v29 = vld [vmem:[%s13649_s5 + $0x70] sm:$0xff]  }
 0x4db   :  { %v7615_v63 = vmax.f32 %v9814_v52, 0.0  ;;  %v7437_v4 = vpop.f32.mrb[15].mxu0  ;;  %v7601_v30 = vpop.f32.mrb[15].mxu1  ;;  %v7617_v9 = vmax.f32 %v9816_v1, 0.0  ;;  %v10009_v52 = vld [vmem:[%s13649_s5 + $0xe8] sm:$0xff]   ;;  %v10012_v56 = vld [vmem:[%s13649_s5 + $0x30] sm:$0xff]  }
 0x4dc   :  { %v7616_v6 = vmax.f32 %v9815_v60, 0.0  ;;  %v7618_v11 = vmax.f32 %v9817_v44, 0.0  ;;  %v10013_v60 = vld [vmem:[%s13649_s5 + $0xf0] sm:$0xff]   ;;  %v10015_v61 = vld [vmem:[%s13649_s5 + $0x78] sm:$0xff]   ;;  %v10019_v4 = vld [vmem:[%s13649_s5 + $0x140] sm:$0xff]  }
 0x4dd   :  { %v7630_v8 = vadd.f32 %v13252_v7, %v7615_v63  ;;  %v9988_v7 = vld [vmem:[%s13649_s5] sm:$0xff]   ;;  %v10014_v0 = vld [vmem:[%s13649_s5 + $0xb0] sm:$0xff]   ;;  %v10016_v63 = vld [vmem:[%s13649_s5 + $0x38] sm:$0xff]  }
 0x4de   :  { %v10017_v1 = vld [vmem:[%s13649_s5 + $0xf8] sm:$0xff]  }
 0x4df   :  { %v7631_v10 = vadd.f32 %v7630_v8, %v7616_v6  ;;  %v10018_v3 = vld [vmem:[%s13649_s5 + $0xb8] sm:$0xff]   ;;  %v7684_v6 = vld [vmem:[%s13650_s4] sm:$0x3f] }
 0x4e0   :  { %v7689_v30 = vrot.slane %v7684_v6, %v11576_v42  ;;  %v7697_v8 = vrot.slane %v7684_v6, %v11588_v49  ;;  %v7693_v44 = vrot.slane %v7684_v6, %v11591_v50 }
 0x4e1   :  { %v7632_v46 = vadd.f32 %v7631_v10, %v7617_v9  ;;  %v7701_v9 = vrot.slane %v7684_v6, %v11594_v53  ;;  %v10020_v53 = vld [vmem:[%s13649_s5 + $0x100] sm:$0xff]  }
 0x4e3   :  { %v7633_v12 = vadd.f32 %v7632_v46, %v7618_v11 }
 0x4e5   :  { %v7634_v35 = vmul.f32 0.0625, %v7633_v12 }
 0x4e7   :  { %v7635_v2 = vpack.c.bf16 %v7634_v35, %v7634_v35 }
 0x4e9   :  { %7989 = vmatmul.mubr.bf16.vlgmr.msra.gmra.mrb[16].mxu0 %v7635_v2  ;;  %8030 = vmatmul.mubr.bf16.vlgmr.msra.gmra.mrb[16].mxu1 %v7635_v2 }
 0x4ea   :  { %8039 = vmatpush1.bf16.msra.mxu0 %v9963_v59  ;;  %8070 = vmatprep.mubr.bf16.mxu0 %v10036_v57  ;;  %v9969_v57 = vld [vmem:[%s13648_s3 + $0x70] ss:$24 sps:$4 sm:$0xff]  }
 0x4eb   :  { %8040 = vmatprep.subr.bf16.mxu0 %v9968_v13  ;;  %9737 = vmatpush3.bf16.msra.mxu1 %v9988_v7 }
 0x4ec   :  { %9738 = vmatprep.subr.bf16.mxu1 %v9991_v38 }
 0x4ee   :  { %8041 = vmatpush1.bf16.msra.mxu0 %v9966_v14 }
 0x4ef   :  { %8042 = vmatprep.subr.bf16.mxu0 %v9971_v15  ;;  %9739 = vmatpush3.bf16.msra.mxu1 %v9992_v5 }
 0x4f0   :  { %9740 = vmatprep.subr.bf16.mxu1 %v9995_v18 }
 0x4f2   :  { %8043 = vmatpush1.bf16.msra.mxu0 %v9969_v57 }
 0x4f3   :  { %8044 = vmatprep.subr.bf16.mxu0 %v9974_v19  ;;  %9741 = vmatpush3.bf16.msra.mxu1 %v9996_v20 }
 0x4f4   :  { %9742 = vmatprep.subr.bf16.mxu1 %v9999_v21  ;;  %v10021_v21 = vld [vmem:[%s13649_s5 + $0x148] sm:$0xff]  }
 0x4f6   :  { %8045 = vmatpush1.bf16.msra.mxu0 %v9972_v22  ;;  %v10022_v22 = vld [vmem:[%s13649_s5 + $0x108] sm:$0xff]  }
 0x4f7   :  { %8046 = vmatprep.subr.bf16.mxu0 %v9977_v23  ;;  %9743 = vmatpush3.bf16.msra.mxu1 %v10000_v58  ;;  %v10023_v23 = vld [vmem:[%s13649_s5 + $0x150] sm:$0xff]  }
 0x4f8   :  { %9744 = vmatprep.subr.bf16.mxu1 %v10003_v17  ;;  %v10024_v58 = vld [vmem:[%s13649_s5 + $0x110] sm:$0xff]   ;;  %v10025_v17 = vld [vmem:[%s13649_s5 + $0x158] sm:$0xff]  }
 0x4fa   :  { %8047 = vmatpush1.bf16.msra.mxu0 %v9975_v24  ;;  %v10026_v24 = vld [vmem:[%s13649_s5 + $0x118] sm:$0xff]  }
 0x4fb   :  { %8048 = vmatprep.subr.bf16.mxu0 %v9980_v26  ;;  %9745 = vmatpush3.bf16.msra.mxu1 %v10004_v27  ;;  %v10027_v26 = vld [vmem:[%s13649_s5 + $0x160] sm:$0xff]  }
 0x4fc   :  { %9746 = vmatprep.subr.bf16.mxu1 %v10007_v28  ;;  %v10028_v27 = vld [vmem:[%s13649_s5 + $0x120] sm:$0xff]   ;;  %v10029_v28 = vld [vmem:[%s13649_s5 + $0x168] sm:$0xff]  }
 0x4fe   :  { %8049 = vmatpush1.bf16.msra.mxu0 %v9978_v31  ;;  %v10030_v31 = vld [vmem:[%s13649_s5 + $0x128] sm:$0xff]  }
 0x4ff   :  { %8050 = vmatprep.subr.bf16.mxu0 %v9983_v32  ;;  %9747 = vmatpush3.bf16.msra.mxu1 %v10008_v33  ;;  %v10031_v32 = vld [vmem:[%s13649_s5 + $0x170] sm:$0xff]   ;;  %v7705_v33 = vrot.slane %v7684_v6, %v12381_v16  ;;  %v10034_v16 = vld [vmem:[%s13649_s5 + $0x138] sm:$0xff]  }
 0x500   :  { %9748 = vmatprep.subr.bf16.mxu1 %v10011_v29 }
 0x502   :  { %8051 = vmatpush1.bf16.msra.mxu0 %v9981_v25  ;;  %v7709_v25 = vrot.slane %v7684_v6, %v12390_v41 }
 0x503   :  { %8052 = vmatprep.subr.bf16.mxu0 %v9986_v34  ;;  %9749 = vmatpush3.bf16.msra.mxu1 %v10012_v56  ;;  %v10032_v34 = vld [vmem:[%s13649_s5 + $0x130] sm:$0xff]  }
 0x504   :  { %9750 = vmatprep.subr.bf16.mxu1 %v10015_v61 }
 0x506   :  { %8053 = vmatpush1.bf16.msra.mxu0 %v9984_v47  ;;  %v10033_v47 = vld [vmem:[%s13649_s5 + $0x178] sm:$0xff]  }
 0x507   :  { %9758 = vmatprep.subr.bf16.mxu0 %v9989_v36  ;;  %9751 = vmatpush3.bf16.msra.mxu1 %v10016_v63 }
 0x508   :  { %9780 = vmatprep.subr.bf16.mxu1 %v10019_v4 }
 0x509   :  { %8071 = vmatmul.mubr.bf16.vlgmr.msra.gmra.mrb[20].mxu0 %v7635_v2 }
 0x50a   :  { %9759 = vmatpush3.bf16.msra.mxu0 %v9990_v37 }
 0x50b   :  { %9760 = vmatprep.subr.bf16.mxu0 %v9993_v39 }
 0x50e   :  { %9761 = vmatpush3.bf16.msra.mxu0 %v9994_v40 }
 0x50f   :  { %9762 = vmatprep.subr.bf16.mxu0 %v9997_v43 }
 0x512   :  { %9763 = vmatpush3.bf16.msra.mxu0 %v9998_v45 }
 0x513   :  { %9764 = vmatprep.subr.bf16.mxu0 %v10001_v48 }
 0x516   :  { %9765 = vmatpush3.bf16.msra.mxu0 %v10002_v55 }
 0x517   :  { %9766 = vmatprep.subr.bf16.mxu0 %v10005_v51 }
 0x51a   :  { %9767 = vmatpush3.bf16.msra.mxu0 %v10006_v54 }
 0x51b   :  { %9768 = vmatprep.subr.bf16.mxu0 %v10009_v52 }
 0x51e   :  { %9769 = vmatpush3.bf16.msra.mxu0 %v10010_v62  ;;  %v9687_v62 = vld [vmem:[%s13651_s6] ss:$0 sm:$0xff] }
 0x51f   :  { %9770 = vmatprep.subr.bf16.mxu0 %v10013_v60 }
 0x522   :  { %9771 = vmatpush3.bf16.msra.mxu0 %v10014_v0 }
 0x523   :  { %9772 = vmatprep.subr.bf16.mxu0 %v10017_v1 }
 0x526   :  { %9773 = vmatpush3.bf16.msra.mxu0 %v10018_v3 }
 0x5bc   :  { %v7990_v10 = vpop.f32.mrb[16].mxu0  ;;  %v8031_v11 = vpop.f32.mrb[16].mxu1 }
 0x5bd   :  { %v7991_v46 = vadd.f32 %v7990_v10, %v7689_v30  ;;  %v8032_v12 = vadd.f32 %v8031_v11, %v7697_v8  ;;  %v7992_v35 = vpop.f32.mrb[17].mxu0  ;;  %v8033_v59 = vpop.f32.mrb[17].mxu1 }
 0x5be   :  { %v7993_v2 = vadd.f32 %v7992_v35, %v7693_v44  ;;  %v8034_v13 = vadd.f32 %v8033_v59, %v7701_v9  ;;  %v7994_v7 = vpop.f32.mrb[18].mxu0  ;;  %v8035_v38 = vpop.f32.mrb[18].mxu1 }
 0x5bf   :  { %v8079_v14 = vmax.f32 %v7991_v46, 0.0  ;;  %v8081_v15 = vmax.f32 %v8032_v12, 0.0  ;;  %v7995_v5 = vpop.f32.mrb[19].mxu0  ;;  %v8036_v42 = vpop.f32.mrb[19].mxu1 }
 0x5c0   :  { %v8080_v18 = vmax.f32 %v7993_v2, 0.0  ;;  %v8082_v49 = vmax.f32 %v8034_v13, 0.0 }
 0x5c1   :  { %v8085_v19 = vpack.c.bf16 %v8079_v14, %v8079_v14  ;;  %v8087_v20 = vpack.c.bf16 %v8081_v15, %v8081_v15 }
 0x5c2   :  { %v8086_v57 = vpack.c.bf16 %v8080_v18, %v8080_v18  ;;  %v8088_v50 = vpack.c.bf16 %v8082_v49, %v8082_v49 }
 0x5c4   :  { %8514 = vmatprep.mubr.bf16.mxu1 %v8086_v57  ;;  %8554 = vmatprep.mubr.bf16.mxu0 %v8088_v50 }
 0x5c5   :  { %8515 = vmatmul.mubr.bf16.vlgmr.msra.gmra.mrb[20].mxu1 %v8085_v19  ;;  %8555 = vmatmul.mubr.bf16.vlgmr.msra.gmra.mrb[24].mxu0 %v8087_v20 }
 0x5c6   :  { %9781 = vmatpush3.bf16.msra.mxu1 %v10020_v53 }
 0x5c7   :  { %9782 = vmatprep.subr.bf16.mxu1 %v10021_v21 }
 0x5ca   :  { %9783 = vmatpush3.bf16.msra.mxu1 %v10022_v22 }
 0x5cb   :  { %9784 = vmatprep.subr.bf16.mxu1 %v10023_v23 }
 0x5ce   :  { %9785 = vmatpush3.bf16.msra.mxu1 %v10024_v58 }
 0x5cf   :  { %9786 = vmatprep.subr.bf16.mxu1 %v10025_v17 }
 0x5d2   :  { %9787 = vmatpush3.bf16.msra.mxu1 %v10026_v24 }
 0x5d3   :  { %9788 = vmatprep.subr.bf16.mxu1 %v10027_v26 }
 0x5d6   :  { %9789 = vmatpush3.bf16.msra.mxu1 %v10028_v27 }
 0x5d7   :  { %9790 = vmatprep.subr.bf16.mxu1 %v10029_v28 }
 0x5da   :  { %9791 = vmatpush3.bf16.msra.mxu1 %v10030_v31 }
 0x5db   :  { %9792 = vmatprep.subr.bf16.mxu1 %v10031_v32 }
 0x5dc   :  { %v8072_v36 = vpop.f32.mrb[20].mxu0 }
 0x5dd   :  { %v8073_v37 = vadd.f32 %v8072_v36, %v7705_v33  ;;  %v8074_v39 = vpop.f32.mrb[21].mxu0 }
 0x5de   :  { %v8075_v40 = vadd.f32 %v8074_v39, %v7709_v25  ;;  %v8076_v43 = vpop.f32.mrb[22].mxu0  ;;  %9793 = vmatpush3.bf16.msra.mxu1 %v10032_v34 }
 0x5df   :  { %v8083_v41 = vmax.f32 %v8073_v37, 0.0  ;;  %v8077_v45 = vpop.f32.mrb[23].mxu0  ;;  %9794 = vmatprep.subr.bf16.mxu1 %v10033_v47 }
 0x5e0   :  { %v8084_v48 = vmax.f32 %v8075_v40, 0.0 }
 0x5e1   :  { %v8089_v51 = vpack.c.bf16 %v8083_v41, %v8083_v41 }
 0x5e2   :  { %v8090_v55 = vpack.c.bf16 %v8084_v48, %v8084_v48  ;;  %9795 = vmatpush3.bf16.msra.mxu1 %v10034_v16 }
 0x5e4   :  { %8594 = vmatprep.mubr.bf16.mxu1 %v8090_v55 }
 0x5e5   :  { %8595 = vmatmul.mubr.bf16.vlgmr.msra.gmra.mrb[24].mxu1 %v8089_v51 }
 0x698   :  { %v9752_v54 = vpop.f32.mrb[20].mxu1  ;;  %v9774_v52 = vpop.f32.mrb[24].mxu0 }
 0x699   :  { %v9753_v29 = vpop.f32.mrb[21].mxu1  ;;  %v9775_v56 = vpop.f32.mrb[25].mxu0 }
 0x69a   :  { %v9754_v60 = vadd.f32 %v9753_v29, %v9752_v54  ;;  %v9776_v0 = vadd.f32 %v9775_v56, %v9774_v52  ;;  %v9755_v61 = vpop.f32.mrb[22].mxu1  ;;  %v9777_v63 = vpop.f32.mrb[26].mxu0 }
 0x69b   :  { %v9756_v1 = vpop.f32.mrb[23].mxu1  ;;  %v9778_v3 = vpop.f32.mrb[27].mxu0 }
 0x69c   :  { %v8517_v4 = vadd.f32 %v9754_v60, %v9687_v62 }
 0x69e   :  { %v8557_v6 = vadd.f32 %v9776_v0, %v8517_v4 }
 0x6b8   :  { %v9796_v30 = vpop.f32.mrb[24].mxu1 }
 0x6b9   :  { %v9797_v8 = vpop.f32.mrb[25].mxu1 }
 0x6ba   :  { %v9798_v44 = vadd.f32 %v9797_v8, %v9796_v30  ;;  %v9799_v9 = vpop.f32.mrb[26].mxu1 }
 0x6bb   :  { %v9800_v10 = vpop.f32.mrb[27].mxu1 }
 0x6bc   :  { %v8597_v11 = vadd.f32 %v9798_v44, %v8557_v6 }
 0x6be   :  { %8602 = vst [vmem:[%s13652_s7] sm:$0xff] %v8597_v11 }

</bundles_post_ra>
